<compile_context>
chip_gen: v7x
topology: tpu7x:2x2x1
jax: 0.10.0
libtpu: 0.0.40
codegen_flags: <defaults>
</compile_context>

<pallas_src>
import functools

import jax
import jax.numpy as jnp
from jax import lax
from jax.experimental import pallas as pl
from jax.experimental.pallas import tpu as pltpu


def _round_up(v, m):
    return (v + m - 1) // m * m


# ----------------------------------------------------------------------------
# Fused ResidualGroup kernel: one grid step = one RCAB of one image.
# ----------------------------------------------------------------------------
def _residual_group_kernel(H, W, C, LEAD, res_scale, num_block, conv_dtype,
                           # inputs
                           x_ref, mask_ref,
                           w1_ref, b1_ref, w2_ref, b2_ref,
                           caw1_ref, cab1_ref, caw2_ref, cab2_ref,
                           wf_ref, bf_ref,
                           # output
                           o_ref,
                           # scratch
                           hp_ref, fp_ref):
    b = pl.program_id(1)
    W2 = W + 2
    HW2 = H * W2
    OFF = LEAD + W2            # flat row of padded pixel (1, 0); multiple of 8

    def conv3x3(src_ref, w_blk, bias):
        """'same' 3x3 conv as 9 accumulating (HW2, C) x (C, C) dots.

        src_ref is a zero-padded flat (ROWS, C) buffer.  Output row q = i*(W+2)+jp
        (output pixel (i, jp-1); jp in {0, W+1} are masked garbage columns) needs
        src row q + OFF + (dy-1)*W2 + (dx-1)  -> 9 *contiguous* row slices, no
        im2col buffer, no 2-D window extraction."""
        acc = jnp.zeros((HW2, C), jnp.float32)
        for k in range(9):
            dy, dx = divmod(k, 3)
            base = OFF + (dy - 1) * W2 + (dx - 1)
            patch = src_ref[pl.ds(base, HW2), :].astype(conv_dtype)
            acc = acc + jnp.dot(patch, w_blk[k * C:(k + 1) * C, :],
                                preferred_element_type=jnp.float32)
        return acc + bias

    mask = mask_ref[...]                                        # (HW2, 1) f32

    # --- first block of this image: load x into the padded carried buffer ------
    @pl.when(b == 0)
    def _init():
        hp_ref[...] = jnp.zeros_like(hp_ref)
        fp_ref[...] = jnp.zeros_like(fp_ref)
        # x arrives already width-padded & flattened -> one contiguous, aligned store.
        hp_ref[pl.ds(OFF, HW2), :] = x_ref[0].astype(jnp.float32)

    # resident stacked weights, indexed per block (no per-image re-streaming)
    w1 = w1_ref[b]                                              # (9C, C) conv_dtype
    w2 = w2_ref[b]
    b1 = b1_ref[b].astype(jnp.float32)                          # (1, C)
    b2 = b2_ref[b].astype(jnp.float32)

    # --- RCAB: conv3x3 -> ReLU -> conv3x3 -> channel attention -> residual ------
    f1 = jnp.maximum(conv3x3(hp_ref, w1, b1), 0.0)              # (HW2, C) f32
    # masked write: garbage columns land on fp's pad columns as zeros
    fp_ref[pl.ds(OFF, HW2), :] = (f1 * mask).astype(fp_ref.dtype)
    f2 = conv3x3(fp_ref, w2, b2) * mask                         # masked (HW2, C)

    # channel attention (tiny MLP, folded into the same kernel)
    pooled = jnp.sum(f2, axis=0, keepdims=True) * (1.0 / (H * W))      # (1, C)
    z = jnp.maximum(
        jnp.dot(pooled, caw1_ref[b], preferred_element_type=jnp.float32)
        + cab1_ref[b], 0.0)                                     # (1, Csq)
    y = jax.nn.sigmoid(
        jnp.dot(z, caw2_ref[b], preferred_element_type=jnp.float32)
        + cab2_ref[b])                                          # (1, C)

    h_old = hp_ref[pl.ds(OFF, HW2), :]                          # pad cols read as 0
    hp_ref[pl.ds(OFF, HW2), :] = f2 * y * res_scale + h_old     # pad cols rewritten 0

    # --- last block: trailing conv3x3 of the group + group-input residual -------
    @pl.when(b == num_block - 1)
    def _final():
        f = conv3x3(hp_ref, wf_ref[...], bf_ref[...].astype(jnp.float32))
        o_ref[0] = (f + x_ref[0].astype(jnp.float32)).astype(o_ref.dtype)


# ----------------------------------------------------------------------------
# Wrapper: NCHW in/out (PyTorch convention).
# ----------------------------------------------------------------------------
def residual_group_forward(x_nchw, params, res_scale=1.0, conv_dtype=jnp.bfloat16):
    N, C, H, W = x_nchw.shape
    num_block = len(params["blocks"])
    assert num_block >= 1
    Csq = params["blocks"][0]["caw1"].shape[-1]

    W2 = W + 2
    HW2 = H * W2
    LEAD = (-W2) % 8 or 8                   # >=1, and LEAD + W2 is a multiple of 8
    ROWS = _round_up(LEAD + (H + 2) * W2 + 1, 8)   # +1: last garbage-column tap read

    # NCHW -> NHWC -> zero-pad W by 1 each side -> flatten (H, W+2) rows.
    x = jnp.transpose(x_nchw, (0, 2, 3, 1))
    x_p = jnp.pad(x, ((0, 0), (0, 0), (1, 1), (0, 0))).reshape(N, HW2, C)

    def cast_w(w9):                          # (9, C, C) -> (9C, C) in conv_dtype
        return w9.reshape(9 * C, C).astype(conv_dtype)

    blocks = params["blocks"]
    w1s = jnp.stack([cast_w(bk["w1"]) for bk in blocks])                   # (B, 9C, C)
    b1s = jnp.stack([bk["b1"].astype(jnp.float32) for bk in blocks])       # (B, 1, C)
    w2s = jnp.stack([cast_w(bk["w2"]) for bk in blocks])
    b2s = jnp.stack([bk["b2"].astype(jnp.float32) for bk in blocks])
    caw1s = jnp.stack([bk["caw1"].astype(jnp.float32) for bk in blocks])   # (B, C, Csq)
    cab1s = jnp.stack([bk["cab1"].astype(jnp.float32) for bk in blocks])   # (B, 1, Csq)
    caw2s = jnp.stack([bk["caw2"].astype(jnp.float32) for bk in blocks])   # (B, Csq, C)
    cab2s = jnp.stack([bk["cab2"].astype(jnp.float32) for bk in blocks])   # (B, 1, C)
    wf = cast_w(params["wf"])                                              # (9C, C)
    bf = params["bf"].astype(jnp.float32)                                  # (1, C)

    # valid-column mask over the flat (H, W+2) output grid (jp in [1, W] is real)
    col = jnp.arange(HW2, dtype=jnp.int32) % W2
    mask = ((col >= 1) & (col <= W)).astype(jnp.float32).reshape(HW2, 1)

    kernel = functools.partial(_residual_group_kernel, H, W, C, LEAD,
                               float(res_scale), num_block, conv_dtype)

    def resident(arr):
        # whole array resident in VMEM for the entire grid (fetched once)
        return pl.BlockSpec(arr.shape, lambda *_: (0,) * arr.ndim)

    in_specs = [
        pl.BlockSpec((1, HW2, C), lambda n, b: (n, 0, 0)),   # x (resident over b)
        resident(mask),
        resident(w1s), resident(b1s), resident(w2s), resident(b2s),
        resident(caw1s), resident(cab1s), resident(caw2s), resident(cab2s),
        resident(wf), resident(bf),
    ]
    out_spec = pl.BlockSpec((1, HW2, C), lambda n, b: (n, 0, 0))

    scratch = [
        pltpu.VMEM((ROWS, C), jnp.float32),    # hp: carried h (zero padded, f32)
        pltpu.VMEM((ROWS, C), conv_dtype),     # fp: conv1 output (zero padded)
    ]

    flops = 2 * N * (2 * num_block + 1) * HW2 * (9 * C) * C
    param_bytes = sum(int(a.size) * a.dtype.itemsize for a in
                      (w1s, b1s, w2s, b2s, caw1s, cab1s, caw2s, cab2s, wf, bf))
    bytes_accessed = 2 * int(x_p.size) * x_p.dtype.itemsize + param_bytes
    cost = pl.CostEstimate(flops=int(flops),
                           transcendentals=int(N * num_block * C),
                           bytes_accessed=int(bytes_accessed))

    out = pl.pallas_call(
        kernel,
        out_shape=jax.ShapeDtypeStruct((N, HW2, C), x.dtype),
        grid_spec=pltpu.PrefetchScalarGridSpec(
            num_scalar_prefetch=0,
            grid=(N, num_block),
            in_specs=in_specs,
            out_specs=out_spec,
            scratch_shapes=scratch,
        ),
        compiler_params=pltpu.CompilerParams(
            dimension_semantics=("parallel", "arbitrary"),
            vmem_limit_bytes=48 * 1024 * 1024,
        ),
        cost_estimate=cost,
    )(x_p, mask, w1s, b1s, w2s, b2s, caw1s, cab1s, caw2s, cab2s, wf, bf)

    # drop the width-pad garbage columns, back to NCHW
    out = out.reshape(N, H, W2, C)[:, :, 1:W + 1, :]
    return jnp.transpose(out, (0, 3, 1, 2))


# ----------------------------------------------------------------------------
# Pure-JAX reference (for correctness check)
# ----------------------------------------------------------------------------
def _ref_conv3x3(x, w9, b):
    Cin, Cout = w9.shape[1], w9.shape[2]
    w = w9.reshape(3, 3, Cin, Cout)
    y = lax.conv_general_dilated(x, w, (1, 1), "SAME",
                                 dimension_numbers=("NHWC", "HWIO", "NHWC"))
    return y + b.reshape(1, 1, 1, Cout)


def _ref_residual_group(x_nchw, params, res_scale=1.0):
    x = jnp.transpose(x_nchw, (0, 2, 3, 1))
    h = x
    for blk in params["blocks"]:
        f = jnp.maximum(_ref_conv3x3(h, blk["w1"], blk["b1"]), 0.0)
        f = _ref_conv3x3(f, blk["w2"], blk["b2"])
        pooled = jnp.mean(f, axis=(1, 2))                                # (N, C)
        z = jnp.maximum(pooled @ blk["caw1"] + blk["cab1"], 0.0)
        y = jax.nn.sigmoid(z @ blk["caw2"] + blk["cab2"])                # (N, C)
        h = f * y[:, None, None, :] * res_scale + h
    out = _ref_conv3x3(h, params["wf"], params["bf"]) + x
    return jnp.transpose(out, (0, 3, 1, 2))


# ----------------------------------------------------------------------------
# Deterministic parameter init (synthetic)
# ----------------------------------------------------------------------------
def make_params(key, num_feat, num_block, squeeze_factor):
    csq = num_feat // squeeze_factor
    blocks = []
    for i in range(num_block):
        ks = jax.random.split(jax.random.fold_in(key, i), 8)
        blocks.append(dict(
            w1=jax.random.normal(ks[0], (9, num_feat, num_feat), jnp.float32) * 0.05,
            b1=jax.random.normal(ks[1], (1, num_feat), jnp.float32) * 0.05,
            w2=jax.random.normal(ks[2], (9, num_feat, num_feat), jnp.float32) * 0.05,
            b2=jax.random.normal(ks[3], (1, num_feat), jnp.float32) * 0.05,
            caw1=jax.random.normal(ks[4], (num_feat, csq), jnp.float32) * 0.1,
            cab1=jax.random.normal(ks[5], (1, csq), jnp.float32) * 0.1,
            caw2=jax.random.normal(ks[6], (csq, num_feat), jnp.float32) * 0.1,
            cab2=jax.random.normal(ks[7], (1, num_feat), jnp.float32) * 0.1,
        ))
    kf = jax.random.split(jax.random.fold_in(key, 1000), 2)
    return dict(
        blocks=blocks,
        wf=jax.random.normal(kf[0], (9, num_feat, num_feat), jnp.float32) * 0.05,
        bf=jax.random.normal(kf[1], (1, num_feat), jnp.float32) * 0.05,
    )


if __name__ == "__main__":
    num_feat = 8
    num_block = 2
    squeeze_factor = 4
    res_scale = 1.0
    N, H, W = 2, 16, 16

    key = jax.random.PRNGKey(0)
    kx, kp = jax.random.split(key)
    x = jax.random.normal(kx, (N, num_feat, H, W), jnp.float32)   # NCHW, like PyTorch
    params = make_params(kp, num_feat, num_block, squeeze_factor)

    ref = jax.block_until_ready(_ref_residual_group(x, params, res_scale))

    # f32 MXU path: exact check against the pure-JAX reference.
    out_f32 = jax.block_until_ready(
        residual_group_forward(x, params, res_scale, conv_dtype=jnp.float32))
    assert out_f32.shape == (N, num_feat, H, W)
    assert jnp.allclose(out_f32, ref, atol=1e-4, rtol=1e-4), "f32 mismatch vs reference"

    # default path: bf16 MXU operands, f32 accumulation and carried state.
    out_bf16 = jax.block_until_ready(residual_group_forward(x, params, res_scale))
    assert jnp.allclose(out_bf16, ref, atol=1e-1, rtol=1e-1), "bf16 mismatch vs reference"

    print("KERNEL_OK")
</pallas_src>

<mosaic_0001>
module attributes {stable_mosaic.version = 11 : i64} {
  func.func @_residual_group_kernel(%arg0: i32, %arg1: i32, %arg2: memref<1x288x8xf32, #tpu.memory_space<vmem>>, %arg3: memref<288x1xf32, #tpu.memory_space<vmem>>, %arg4: memref<2x72x8xf32, #tpu.memory_space<vmem>>, %arg5: memref<2x1x8xf32, #tpu.memory_space<vmem>>, %arg6: memref<2x72x8xf32, #tpu.memory_space<vmem>>, %arg7: memref<2x1x8xf32, #tpu.memory_space<vmem>>, %arg8: memref<2x8x2xf32, #tpu.memory_space<vmem>>, %arg9: memref<2x1x2xf32, #tpu.memory_space<vmem>>, %arg10: memref<2x2x8xf32, #tpu.memory_space<vmem>>, %arg11: memref<2x1x8xf32, #tpu.memory_space<vmem>>, %arg12: memref<72x8xf32, #tpu.memory_space<vmem>>, %arg13: memref<1x8xf32, #tpu.memory_space<vmem>>, %arg14: memref<1x288x8xf32, #tpu.memory_space<vmem>>, %arg15: memref<336x8xf32, #tpu.memory_space<vmem>>, %arg16: memref<336x8xf32, #tpu.memory_space<vmem>>) attributes {dimension_semantics = [#tpu.dimension_semantics<parallel>, #tpu.dimension_semantics<arbitrary>], iteration_bounds = array<i64: 2, 2>, scalar_prefetch = 0 : i64, scratch_operands = 2 : i64, tpu.core_type = #tpu.core_type<tc>, window_params = [{transform_indices = @transform_0, window_bounds = array<i64: 1, 288, 8>}, {pipeline_mode = #tpu.pipeline_mode<synchronous>, transform_indices = @transform_1, window_bounds = array<i64: 288, 1>}, {pipeline_mode = #tpu.pipeline_mode<synchronous>, transform_indices = @transform_2, window_bounds = array<i64: 2, 72, 8>}, {pipeline_mode = #tpu.pipeline_mode<synchronous>, transform_indices = @transform_3, window_bounds = array<i64: 2, 1, 8>}, {pipeline_mode = #tpu.pipeline_mode<synchronous>, transform_indices = @transform_4, window_bounds = array<i64: 2, 72, 8>}, {pipeline_mode = #tpu.pipeline_mode<synchronous>, transform_indices = @transform_5, window_bounds = array<i64: 2, 1, 8>}, {pipeline_mode = #tpu.pipeline_mode<synchronous>, transform_indices = @transform_6, window_bounds = array<i64: 2, 8, 2>}, {pipeline_mode = #tpu.pipeline_mode<synchronous>, transform_indices = @transform_7, window_bounds = array<i64: 2, 1, 2>}, {pipeline_mode = #tpu.pipeline_mode<synchronous>, transform_indices = @transform_8, window_bounds = array<i64: 2, 2, 8>}, {pipeline_mode = #tpu.pipeline_mode<synchronous>, transform_indices = @transform_9, window_bounds = array<i64: 2, 1, 8>}, {pipeline_mode = #tpu.pipeline_mode<synchronous>, transform_indices = @transform_10, window_bounds = array<i64: 72, 8>}, {pipeline_mode = #tpu.pipeline_mode<synchronous>, transform_indices = @transform_11, window_bounds = array<i64: 1, 8>}, {transform_indices = @transform_12, window_bounds = array<i64: 1, 288, 8>}]} {
    %c0 = arith.constant 0 : index
    %c0_0 = arith.constant 0 : index
    %0 = vector.load %arg3[%c0, %c0_0] : memref<288x1xf32, #tpu.memory_space<vmem>>, vector<288x1xf32>
    %c0_i32 = arith.constant 0 : i32
    %1 = arith.cmpi eq, %arg1, %c0_i32 : i32
    %2 = arith.extui %1 : i1 to i32
    %c0_i32_1 = arith.constant 0 : i32
    %3 = arith.cmpi ne, %2, %c0_i32_1 : i32
    scf.if %3 {
      %cst_79 = arith.constant 0.000000e+00 : f32
      %138 = vector.broadcast %cst_79 : f32 to vector<336x8xf32>
      %c0_80 = arith.constant 0 : index
      %c0_81 = arith.constant 0 : index
      %139 = vector.load %arg15[%c0_80, %c0_81] : memref<336x8xf32, #tpu.memory_space<vmem>>, vector<336x8xf32>
      tpu.vector_store %arg15[%c0_80, %c0_81], %138 {strides = array<i32>} : memref<336x8xf32, #tpu.memory_space<vmem>>, vector<336x8xf32>,
      %cst_82 = arith.constant 0.000000e+00 : f32
      %140 = vector.broadcast %cst_82 : f32 to vector<336x8xf32>
      %c0_83 = arith.constant 0 : index
      %c0_84 = arith.constant 0 : index
      %141 = vector.load %arg16[%c0_83, %c0_84] : memref<336x8xf32, #tpu.memory_space<vmem>>, vector<336x8xf32>
      tpu.vector_store %arg16[%c0_83, %c0_84], %140 {strides = array<i32>} : memref<336x8xf32, #tpu.memory_space<vmem>>, vector<336x8xf32>,
      %c0_85 = arith.constant 0 : index
      %c0_86 = arith.constant 0 : index
      %c0_87 = arith.constant 0 : index
      %142 = vector.load %arg2[%c0_85, %c0_86, %c0_87] : memref<1x288x8xf32, #tpu.memory_space<vmem>>, vector<1x288x8xf32>
      %143 = vector.shape_cast %142 : vector<1x288x8xf32> to vector<288x8xf32>
      %c24_88 = arith.constant 24 : index
      %c0_89 = arith.constant 0 : index
      %144 = vector.load %arg15[%c24_88, %c0_89] : memref<336x8xf32, #tpu.memory_space<vmem>>, vector<288x8xf32>
      tpu.vector_store %arg15[%c24_88, %c0_89], %143 {strides = array<i32>} : memref<336x8xf32, #tpu.memory_space<vmem>>, vector<288x8xf32>,
    } else {
    }
    %4 = arith.index_cast %arg1 : i32 to index
    %c0_2 = arith.constant 0 : index
    %c0_3 = arith.constant 0 : index
    %5 = vector.load %arg4[%4, %c0_2, %c0_3] : memref<2x72x8xf32, #tpu.memory_space<vmem>>, vector<1x72x8xf32>
    %6 = vector.shape_cast %5 : vector<1x72x8xf32> to vector<72x8xf32>
    %7 = arith.index_cast %arg1 : i32 to index
    %c0_4 = arith.constant 0 : index
    %c0_5 = arith.constant 0 : index
    %8 = vector.load %arg6[%7, %c0_4, %c0_5] : memref<2x72x8xf32, #tpu.memory_space<vmem>>, vector<1x72x8xf32>
    %9 = vector.shape_cast %8 : vector<1x72x8xf32> to vector<72x8xf32>
    %10 = arith.index_cast %arg1 : i32 to index
    %c0_6 = arith.constant 0 : index
    %c0_7 = arith.constant 0 : index
    %11 = vector.load %arg5[%10, %c0_6, %c0_7] : memref<2x1x8xf32, #tpu.memory_space<vmem>>, vector<1x1x8xf32>
    %12 = vector.shape_cast %11 : vector<1x1x8xf32> to vector<1x8xf32>
    %13 = arith.index_cast %arg1 : i32 to index
    %c0_8 = arith.constant 0 : index
    %c0_9 = arith.constant 0 : index
    %14 = vector.load %arg7[%13, %c0_8, %c0_9] : memref<2x1x8xf32, #tpu.memory_space<vmem>>, vector<1x1x8xf32>
    %15 = vector.shape_cast %14 : vector<1x1x8xf32> to vector<1x8xf32>
    %cst = arith.constant 0.000000e+00 : f32
    %16 = vector.broadcast %cst : f32 to vector<288x8xf32>
    %c5 = arith.constant 5 : index
    %c0_10 = arith.constant 0 : index
    %17 = vector.load %arg15[%c5, %c0_10] : memref<336x8xf32, #tpu.memory_space<vmem>>, vector<288x8xf32>
    %18 = vector.extract_strided_slice %6 {offsets = [0, 0], sizes = [8, 8], strides = [1, 1]} : vector<72x8xf32> to vector<8x8xf32>
    %cst_11 = arith.constant dense<0.000000e+00> : vector<288x8xf32>
    %19 = tpu.matmul %17, %18, %cst_11 {dimension_numbers = #tpu.dot_dimension_numbers<[1], [0], [0], [1], [0, 0, 1, 1], [], []>} : vector<288x8xf32>, vector<8x8xf32>, vector<288x8xf32> -> vector<288x8xf32>
    %20 = arith.addf %16, %19 : vector<288x8xf32>
    %c6 = arith.constant 6 : index
    %c0_12 = arith.constant 0 : index
    %21 = vector.load %arg15[%c6, %c0_12] : memref<336x8xf32, #tpu.memory_space<vmem>>, vector<288x8xf32>
    %22 = vector.extract_strided_slice %6 {offsets = [8, 0], sizes = [8, 8], strides = [1, 1]} : vector<72x8xf32> to vector<8x8xf32>
    %cst_13 = arith.constant dense<0.000000e+00> : vector<288x8xf32>
    %23 = tpu.matmul %21, %22, %cst_13 {dimension_numbers = #tpu.dot_dimension_numbers<[1], [0], [0], [1], [0, 0, 1, 1], [], []>} : vector<288x8xf32>, vector<8x8xf32>, vector<288x8xf32> -> vector<288x8xf32>
    %24 = arith.addf %20, %23 : vector<288x8xf32>
    %c7 = arith.constant 7 : index
    %c0_14 = arith.constant 0 : index
    %25 = vector.load %arg15[%c7, %c0_14] : memref<336x8xf32, #tpu.memory_space<vmem>>, vector<288x8xf32>
    %26 = vector.extract_strided_slice %6 {offsets = [16, 0], sizes = [8, 8], strides = [1, 1]} : vector<72x8xf32> to vector<8x8xf32>
    %cst_15 = arith.constant dense<0.000000e+00> : vector<288x8xf32>
    %27 = tpu.matmul %25, %26, %cst_15 {dimension_numbers = #tpu.dot_dimension_numbers<[1], [0], [0], [1], [0, 0, 1, 1], [], []>} : vector<288x8xf32>, vector<8x8xf32>, vector<288x8xf32> -> vector<288x8xf32>
    %28 = arith.addf %24, %27 : vector<288x8xf32>
    %c23 = arith.constant 23 : index
    %c0_16 = arith.constant 0 : index
    %29 = vector.load %arg15[%c23, %c0_16] : memref<336x8xf32, #tpu.memory_space<vmem>>, vector<288x8xf32>
    %30 = vector.extract_strided_slice %6 {offsets = [24, 0], sizes = [8, 8], strides = [1, 1]} : vector<72x8xf32> to vector<8x8xf32>
    %cst_17 = arith.constant dense<0.000000e+00> : vector<288x8xf32>
    %31 = tpu.matmul %29, %30, %cst_17 {dimension_numbers = #tpu.dot_dimension_numbers<[1], [0], [0], [1], [0, 0, 1, 1], [], []>} : vector<288x8xf32>, vector<8x8xf32>, vector<288x8xf32> -> vector<288x8xf32>
    %32 = arith.addf %28, %31 : vector<288x8xf32>
    %c24 = arith.constant 24 : index
    %c0_18 = arith.constant 0 : index
    %33 = vector.load %arg15[%c24, %c0_18] : memref<336x8xf32, #tpu.memory_space<vmem>>, vector<288x8xf32>
    %34 = vector.extract_strided_slice %6 {offsets = [32, 0], sizes = [8, 8], strides = [1, 1]} : vector<72x8xf32> to vector<8x8xf32>
    %cst_19 = arith.constant dense<0.000000e+00> : vector<288x8xf32>
    %35 = tpu.matmul %33, %34, %cst_19 {dimension_numbers = #tpu.dot_dimension_numbers<[1], [0], [0], [1], [0, 0, 1, 1], [], []>} : vector<288x8xf32>, vector<8x8xf32>, vector<288x8xf32> -> vector<288x8xf32>
    %36 = arith.addf %32, %35 : vector<288x8xf32>
    %c25 = arith.constant 25 : index
    %c0_20 = arith.constant 0 : index
    %37 = vector.load %arg15[%c25, %c0_20] : memref<336x8xf32, #tpu.memory_space<vmem>>, vector<288x8xf32>
    %38 = vector.extract_strided_slice %6 {offsets = [40, 0], sizes = [8, 8], strides = [1, 1]} : vector<72x8xf32> to vector<8x8xf32>
    %cst_21 = arith.constant dense<0.000000e+00> : vector<288x8xf32>
    %39 = tpu.matmul %37, %38, %cst_21 {dimension_numbers = #tpu.dot_dimension_numbers<[1], [0], [0], [1], [0, 0, 1, 1], [], []>} : vector<288x8xf32>, vector<8x8xf32>, vector<288x8xf32> -> vector<288x8xf32>
    %40 = arith.addf %36, %39 : vector<288x8xf32>
    %c41 = arith.constant 41 : index
    %c0_22 = arith.constant 0 : index
    %41 = vector.load %arg15[%c41, %c0_22] : memref<336x8xf32, #tpu.memory_space<vmem>>, vector<288x8xf32>
    %42 = vector.extract_strided_slice %6 {offsets = [48, 0], sizes = [8, 8], strides = [1, 1]} : vector<72x8xf32> to vector<8x8xf32>
    %cst_23 = arith.constant dense<0.000000e+00> : vector<288x8xf32>
    %43 = tpu.matmul %41, %42, %cst_23 {dimension_numbers = #tpu.dot_dimension_numbers<[1], [0], [0], [1], [0, 0, 1, 1], [], []>} : vector<288x8xf32>, vector<8x8xf32>, vector<288x8xf32> -> vector<288x8xf32>
    %44 = arith.addf %40, %43 : vector<288x8xf32>
    %c42 = arith.constant 42 : index
    %c0_24 = arith.constant 0 : index
    %45 = vector.load %arg15[%c42, %c0_24] : memref<336x8xf32, #tpu.memory_space<vmem>>, vector<288x8xf32>
    %46 = vector.extract_strided_slice %6 {offsets = [56, 0], sizes = [8, 8], strides = [1, 1]} : vector<72x8xf32> to vector<8x8xf32>
    %cst_25 = arith.constant dense<0.000000e+00> : vector<288x8xf32>
    %47 = tpu.matmul %45, %46, %cst_25 {dimension_numbers = #tpu.dot_dimension_numbers<[1], [0], [0], [1], [0, 0, 1, 1], [], []>} : vector<288x8xf32>, vector<8x8xf32>, vector<288x8xf32> -> vector<288x8xf32>
    %48 = arith.addf %44, %47 : vector<288x8xf32>
    %c43 = arith.constant 43 : index
    %c0_26 = arith.constant 0 : index
    %49 = vector.load %arg15[%c43, %c0_26] : memref<336x8xf32, #tpu.memory_space<vmem>>, vector<288x8xf32>
    %50 = vector.extract_strided_slice %6 {offsets = [64, 0], sizes = [8, 8], strides = [1, 1]} : vector<72x8xf32> to vector<8x8xf32>
    %cst_27 = arith.constant dense<0.000000e+00> : vector<288x8xf32>
    %51 = tpu.matmul %49, %50, %cst_27 {dimension_numbers = #tpu.dot_dimension_numbers<[1], [0], [0], [1], [0, 0, 1, 1], [], []>} : vector<288x8xf32>, vector<8x8xf32>, vector<288x8xf32> -> vector<288x8xf32>
    %52 = arith.addf %48, %51 : vector<288x8xf32>
    %53 = vector.broadcast %12 : vector<1x8xf32> to vector<288x8xf32>
    %54 = arith.addf %52, %53 : vector<288x8xf32>
    %cst_28 = arith.constant 0.000000e+00 : f32
    %55 = vector.broadcast %cst_28 : f32 to vector<288x8xf32>
    %56 = arith.maximumf %54, %55 : vector<288x8xf32>
    %57 = vector.broadcast %0 : vector<288x1xf32> to vector<288x8xf32>
    %58 = arith.mulf %56, %57 : vector<288x8xf32>
    %c24_29 = arith.constant 24 : index
    %c0_30 = arith.constant 0 : index
    %59 = vector.load %arg16[%c24_29, %c0_30] : memref<336x8xf32, #tpu.memory_space<vmem>>, vector<288x8xf32>
    tpu.vector_store %arg16[%c24_29, %c0_30], %58 {strides = array<i32>} : memref<336x8xf32, #tpu.memory_space<vmem>>, vector<288x8xf32>,
    %cst_31 = arith.constant 0.000000e+00 : f32
    %60 = vector.broadcast %cst_31 : f32 to vector<288x8xf32>
    %c5_32 = arith.constant 5 : index
    %c0_33 = arith.constant 0 : index
    %61 = vector.load %arg16[%c5_32, %c0_33] : memref<336x8xf32, #tpu.memory_space<vmem>>, vector<288x8xf32>
    %62 = vector.extract_strided_slice %9 {offsets = [0, 0], sizes = [8, 8], strides = [1, 1]} : vector<72x8xf32> to vector<8x8xf32>
    %cst_34 = arith.constant dense<0.000000e+00> : vector<288x8xf32>
    %63 = tpu.matmul %61, %62, %cst_34 {dimension_numbers = #tpu.dot_dimension_numbers<[1], [0], [0], [1], [0, 0, 1, 1], [], []>} : vector<288x8xf32>, vector<8x8xf32>, vector<288x8xf32> -> vector<288x8xf32>
    %64 = arith.addf %60, %63 : vector<288x8xf32>
    %c6_35 = arith.constant 6 : index
    %c0_36 = arith.constant 0 : index
    %65 = vector.load %arg16[%c6_35, %c0_36] : memref<336x8xf32, #tpu.memory_space<vmem>>, vector<288x8xf32>
    %66 = vector.extract_strided_slice %9 {offsets = [8, 0], sizes = [8, 8], strides = [1, 1]} : vector<72x8xf32> to vector<8x8xf32>
    %cst_37 = arith.constant dense<0.000000e+00> : vector<288x8xf32>
    %67 = tpu.matmul %65, %66, %cst_37 {dimension_numbers = #tpu.dot_dimension_numbers<[1], [0], [0], [1], [0, 0, 1, 1], [], []>} : vector<288x8xf32>, vector<8x8xf32>, vector<288x8xf32> -> vector<288x8xf32>
    %68 = arith.addf %64, %67 : vector<288x8xf32>
    %c7_38 = arith.constant 7 : index
    %c0_39 = arith.constant 0 : index
    %69 = vector.load %arg16[%c7_38, %c0_39] : memref<336x8xf32, #tpu.memory_space<vmem>>, vector<288x8xf32>
    %70 = vector.extract_strided_slice %9 {offsets = [16, 0], sizes = [8, 8], strides = [1, 1]} : vector<72x8xf32> to vector<8x8xf32>
    %cst_40 = arith.constant dense<0.000000e+00> : vector<288x8xf32>
    %71 = tpu.matmul %69, %70, %cst_40 {dimension_numbers = #tpu.dot_dimension_numbers<[1], [0], [0], [1], [0, 0, 1, 1], [], []>} : vector<288x8xf32>, vector<8x8xf32>, vector<288x8xf32> -> vector<288x8xf32>
    %72 = arith.addf %68, %71 : vector<288x8xf32>
    %c23_41 = arith.constant 23 : index
    %c0_42 = arith.constant 0 : index
    %73 = vector.load %arg16[%c23_41, %c0_42] : memref<336x8xf32, #tpu.memory_space<vmem>>, vector<288x8xf32>
    %74 = vector.extract_strided_slice %9 {offsets = [24, 0], sizes = [8, 8], strides = [1, 1]} : vector<72x8xf32> to vector<8x8xf32>
    %cst_43 = arith.constant dense<0.000000e+00> : vector<288x8xf32>
    %75 = tpu.matmul %73, %74, %cst_43 {dimension_numbers = #tpu.dot_dimension_numbers<[1], [0], [0], [1], [0, 0, 1, 1], [], []>} : vector<288x8xf32>, vector<8x8xf32>, vector<288x8xf32> -> vector<288x8xf32>
    %76 = arith.addf %72, %75 : vector<288x8xf32>
    %c24_44 = arith.constant 24 : index
    %c0_45 = arith.constant 0 : index
    %77 = vector.load %arg16[%c24_44, %c0_45] : memref<336x8xf32, #tpu.memory_space<vmem>>, vector<288x8xf32>
    %78 = vector.extract_strided_slice %9 {offsets = [32, 0], sizes = [8, 8], strides = [1, 1]} : vector<72x8xf32> to vector<8x8xf32>
    %cst_46 = arith.constant dense<0.000000e+00> : vector<288x8xf32>
    %79 = tpu.matmul %77, %78, %cst_46 {dimension_numbers = #tpu.dot_dimension_numbers<[1], [0], [0], [1], [0, 0, 1, 1], [], []>} : vector<288x8xf32>, vector<8x8xf32>, vector<288x8xf32> -> vector<288x8xf32>
    %80 = arith.addf %76, %79 : vector<288x8xf32>
    %c25_47 = arith.constant 25 : index
    %c0_48 = arith.constant 0 : index
    %81 = vector.load %arg16[%c25_47, %c0_48] : memref<336x8xf32, #tpu.memory_space<vmem>>, vector<288x8xf32>
    %82 = vector.extract_strided_slice %9 {offsets = [40, 0], sizes = [8, 8], strides = [1, 1]} : vector<72x8xf32> to vector<8x8xf32>
    %cst_49 = arith.constant dense<0.000000e+00> : vector<288x8xf32>
    %83 = tpu.matmul %81, %82, %cst_49 {dimension_numbers = #tpu.dot_dimension_numbers<[1], [0], [0], [1], [0, 0, 1, 1], [], []>} : vector<288x8xf32>, vector<8x8xf32>, vector<288x8xf32> -> vector<288x8xf32>
    %84 = arith.addf %80, %83 : vector<288x8xf32>
    %c41_50 = arith.constant 41 : index
    %c0_51 = arith.constant 0 : index
    %85 = vector.load %arg16[%c41_50, %c0_51] : memref<336x8xf32, #tpu.memory_space<vmem>>, vector<288x8xf32>
    %86 = vector.extract_strided_slice %9 {offsets = [48, 0], sizes = [8, 8], strides = [1, 1]} : vector<72x8xf32> to vector<8x8xf32>
    %cst_52 = arith.constant dense<0.000000e+00> : vector<288x8xf32>
    %87 = tpu.matmul %85, %86, %cst_52 {dimension_numbers = #tpu.dot_dimension_numbers<[1], [0], [0], [1], [0, 0, 1, 1], [], []>} : vector<288x8xf32>, vector<8x8xf32>, vector<288x8xf32> -> vector<288x8xf32>
    %88 = arith.addf %84, %87 : vector<288x8xf32>
    %c42_53 = arith.constant 42 : index
    %c0_54 = arith.constant 0 : index
    %89 = vector.load %arg16[%c42_53, %c0_54] : memref<336x8xf32, #tpu.memory_space<vmem>>, vector<288x8xf32>
    %90 = vector.extract_strided_slice %9 {offsets = [56, 0], sizes = [8, 8], strides = [1, 1]} : vector<72x8xf32> to vector<8x8xf32>
    %cst_55 = arith.constant dense<0.000000e+00> : vector<288x8xf32>
    %91 = tpu.matmul %89, %90, %cst_55 {dimension_numbers = #tpu.dot_dimension_numbers<[1], [0], [0], [1], [0, 0, 1, 1], [], []>} : vector<288x8xf32>, vector<8x8xf32>, vector<288x8xf32> -> vector<288x8xf32>
    %92 = arith.addf %88, %91 : vector<288x8xf32>
    %c43_56 = arith.constant 43 : index
    %c0_57 = arith.constant 0 : index
    %93 = vector.load %arg16[%c43_56, %c0_57] : memref<336x8xf32, #tpu.memory_space<vmem>>, vector<288x8xf32>
    %94 = vector.extract_strided_slice %9 {offsets = [64, 0], sizes = [8, 8], strides = [1, 1]} : vector<72x8xf32> to vector<8x8xf32>
    %cst_58 = arith.constant dense<0.000000e+00> : vector<288x8xf32>
    %95 = tpu.matmul %93, %94, %cst_58 {dimension_numbers = #tpu.dot_dimension_numbers<[1], [0], [0], [1], [0, 0, 1, 1], [], []>} : vector<288x8xf32>, vector<8x8xf32>, vector<288x8xf32> -> vector<288x8xf32>
    %96 = arith.addf %92, %95 : vector<288x8xf32>
    %97 = vector.broadcast %15 : vector<1x8xf32> to vector<288x8xf32>
    %98 = arith.addf %96, %97 : vector<288x8xf32>
    %99 = vector.broadcast %0 : vector<288x1xf32> to vector<288x8xf32>
    %100 = arith.mulf %98, %99 : vector<288x8xf32>
    %cst_59 = arith.constant dense<0.000000e+00> : vector<8xf32>
    %101 = vector.multi_reduction <add>, %100, %cst_59 [0] : vector<288x8xf32> to vector<8xf32>
    %102 = vector.shape_cast %101 : vector<8xf32> to vector<1x8xf32>
    %cst_60 = arith.constant 3.906250e-03 : f32
    %103 = vector.broadcast %cst_60 : f32 to vector<1x8xf32>
    %104 = arith.mulf %102, %103 : vector<1x8xf32>
    %105 = arith.index_cast %arg1 : i32 to index
    %c0_61 = arith.constant 0 : index
    %c0_62 = arith.constant 0 : index
    %106 = vector.load %arg8[%105, %c0_61, %c0_62] : memref<2x8x2xf32, #tpu.memory_space<vmem>>, vector<1x8x2xf32>
    %107 = vector.shape_cast %106 : vector<1x8x2xf32> to vector<8x2xf32>
    %cst_63 = arith.constant dense<0.000000e+00> : vector<1x2xf32>
    %108 = tpu.matmul %104, %107, %cst_63 {dimension_numbers = #tpu.dot_dimension_numbers<[1], [0], [0], [1], [0, 0, 1, 1], [], []>} : vector<1x8xf32>, vector<8x2xf32>, vector<1x2xf32> -> vector<1x2xf32>
    %109 = arith.index_cast %arg1 : i32 to index
    %c0_64 = arith.constant 0 : index
    %c0_65 = arith.constant 0 : index
    %110 = vector.load %arg9[%109, %c0_64, %c0_65] : memref<2x1x2xf32, #tpu.memory_space<vmem>>, vector<1x1x2xf32>
    %111 = vector.shape_cast %110 : vector<1x1x2xf32> to vector<1x2xf32>
    %112 = arith.addf %108, %111 : vector<1x2xf32>
    %cst_66 = arith.constant 0.000000e+00 : f32
    %113 = vector.broadcast %cst_66 : f32 to vector<1x2xf32>
    %114 = arith.maximumf %112, %113 : vector<1x2xf32>
    %115 = arith.index_cast %arg1 : i32 to index
    %c0_67 = arith.constant 0 : index
    %c0_68 = arith.constant 0 : index
    %116 = vector.load %arg10[%115, %c0_67, %c0_68] : memref<2x2x8xf32, #tpu.memory_space<vmem>>, vector<1x2x8xf32>
    %117 = vector.shape_cast %116 : vector<1x2x8xf32> to vector<2x8xf32>
    %cst_69 = arith.constant dense<0.000000e+00> : vector<1x8xf32>
    %118 = tpu.matmul %114, %117, %cst_69 {dimension_numbers = #tpu.dot_dimension_numbers<[1], [0], [0], [1], [0, 0, 1, 1], [], []>} : vector<1x2xf32>, vector<2x8xf32>, vector<1x8xf32> -> vector<1x8xf32>
    %119 = arith.index_cast %arg1 : i32 to index
    %c0_70 = arith.constant 0 : index
    %c0_71 = arith.constant 0 : index
    %120 = vector.load %arg11[%119, %c0_70, %c0_71] : memref<2x1x8xf32, #tpu.memory_space<vmem>>, vector<1x1x8xf32>
    %121 = vector.shape_cast %120 : vector<1x1x8xf32> to vector<1x8xf32>
    %122 = arith.addf %118, %121 : vector<1x8xf32>
    %123 = arith.negf %122 : vector<1x8xf32>
    %124 = math.exp %123 : vector<1x8xf32>
    %cst_72 = arith.constant 1.000000e+00 : f32
    %125 = vector.broadcast %cst_72 : f32 to vector<1x8xf32>
    %126 = arith.addf %125, %124 : vector<1x8xf32>
    %127 = arith.divf %125, %126 : vector<1x8xf32>
    %c24_73 = arith.constant 24 : index
    %c0_74 = arith.constant 0 : index
    %128 = vector.load %arg15[%c24_73, %c0_74] : memref<336x8xf32, #tpu.memory_space<vmem>>, vector<288x8xf32>
    %129 = vector.broadcast %127 : vector<1x8xf32> to vector<288x8xf32>
    %130 = arith.mulf %100, %129 : vector<288x8xf32>
    %cst_75 = arith.constant 1.000000e+00 : f32
    %131 = vector.broadcast %cst_75 : f32 to vector<288x8xf32>
    %132 = arith.mulf %130, %131 : vector<288x8xf32>
    %133 = arith.addf %132, %128 : vector<288x8xf32>
    %c24_76 = arith.constant 24 : index
    %c0_77 = arith.constant 0 : index
    %134 = vector.load %arg15[%c24_76, %c0_77] : memref<336x8xf32, #tpu.memory_space<vmem>>, vector<288x8xf32>
    tpu.vector_store %arg15[%c24_76, %c0_77], %133 {strides = array<i32>} : memref<336x8xf32, #tpu.memory_space<vmem>>, vector<288x8xf32>,
    %c1_i32 = arith.constant 1 : i32
    %135 = arith.cmpi eq, %arg1, %c1_i32 : i32
    %136 = arith.extui %135 : i1 to i32
    %c0_i32_78 = arith.constant 0 : i32
    %137 = arith.cmpi ne, %136, %c0_i32_78 : i32
    scf.if %137 {
      %c0_79 = arith.constant 0 : index
      %c0_80 = arith.constant 0 : index
      %138 = vector.load %arg12[%c0_79, %c0_80] : memref<72x8xf32, #tpu.memory_space<vmem>>, vector<72x8xf32>
      %c0_81 = arith.constant 0 : index
      %c0_82 = arith.constant 0 : index
      %139 = vector.load %arg13[%c0_81, %c0_82] : memref<1x8xf32, #tpu.memory_space<vmem>>, vector<1x8xf32>
      %cst_83 = arith.constant 0.000000e+00 : f32
      %140 = vector.broadcast %cst_83 : f32 to vector<288x8xf32>
      %c5_84 = arith.constant 5 : index
      %c0_85 = arith.constant 0 : index
      %141 = vector.load %arg15[%c5_84, %c0_85] : memref<336x8xf32, #tpu.memory_space<vmem>>, vector<288x8xf32>
      %142 = vector.extract_strided_slice %138 {offsets = [0, 0], sizes = [8, 8], strides = [1, 1]} : vector<72x8xf32> to vector<8x8xf32>
      %cst_86 = arith.constant dense<0.000000e+00> : vector<288x8xf32>
      %143 = tpu.matmul %141, %142, %cst_86 {dimension_numbers = #tpu.dot_dimension_numbers<[1], [0], [0], [1], [0, 0, 1, 1], [], []>} : vector<288x8xf32>, vector<8x8xf32>, vector<288x8xf32> -> vector<288x8xf32>
      %144 = arith.addf %140, %143 : vector<288x8xf32>
      %c6_87 = arith.constant 6 : index
      %c0_88 = arith.constant 0 : index
      %145 = vector.load %arg15[%c6_87, %c0_88] : memref<336x8xf32, #tpu.memory_space<vmem>>, vector<288x8xf32>
      %146 = vector.extract_strided_slice %138 {offsets = [8, 0], sizes = [8, 8], strides = [1, 1]} : vector<72x8xf32> to vector<8x8xf32>
      %cst_89 = arith.constant dense<0.000000e+00> : vector<288x8xf32>
      %147 = tpu.matmul %145, %146, %cst_89 {dimension_numbers = #tpu.dot_dimension_numbers<[1], [0], [0], [1], [0, 0, 1, 1], [], []>} : vector<288x8xf32>, vector<8x8xf32>, vector<288x8xf32> -> vector<288x8xf32>
      %148 = arith.addf %144, %147 : vector<288x8xf32>
      %c7_90 = arith.constant 7 : index
      %c0_91 = arith.constant 0 : index
      %149 = vector.load %arg15[%c7_90, %c0_91] : memref<336x8xf32, #tpu.memory_space<vmem>>, vector<288x8xf32>
      %150 = vector.extract_strided_slice %138 {offsets = [16, 0], sizes = [8, 8], strides = [1, 1]} : vector<72x8xf32> to vector<8x8xf32>
      %cst_92 = arith.constant dense<0.000000e+00> : vector<288x8xf32>
      %151 = tpu.matmul %149, %150, %cst_92 {dimension_numbers = #tpu.dot_dimension_numbers<[1], [0], [0], [1], [0, 0, 1, 1], [], []>} : vector<288x8xf32>, vector<8x8xf32>, vector<288x8xf32> -> vector<288x8xf32>
      %152 = arith.addf %148, %151 : vector<288x8xf32>
      %c23_93 = arith.constant 23 : index
      %c0_94 = arith.constant 0 : index
      %153 = vector.load %arg15[%c23_93, %c0_94] : memref<336x8xf32, #tpu.memory_space<vmem>>, vector<288x8xf32>
      %154 = vector.extract_strided_slice %138 {offsets = [24, 0], sizes = [8, 8], strides = [1, 1]} : vector<72x8xf32> to vector<8x8xf32>
      %cst_95 = arith.constant dense<0.000000e+00> : vector<288x8xf32>
      %155 = tpu.matmul %153, %154, %cst_95 {dimension_numbers = #tpu.dot_dimension_numbers<[1], [0], [0], [1], [0, 0, 1, 1], [], []>} : vector<288x8xf32>, vector<8x8xf32>, vector<288x8xf32> -> vector<288x8xf32>
      %156 = arith.addf %152, %155 : vector<288x8xf32>
      %c24_96 = arith.constant 24 : index
      %c0_97 = arith.constant 0 : index
      %157 = vector.load %arg15[%c24_96, %c0_97] : memref<336x8xf32, #tpu.memory_space<vmem>>, vector<288x8xf32>
      %158 = vector.extract_strided_slice %138 {offsets = [32, 0], sizes = [8, 8], strides = [1, 1]} : vector<72x8xf32> to vector<8x8xf32>
      %cst_98 = arith.constant dense<0.000000e+00> : vector<288x8xf32>
      %159 = tpu.matmul %157, %158, %cst_98 {dimension_numbers = #tpu.dot_dimension_numbers<[1], [0], [0], [1], [0, 0, 1, 1], [], []>} : vector<288x8xf32>, vector<8x8xf32>, vector<288x8xf32> -> vector<288x8xf32>
      %160 = arith.addf %156, %159 : vector<288x8xf32>
      %c25_99 = arith.constant 25 : index
      %c0_100 = arith.constant 0 : index
      %161 = vector.load %arg15[%c25_99, %c0_100] : memref<336x8xf32, #tpu.memory_space<vmem>>, vector<288x8xf32>
      %162 = vector.extract_strided_slice %138 {offsets = [40, 0], sizes = [8, 8], strides = [1, 1]} : vector<72x8xf32> to vector<8x8xf32>
      %cst_101 = arith.constant dense<0.000000e+00> : vector<288x8xf32>
      %163 = tpu.matmul %161, %162, %cst_101 {dimension_numbers = #tpu.dot_dimension_numbers<[1], [0], [0], [1], [0, 0, 1, 1], [], []>} : vector<288x8xf32>, vector<8x8xf32>, vector<288x8xf32> -> vector<288x8xf32>
      %164 = arith.addf %160, %163 : vector<288x8xf32>
      %c41_102 = arith.constant 41 : index
      %c0_103 = arith.constant 0 : index
      %165 = vector.load %arg15[%c41_102, %c0_103] : memref<336x8xf32, #tpu.memory_space<vmem>>, vector<288x8xf32>
      %166 = vector.extract_strided_slice %138 {offsets = [48, 0], sizes = [8, 8], strides = [1, 1]} : vector<72x8xf32> to vector<8x8xf32>
      %cst_104 = arith.constant dense<0.000000e+00> : vector<288x8xf32>
      %167 = tpu.matmul %165, %166, %cst_104 {dimension_numbers = #tpu.dot_dimension_numbers<[1], [0], [0], [1], [0, 0, 1, 1], [], []>} : vector<288x8xf32>, vector<8x8xf32>, vector<288x8xf32> -> vector<288x8xf32>
      %168 = arith.addf %164, %167 : vector<288x8xf32>
      %c42_105 = arith.constant 42 : index
      %c0_106 = arith.constant 0 : index
      %169 = vector.load %arg15[%c42_105, %c0_106] : memref<336x8xf32, #tpu.memory_space<vmem>>, vector<288x8xf32>
      %170 = vector.extract_strided_slice %138 {offsets = [56, 0], sizes = [8, 8], strides = [1, 1]} : vector<72x8xf32> to vector<8x8xf32>
      %cst_107 = arith.constant dense<0.000000e+00> : vector<288x8xf32>
      %171 = tpu.matmul %169, %170, %cst_107 {dimension_numbers = #tpu.dot_dimension_numbers<[1], [0], [0], [1], [0, 0, 1, 1], [], []>} : vector<288x8xf32>, vector<8x8xf32>, vector<288x8xf32> -> vector<288x8xf32>
      %172 = arith.addf %168, %171 : vector<288x8xf32>
      %c43_108 = arith.constant 43 : index
      %c0_109 = arith.constant 0 : index
      %173 = vector.load %arg15[%c43_108, %c0_109] : memref<336x8xf32, #tpu.memory_space<vmem>>, vector<288x8xf32>
      %174 = vector.extract_strided_slice %138 {offsets = [64, 0], sizes = [8, 8], strides = [1, 1]} : vector<72x8xf32> to vector<8x8xf32>
      %cst_110 = arith.constant dense<0.000000e+00> : vector<288x8xf32>
      %175 = tpu.matmul %173, %174, %cst_110 {dimension_numbers = #tpu.dot_dimension_numbers<[1], [0], [0], [1], [0, 0, 1, 1], [], []>} : vector<288x8xf32>, vector<8x8xf32>, vector<288x8xf32> -> vector<288x8xf32>
      %176 = arith.addf %172, %175 : vector<288x8xf32>
      %177 = vector.broadcast %139 : vector<1x8xf32> to vector<288x8xf32>
      %178 = arith.addf %176, %177 : vector<288x8xf32>
      %c0_111 = arith.constant 0 : index
      %c0_112 = arith.constant 0 : index
      %c0_113 = arith.constant 0 : index
      %179 = vector.load %arg2[%c0_111, %c0_112, %c0_113] : memref<1x288x8xf32, #tpu.memory_space<vmem>>, vector<1x288x8xf32>
      %180 = vector.shape_cast %179 : vector<1x288x8xf32> to vector<288x8xf32>
      %181 = arith.addf %178, %180 : vector<288x8xf32>
      %c0_114 = arith.constant 0 : index
      %c0_115 = arith.constant 0 : index
      %c0_116 = arith.constant 0 : index
      %182 = vector.load %arg14[%c0_114, %c0_115, %c0_116] : memref<1x288x8xf32, #tpu.memory_space<vmem>>, vector<1x288x8xf32>
      %183 = vector.shape_cast %182 : vector<1x288x8xf32> to vector<288x8xf32>
      %184 = vector.shape_cast %181 : vector<288x8xf32> to vector<1x288x8xf32>
      tpu.vector_store %arg14[%c0_114, %c0_115, %c0_116], %184 {strides = array<i32>} : memref<1x288x8xf32, #tpu.memory_space<vmem>>, vector<1x288x8xf32>,
    } else {
    }
    return
  }
  func.func @transform_0(%arg0: i32, %arg1: i32) -> (i32, i32, i32) {
    %c0_i32 = arith.constant 0 : i32
    %c0_i32_0 = arith.constant 0 : i32
    %c0_i32_1 = arith.constant 0 : i32
    return %arg0, %c0_i32, %c0_i32_0 : i32, i32, i32
  }
  func.func @transform_1(%arg0: i32, %arg1: i32) -> (i32, i32) {
    %c0_i32 = arith.constant 0 : i32
    %c0_i32_0 = arith.constant 0 : i32
    %c0_i32_1 = arith.constant 0 : i32
    return %c0_i32, %c0_i32_0 : i32, i32
  }
  func.func @transform_2(%arg0: i32, %arg1: i32) -> (i32, i32, i32) {
    %c0_i32 = arith.constant 0 : i32
    %c0_i32_0 = arith.constant 0 : i32
    %c0_i32_1 = arith.constant 0 : i32
    %c0_i32_2 = arith.constant 0 : i32
    return %c0_i32, %c0_i32_0, %c0_i32_1 : i32, i32, i32
  }
  func.func @transform_3(%arg0: i32, %arg1: i32) -> (i32, i32, i32) {
    %c0_i32 = arith.constant 0 : i32
    %c0_i32_0 = arith.constant 0 : i32
    %c0_i32_1 = arith.constant 0 : i32
    %c0_i32_2 = arith.constant 0 : i32
    return %c0_i32, %c0_i32_0, %c0_i32_1 : i32, i32, i32
  }
  func.func @transform_4(%arg0: i32, %arg1: i32) -> (i32, i32, i32) {
    %c0_i32 = arith.constant 0 : i32
    %c0_i32_0 = arith.constant 0 : i32
    %c0_i32_1 = arith.constant 0 : i32
    %c0_i32_2 = arith.constant 0 : i32
    return %c0_i32, %c0_i32_0, %c0_i32_1 : i32, i32, i32
  }
  func.func @transform_5(%arg0: i32, %arg1: i32) -> (i32, i32, i32) {
    %c0_i32 = arith.constant 0 : i32
    %c0_i32_0 = arith.constant 0 : i32
    %c0_i32_1 = arith.constant 0 : i32
    %c0_i32_2 = arith.constant 0 : i32
    return %c0_i32, %c0_i32_0, %c0_i32_1 : i32, i32, i32
  }
  func.func @transform_6(%arg0: i32, %arg1: i32) -> (i32, i32, i32) {
    %c0_i32 = arith.constant 0 : i32
    %c0_i32_0 = arith.constant 0 : i32
    %c0_i32_1 = arith.constant 0 : i32
    %c0_i32_2 = arith.constant 0 : i32
    return %c0_i32, %c0_i32_0, %c0_i32_1 : i32, i32, i32
  }
  func.func @transform_7(%arg0: i32, %arg1: i32) -> (i32, i32, i32) {
    %c0_i32 = arith.constant 0 : i32
    %c0_i32_0 = arith.constant 0 : i32
    %c0_i32_1 = arith.constant 0 : i32
    %c0_i32_2 = arith.constant 0 : i32
    return %c0_i32, %c0_i32_0, %c0_i32_1 : i32, i32, i32
  }
  func.func @transform_8(%arg0: i32, %arg1: i32) -> (i32, i32, i32) {
    %c0_i32 = arith.constant 0 : i32
    %c0_i32_0 = arith.constant 0 : i32
    %c0_i32_1 = arith.constant 0 : i32
    %c0_i32_2 = arith.constant 0 : i32
    return %c0_i32, %c0_i32_0, %c0_i32_1 : i32, i32, i32
  }
  func.func @transform_9(%arg0: i32, %arg1: i32) -> (i32, i32, i32) {
    %c0_i32 = arith.constant 0 : i32
    %c0_i32_0 = arith.constant 0 : i32
    %c0_i32_1 = arith.constant 0 : i32
    %c0_i32_2 = arith.constant 0 : i32
    return %c0_i32, %c0_i32_0, %c0_i32_1 : i32, i32, i32
  }
  func.func @transform_10(%arg0: i32, %arg1: i32) -> (i32, i32) {
    %c0_i32 = arith.constant 0 : i32
    %c0_i32_0 = arith.constant 0 : i32
    %c0_i32_1 = arith.constant 0 : i32
    return %c0_i32, %c0_i32_0 : i32, i32
  }
  func.func @transform_11(%arg0: i32, %arg1: i32) -> (i32, i32) {
    %c0_i32 = arith.constant 0 : i32
    %c0_i32_0 = arith.constant 0 : i32
    %c0_i32_1 = arith.constant 0 : i32
    return %c0_i32, %c0_i32_0 : i32, i32
  }
  func.func @transform_12(%arg0: i32, %arg1: i32) -> (i32, i32, i32) {
    %c0_i32 = arith.constant 0 : i32
    %c0_i32_0 = arith.constant 0 : i32
    %c0_i32_1 = arith.constant 0 : i32
    return %arg0, %c0_i32, %c0_i32_0 : i32, i32, i32
  }
}

</mosaic_0001>

<bundles_post_ra>
// kernel: tpu_custom_call.1
= control target key start
LH: loop header
LB: loop body
LE: loop exit
PB: predicated region body
PF: predicated region fallthrough
CT: control target
= control target key end

     0   :  { %s17495_s21 = smov 0   ;;  %s17497_s22 = smov 0   ;;  %s20287_s0 = inlined_call_operand.vmem [shape: f32[2,288,8], index: 0, kind: input, shape index: {}]   ;;  %s20288_s1 = inlined_call_operand.vmem [shape: f32[288,1], index: 1, kind: input, shape index: {}]   ;;  %s20289_s2 = inlined_call_operand.vmem [shape: f32[2,72,8], index: 2, kind: input, shape index: {}]   ;;  %s20290_s3 = inlined_call_operand.vmem [shape: f32[2,1,8], index: 3, kind: input, shape index: {}]   ;;  %s20291_s4 = inlined_call_operand.vmem [shape: f32[2,72,8], index: 4, kind: input, shape index: {}]   ;;  %s20292_s5 = inlined_call_operand.vmem [shape: f32[2,1,8], index: 5, kind: input, shape index: {}]   ;;  %s20293_s6 = inlined_call_operand.vmem [shape: f32[2,8,2], index: 6, kind: input, shape index: {}]   ;;  %s20294_s7 = inlined_call_operand.vmem [shape: f32[2,1,2], index: 7, kind: input, shape index: {}]   ;;  %s20295_s8 = inlined_call_operand.vmem [shape: f32[2,2,8], index: 8, kind: input, shape index: {}]   ;;  %s20296_s9 = inlined_call_operand.vmem [shape: f32[2,1,8], index: 9, kind: input, shape index: {}]   ;;  %s20297_s10 = inlined_call_operand.vmem [shape: f32[72,8], index: 10, kind: input, shape index: {}]   ;;  %s20298_s11 = inlined_call_operand.vmem [shape: f32[1,8], index: 11, kind: input, shape index: {}]   ;;  %s20299_s12 = inlined_call_operand.vmem [shape: f32[2,288,8], index: 12, kind: output, shape index: {}]  }
   0x1   :  { %s17499_s23 = smov 0   ;;  %s17501_s24 = smov 0  }
   0x2   :  { %s17503_s25 = smov 0  }
   0x3 LB: > { %s31_s26 = sadd.s32 1, %s17416_s23  ;;  %s34_s27 = sadd.s32 1, %s17420_s24  ;;  %s17424_s25 = sphi %s17503_s25, %s22_s25   ;;  %s17420_s24 = sphi %s17501_s24, %s20365_s24   ;;  %s17416_s23 = sphi %s17499_s23, %s20364_s23   ;;  %s17412_s22 = sphi %s17497_s22, %s20363_s22   ;;  %s17408_s21 = sphi %s17495_s21, %s20362_s21  }
   0x4   : > { %p32_p0 = scmp.ge.s32.totalorder %s31_s26, 2  ;;  %p12956_p1 = scmp.ge.s32.totalorder %s17424_s25, 1 }
   0x5   : > { %p374_p2 = scmp.lt.s32.totalorder %s17424_s25, 5 }
   0x6   : > { %s20367_s26 = smov (%p32_p0, %s31_s26), 0  ;;  %s20369_s27 = smov (!%p32_p0, %s34_s27), %s17420_s24 }
   0x7   : > { %p375_p3 = pnand %p12956_p1, %p374_p2  ;;  %p36_p4 = scmp.ge.s32.totalorder %s20369_s27, 2 }
   0x9   : > { %s20371_s27 = smov (%p36_p4, %s20369_s27), 0  ;;  %378 = sbr.rel (%p375_p3) target bundleno = 2795 (0xaeb), region = 68 }
   0xa   : > { %20308 = sst [smem:[#allocation4_spill]] %s20371_s27 }
  0x10   : > { %p416_p5 = scmp.lt.s32.totalorder %s17412_s22, 1  ;;  %v17530_v0 = vld [vmem:[%s20288_s1] sm:$0xff]  ;;  %v17535_v1 = vld [vmem:[%s20288_s1 + $0x8] sm:$0xff]  ;;  %v17540_v2 = vld [vmem:[%s20288_s1 + $0x10] sm:$0xff]  ;;  %p12959_p6 = scmp.ne.s32.totalorder %s17408_s21, 0 }
  0x11   : > { %v17545_v3 = vld [vmem:[%s20288_s1 + $0x18] sm:$0xff]  ;;  %v17550_v4 = vld [vmem:[%s20288_s1 + $0x20] sm:$0xff]  ;;  %v17555_v5 = vld [vmem:[%s20288_s1 + $0x28] sm:$0xff]  ;;  %vm466_vm0 = vcmask (!%p12959_p6), 64512   ;;  %v17426_v39 = vmov (!%p12959_p6), 0.0  }
  0x12   : > { %s20373_s22 = smov (!%p416_p5, %s17412_s22), 1  ;;  %v17560_v6 = vld [vmem:[%s20288_s1 + $0x30] sm:$0xff]  ;;  %v17565_v7 = vld [vmem:[%s20288_s1 + $0x38] sm:$0xff]  ;;  %v17570_v8 = vld [vmem:[%s20288_s1 + $0x40] sm:$0xff]  ;;  %470 = vst.msk [vmem:[#allocation2 + $0x18] sm:$0xff] (!%p12959_p6), %vm466_vm0, %v17426_v39 }
  0x13   : > { %v17575_v9 = vld [vmem:[%s20288_s1 + $0x48] sm:$0xff]  ;;  %v17580_v10 = vld [vmem:[%s20288_s1 + $0x50] sm:$0xff]  ;;  %v17585_v11 = vld [vmem:[%s20288_s1 + $0x58] sm:$0xff]  ;;  %s17335_s30 = smul.u32 288, %s20373_s22  ;;  %467 = vst.msk [vmem:[#allocation2] sm:$0xff] (!%p12959_p6), %vm466_vm0, %v17426_v39 }
  0x14   : > { %v17590_v12 = vld [vmem:[%s20288_s1 + $0x60] sm:$0xff]  ;;  %v17595_v13 = vld [vmem:[%s20288_s1 + $0x68] sm:$0xff]  ;;  %v17600_v14 = vld [vmem:[%s20288_s1 + $0x70] sm:$0xff]  ;;  %468 = vst.msk [vmem:[#allocation2 + $0x8] sm:$0xff] (!%p12959_p6), %vm466_vm0, %v17426_v39 }
  0x15   : > { %v17605_v15 = vld [vmem:[%s20288_s1 + $0x78] sm:$0xff]  ;;  %v17610_v16 = vld [vmem:[%s20288_s1 + $0x80] sm:$0xff]  ;;  %v17615_v17 = vld [vmem:[%s20288_s1 + $0x88] sm:$0xff]  ;;  %s17620_s16 = scalar_lea.vmem %s20287_s0, %s17335_s30  ;;  %s17625_s19 = scalar_lea.vmem %s20299_s12, %s17335_s30  ;;  %469 = vst.msk [vmem:[#allocation2 + $0x10] sm:$0xff] (!%p12959_p6), %vm466_vm0, %v17426_v39 }
  0x16   : > { %v17630_v18 = vld [vmem:[%s20288_s1 + $0x90] sm:$0xff]  ;;  %v17635_v19 = vld [vmem:[%s20288_s1 + $0x98] sm:$0xff]  ;;  %v17640_v20 = vld [vmem:[%s20288_s1 + $0xa0] sm:$0xff]  ;;  %471 = vst.msk [vmem:[#allocation2 + $0x20] sm:$0xff] (!%p12959_p6), %vm466_vm0, %v17426_v39 }
  0x17   : > { %v17645_v21 = vld [vmem:[%s20288_s1 + $0xa8] sm:$0xff]  ;;  %v17650_v22 = vld [vmem:[%s20288_s1 + $0xb0] sm:$0xff]  ;;  %v17655_v23 = vld [vmem:[%s20288_s1 + $0xb8] sm:$0xff]  ;;  %465 = sbr.rel (%p12959_p6) target bundleno = 86 (0x56), region = 72  ;;  %472 = vst.msk [vmem:[#allocation2 + $0x28] sm:$0xff] (!%p12959_p6), %vm466_vm0, %v17426_v39 }
  0x18   : > { %v17660_v24 = vld [vmem:[%s20288_s1 + $0xc0] sm:$0xff]  ;;  %v17665_v25 = vld [vmem:[%s20288_s1 + $0xc8] sm:$0xff]  ;;  %v17670_v26 = vld [vmem:[%s20288_s1 + $0xd0] sm:$0xff]  ;;  %473 = vst.msk [vmem:[#allocation2 + $0x30] sm:$0xff] (!%p12959_p6), %vm466_vm0, %v17426_v39 }
  0x19   : > { %v17675_v27 = vld [vmem:[%s20288_s1 + $0xd8] sm:$0xff]  ;;  %v17680_v28 = vld [vmem:[%s20288_s1 + $0xe0] sm:$0xff]  ;;  %v17685_v29 = vld [vmem:[%s20288_s1 + $0xe8] sm:$0xff]  ;;  %474 = vst.msk [vmem:[#allocation2 + $0x38] sm:$0xff] (!%p12959_p6), %vm466_vm0, %v17426_v39 }
  0x1a   : > { %20309 = vst [vmem:[#allocation5_spill] sm:$0xff] %v17680_v28  ;;  %20310 = vst [vmem:[#allocation6_spill] sm:$0xff] %v17685_v29  ;;  %v17690_v30 = vld [vmem:[%s20288_s1 + $0xf0] sm:$0xff]  ;;  %v17695_v31 = vld [vmem:[%s20288_s1 + $0xf8] sm:$0xff] }
  0x1b   : > { %20311 = vst [vmem:[#allocation7_spill] sm:$0xff] %v17690_v30  ;;  %20312 = vst [vmem:[#allocation8_spill] sm:$0xff] %v17695_v31  ;;  %v17700_v32 = vld [vmem:[%s20288_s1 + $0x100] sm:$0xff]  ;;  %v17705_v33 = vld [vmem:[%s20288_s1 + $0x108] sm:$0xff] }
  0x1c   : > { %20313 = vst [vmem:[#allocation9_spill] sm:$0xff] %v17700_v32  ;;  %20314 = vst [vmem:[#allocation10_spill] sm:$0xff] %v17705_v33  ;;  %v17710_v34 = vld [vmem:[%s20288_s1 + $0x110] sm:$0xff]  ;;  %v17715_v35 = vld [vmem:[%s20288_s1 + $0x118] sm:$0xff] }
  0x1d   : > { %20315 = vst [vmem:[#allocation11_spill] sm:$0xff] %v17710_v34  ;;  %20316 = vst [vmem:[#allocation12_spill] sm:$0xff] %v17715_v35  ;;  %v17719_v36 = vld [vmem:[%s17620_s16] sm:$0xff] (!%p12959_p6)  ;;  %v17722_v37 = vld [vmem:[%s17620_s16 + $0x8] sm:$0xff] (!%p12959_p6) }
  0x1e   : > { %v17725_v38 = vld [vmem:[%s17620_s16 + $0x10] sm:$0xff]  ;;  %475 = vst.msk [vmem:[#allocation2 + $0x40] sm:$0xff] %vm466_vm0, %v17426_v39  ;;  %476 = vst.msk [vmem:[#allocation2 + $0x48] sm:$0xff] %vm466_vm0, %v17426_v39  ;;  %v554_v40 = vld [vmem:[%s17620_s16 + $0x18] sm:$0xff] }
  0x1f   : > { %477 = vst.msk [vmem:[#allocation2 + $0x50] sm:$0xff] %vm466_vm0, %v17426_v39  ;;  %478 = vst.msk [vmem:[#allocation2 + $0x58] sm:$0xff] %vm466_vm0, %v17426_v39  ;;  %v555_v41 = vld [vmem:[%s17620_s16 + $0x20] sm:$0xff]  ;;  %v556_v42 = vld [vmem:[%s17620_s16 + $0x28] sm:$0xff] }
  0x20   : > { %479 = vst.msk [vmem:[#allocation2 + $0x60] sm:$0xff] %vm466_vm0, %v17426_v39  ;;  %480 = vst.msk [vmem:[#allocation2 + $0x68] sm:$0xff] %vm466_vm0, %v17426_v39  ;;  %v557_v43 = vld [vmem:[%s17620_s16 + $0x30] sm:$0xff]  ;;  %v558_v44 = vld [vmem:[%s17620_s16 + $0x38] sm:$0xff] }
  0x21   : > { %481 = vst.msk [vmem:[#allocation2 + $0x70] sm:$0xff] %vm466_vm0, %v17426_v39  ;;  %482 = vst.msk [vmem:[#allocation2 + $0x78] sm:$0xff] %vm466_vm0, %v17426_v39  ;;  %v559_v45 = vld [vmem:[%s17620_s16 + $0x40] sm:$0xff]  ;;  %v560_v46 = vld [vmem:[%s17620_s16 + $0x48] sm:$0xff] }
  0x22   : > { %483 = vst.msk [vmem:[#allocation2 + $0x80] sm:$0xff] %vm466_vm0, %v17426_v39  ;;  %484 = vst.msk [vmem:[#allocation2 + $0x88] sm:$0xff] %vm466_vm0, %v17426_v39  ;;  %v561_v47 = vld [vmem:[%s17620_s16 + $0x50] sm:$0xff]  ;;  %v562_v48 = vld [vmem:[%s17620_s16 + $0x58] sm:$0xff] }
  0x23   : > { %485 = vst.msk [vmem:[#allocation2 + $0x90] sm:$0xff] %vm466_vm0, %v17426_v39  ;;  %486 = vst.msk [vmem:[#allocation2 + $0x98] sm:$0xff] %vm466_vm0, %v17426_v39  ;;  %v563_v49 = vld [vmem:[%s17620_s16 + $0x60] sm:$0xff]  ;;  %v564_v50 = vld [vmem:[%s17620_s16 + $0x68] sm:$0xff] }
  0x24   : > { %487 = vst.msk [vmem:[#allocation2 + $0xa0] sm:$0xff] %vm466_vm0, %v17426_v39  ;;  %488 = vst.msk [vmem:[#allocation2 + $0xa8] sm:$0xff] %vm466_vm0, %v17426_v39  ;;  %v565_v51 = vld [vmem:[%s17620_s16 + $0x70] sm:$0xff]  ;;  %v566_v52 = vld [vmem:[%s17620_s16 + $0x78] sm:$0xff] }
  0x25   : > { %489 = vst.msk [vmem:[#allocation2 + $0xb0] sm:$0xff] %vm466_vm0, %v17426_v39  ;;  %490 = vst.msk [vmem:[#allocation2 + $0xb8] sm:$0xff] %vm466_vm0, %v17426_v39  ;;  %v567_v53 = vld [vmem:[%s17620_s16 + $0x80] sm:$0xff]  ;;  %v568_v54 = vld [vmem:[%s17620_s16 + $0x88] sm:$0xff] }
  0x26   : > { %491 = vst.msk [vmem:[#allocation2 + $0xc0] sm:$0xff] %vm466_vm0, %v17426_v39  ;;  %492 = vst.msk [vmem:[#allocation2 + $0xc8] sm:$0xff] %vm466_vm0, %v17426_v39  ;;  %v569_v55 = vld [vmem:[%s17620_s16 + $0x90] sm:$0xff]  ;;  %v570_v56 = vld [vmem:[%s17620_s16 + $0x98] sm:$0xff] }
  0x27   : > { %493 = vst.msk [vmem:[#allocation2 + $0xd0] sm:$0xff] %vm466_vm0, %v17426_v39  ;;  %494 = vst.msk [vmem:[#allocation2 + $0xd8] sm:$0xff] %vm466_vm0, %v17426_v39  ;;  %v571_v57 = vld [vmem:[%s17620_s16 + $0xa0] sm:$0xff]  ;;  %v572_v58 = vld [vmem:[%s17620_s16 + $0xa8] sm:$0xff] }
  0x28   : > { %495 = vst.msk [vmem:[#allocation2 + $0xe0] sm:$0xff] %vm466_vm0, %v17426_v39  ;;  %496 = vst.msk [vmem:[#allocation2 + $0xe8] sm:$0xff] %vm466_vm0, %v17426_v39  ;;  %v573_v59 = vld [vmem:[%s17620_s16 + $0xb0] sm:$0xff]  ;;  %v574_v60 = vld [vmem:[%s17620_s16 + $0xb8] sm:$0xff] }
  0x29   : > { %497 = vst.msk [vmem:[#allocation2 + $0xf0] sm:$0xff] %vm466_vm0, %v17426_v39  ;;  %498 = vst.msk [vmem:[#allocation2 + $0xf8] sm:$0xff] %vm466_vm0, %v17426_v39  ;;  %v575_v61 = vld [vmem:[%s17620_s16 + $0xc0] sm:$0xff]  ;;  %v576_v62 = vld [vmem:[%s17620_s16 + $0xc8] sm:$0xff] }
  0x2a   : > { %499 = vst.msk [vmem:[#allocation2 + $0x100] sm:$0xff] %vm466_vm0, %v17426_v39  ;;  %500 = vst.msk [vmem:[#allocation2 + $0x108] sm:$0xff] %vm466_vm0, %v17426_v39  ;;  %v577_v63 = vld [vmem:[%s17620_s16 + $0xd0] sm:$0xff] }
  0x2b   : > { %501 = vst.msk [vmem:[#allocation2 + $0x110] sm:$0xff] %vm466_vm0, %v17426_v39  ;;  %502 = vst.msk [vmem:[#allocation2 + $0x118] sm:$0xff] %vm466_vm0, %v17426_v39 }
  0x2c   : > { %503 = vst.msk [vmem:[#allocation2 + $0x120] sm:$0xff] %vm466_vm0, %v17426_v39  ;;  %504 = vst.msk [vmem:[#allocation2 + $0x128] sm:$0xff] %vm466_vm0, %v17426_v39 }
  0x2d   : > { %505 = vst.msk [vmem:[#allocation2 + $0x130] sm:$0xff] %vm466_vm0, %v17426_v39  ;;  %506 = vst.msk [vmem:[#allocation2 + $0x138] sm:$0xff] %vm466_vm0, %v17426_v39 }
  0x2e   : > { %507 = vst.msk [vmem:[#allocation2 + $0x140] sm:$0xff] %vm466_vm0, %v17426_v39  ;;  %508 = vst.msk [vmem:[#allocation2 + $0x148] sm:$0xff] %vm466_vm0, %v17426_v39 }
  0x2f   : > { %509 = vst.msk [vmem:[#allocation3] sm:$0xff] %vm466_vm0, %v17426_v39  ;;  %510 = vst.msk [vmem:[#allocation3 + $0x8] sm:$0xff] %vm466_vm0, %v17426_v39 }
  0x30   : > { %511 = vst.msk [vmem:[#allocation3 + $0x10] sm:$0xff] %vm466_vm0, %v17426_v39  ;;  %512 = vst.msk [vmem:[#allocation3 + $0x18] sm:$0xff] %vm466_vm0, %v17426_v39 }
  0x31   : > { %513 = vst.msk [vmem:[#allocation3 + $0x20] sm:$0xff] %vm466_vm0, %v17426_v39  ;;  %514 = vst.msk [vmem:[#allocation3 + $0x28] sm:$0xff] %vm466_vm0, %v17426_v39 }
  0x32   : > { %515 = vst.msk [vmem:[#allocation3 + $0x30] sm:$0xff] %vm466_vm0, %v17426_v39  ;;  %516 = vst.msk [vmem:[#allocation3 + $0x38] sm:$0xff] %vm466_vm0, %v17426_v39 }
  0x33   : > { %517 = vst.msk [vmem:[#allocation3 + $0x40] sm:$0xff] %vm466_vm0, %v17426_v39  ;;  %518 = vst.msk [vmem:[#allocation3 + $0x48] sm:$0xff] %vm466_vm0, %v17426_v39 }
  0x34   : > { %519 = vst.msk [vmem:[#allocation3 + $0x50] sm:$0xff] %vm466_vm0, %v17426_v39  ;;  %520 = vst.msk [vmem:[#allocation3 + $0x58] sm:$0xff] %vm466_vm0, %v17426_v39 }
  0x35   : > { %521 = vst.msk [vmem:[#allocation3 + $0x60] sm:$0xff] %vm466_vm0, %v17426_v39  ;;  %522 = vst.msk [vmem:[#allocation3 + $0x68] sm:$0xff] %vm466_vm0, %v17426_v39 }
  0x36   : > { %523 = vst.msk [vmem:[#allocation3 + $0x70] sm:$0xff] %vm466_vm0, %v17426_v39  ;;  %524 = vst.msk [vmem:[#allocation3 + $0x78] sm:$0xff] %vm466_vm0, %v17426_v39 }
  0x37   : > { %525 = vst.msk [vmem:[#allocation3 + $0x80] sm:$0xff] %vm466_vm0, %v17426_v39  ;;  %526 = vst.msk [vmem:[#allocation3 + $0x88] sm:$0xff] %vm466_vm0, %v17426_v39 }
  0x38   : > { %527 = vst.msk [vmem:[#allocation3 + $0x90] sm:$0xff] %vm466_vm0, %v17426_v39  ;;  %528 = vst.msk [vmem:[#allocation3 + $0x98] sm:$0xff] %vm466_vm0, %v17426_v39 }
  0x39   : > { %529 = vst.msk [vmem:[#allocation3 + $0xa0] sm:$0xff] %vm466_vm0, %v17426_v39  ;;  %530 = vst.msk [vmem:[#allocation3 + $0xa8] sm:$0xff] %vm466_vm0, %v17426_v39 }
  0x3a   : > { %531 = vst.msk [vmem:[#allocation3 + $0xb0] sm:$0xff] %vm466_vm0, %v17426_v39  ;;  %532 = vst.msk [vmem:[#allocation3 + $0xb8] sm:$0xff] %vm466_vm0, %v17426_v39 }
  0x3b   : > { %533 = vst.msk [vmem:[#allocation3 + $0xc0] sm:$0xff] %vm466_vm0, %v17426_v39  ;;  %534 = vst.msk [vmem:[#allocation3 + $0xc8] sm:$0xff] %vm466_vm0, %v17426_v39 }
  0x3c   : > { %535 = vst.msk [vmem:[#allocation3 + $0xd0] sm:$0xff] %vm466_vm0, %v17426_v39  ;;  %536 = vst.msk [vmem:[#allocation3 + $0xd8] sm:$0xff] %vm466_vm0, %v17426_v39 }
  0x3d   : > { %537 = vst.msk [vmem:[#allocation3 + $0xe0] sm:$0xff] %vm466_vm0, %v17426_v39  ;;  %538 = vst.msk [vmem:[#allocation3 + $0xe8] sm:$0xff] %vm466_vm0, %v17426_v39 }
  0x3e   : > { %539 = vst.msk [vmem:[#allocation3 + $0xf0] sm:$0xff] %vm466_vm0, %v17426_v39  ;;  %540 = vst.msk [vmem:[#allocation3 + $0xf8] sm:$0xff] %vm466_vm0, %v17426_v39 }
  0x3f   : > { %541 = vst.msk [vmem:[#allocation3 + $0x100] sm:$0xff] %vm466_vm0, %v17426_v39  ;;  %542 = vst.msk [vmem:[#allocation3 + $0x108] sm:$0xff] %vm466_vm0, %v17426_v39 }
  0x40   : > { %543 = vst.msk [vmem:[#allocation3 + $0x110] sm:$0xff] %vm466_vm0, %v17426_v39  ;;  %544 = vst.msk [vmem:[#allocation3 + $0x118] sm:$0xff] %vm466_vm0, %v17426_v39 }
  0x41   : > { %545 = vst.msk [vmem:[#allocation3 + $0x120] sm:$0xff] %vm466_vm0, %v17426_v39  ;;  %546 = vst.msk [vmem:[#allocation3 + $0x128] sm:$0xff] %vm466_vm0, %v17426_v39 }
  0x42   : > { %547 = vst.msk [vmem:[#allocation3 + $0x130] sm:$0xff] %vm466_vm0, %v17426_v39  ;;  %548 = vst.msk [vmem:[#allocation3 + $0x138] sm:$0xff] %vm466_vm0, %v17426_v39 }
  0x43   : > { %549 = vst.msk [vmem:[#allocation3 + $0x140] sm:$0xff] %vm466_vm0, %v17426_v39  ;;  %550 = vst.msk [vmem:[#allocation3 + $0x148] sm:$0xff] %vm466_vm0, %v17426_v39  ;;  %v581_v39 = vld [vmem:[%s17620_s16 + $0xf0] sm:$0xff] }
  0x44   : > { %587 = vst.msk [vmem:[#allocation2 + $0x18] sm:$0xff] %vm466_vm0, %v17719_v36  ;;  %588 = vst.msk [vmem:[#allocation2 + $0x20] sm:$0xff] %vm466_vm0, %v17722_v37  ;;  %v578_v36 = vld [vmem:[%s17620_s16 + $0xd8] sm:$0xff]  ;;  %v579_v37 = vld [vmem:[%s17620_s16 + $0xe0] sm:$0xff] }
  0x45   : > { %589 = vst.msk [vmem:[#allocation2 + $0x28] sm:$0xff] %vm466_vm0, %v17725_v38  ;;  %590 = vst.msk [vmem:[#allocation2 + $0x30] sm:$0xff] %vm466_vm0, %v554_v40  ;;  %v580_v38 = vld [vmem:[%s17620_s16 + $0xe8] sm:$0xff]  ;;  %v582_v40 = vld [vmem:[%s17620_s16 + $0xf8] sm:$0xff] }
  0x46   : > { %591 = vst.msk [vmem:[#allocation2 + $0x38] sm:$0xff] %vm466_vm0, %v555_v41  ;;  %592 = vst.msk [vmem:[#allocation2 + $0x40] sm:$0xff] %vm466_vm0, %v556_v42  ;;  %v583_v41 = vld [vmem:[%s17620_s16 + $0x100] sm:$0xff]  ;;  %v584_v42 = vld [vmem:[%s17620_s16 + $0x108] sm:$0xff] }
  0x47   : > { %593 = vst.msk [vmem:[#allocation2 + $0x48] sm:$0xff] %vm466_vm0, %v557_v43  ;;  %594 = vst.msk [vmem:[#allocation2 + $0x50] sm:$0xff] %vm466_vm0, %v558_v44  ;;  %v585_v43 = vld [vmem:[%s17620_s16 + $0x110] sm:$0xff]  ;;  %v586_v44 = vld [vmem:[%s17620_s16 + $0x118] sm:$0xff] }
  0x48   : > { %595 = vst.msk [vmem:[#allocation2 + $0x58] sm:$0xff] %vm466_vm0, %v559_v45  ;;  %596 = vst.msk [vmem:[#allocation2 + $0x60] sm:$0xff] %vm466_vm0, %v560_v46 }
  0x49   : > { %597 = vst.msk [vmem:[#allocation2 + $0x68] sm:$0xff] %vm466_vm0, %v561_v47  ;;  %598 = vst.msk [vmem:[#allocation2 + $0x70] sm:$0xff] %vm466_vm0, %v562_v48 }
  0x4a   : > { %599 = vst.msk [vmem:[#allocation2 + $0x78] sm:$0xff] %vm466_vm0, %v563_v49  ;;  %600 = vst.msk [vmem:[#allocation2 + $0x80] sm:$0xff] %vm466_vm0, %v564_v50 }
  0x4b   : > { %601 = vst.msk [vmem:[#allocation2 + $0x88] sm:$0xff] %vm466_vm0, %v565_v51  ;;  %602 = vst.msk [vmem:[#allocation2 + $0x90] sm:$0xff] %vm466_vm0, %v566_v52 }
  0x4c   : > { %603 = vst.msk [vmem:[#allocation2 + $0x98] sm:$0xff] %vm466_vm0, %v567_v53  ;;  %604 = vst.msk [vmem:[#allocation2 + $0xa0] sm:$0xff] %vm466_vm0, %v568_v54 }
  0x4d   : > { %605 = vst.msk [vmem:[#allocation2 + $0xa8] sm:$0xff] %vm466_vm0, %v569_v55  ;;  %606 = vst.msk [vmem:[#allocation2 + $0xb0] sm:$0xff] %vm466_vm0, %v570_v56 }
  0x4e   : > { %607 = vst.msk [vmem:[#allocation2 + $0xb8] sm:$0xff] %vm466_vm0, %v571_v57  ;;  %608 = vst.msk [vmem:[#allocation2 + $0xc0] sm:$0xff] %vm466_vm0, %v572_v58 }
  0x4f   : > { %609 = vst.msk [vmem:[#allocation2 + $0xc8] sm:$0xff] %vm466_vm0, %v573_v59  ;;  %610 = vst.msk [vmem:[#allocation2 + $0xd0] sm:$0xff] %vm466_vm0, %v574_v60 }
  0x50   : > { %611 = vst.msk [vmem:[#allocation2 + $0xd8] sm:$0xff] %vm466_vm0, %v575_v61  ;;  %612 = vst.msk [vmem:[#allocation2 + $0xe0] sm:$0xff] %vm466_vm0, %v576_v62 }
  0x51   : > { %613 = vst.msk [vmem:[#allocation2 + $0xe8] sm:$0xff] %vm466_vm0, %v577_v63  ;;  %614 = vst.msk [vmem:[#allocation2 + $0xf0] sm:$0xff] %vm466_vm0, %v578_v36 }
  0x52   : > { %615 = vst.msk [vmem:[#allocation2 + $0xf8] sm:$0xff] %vm466_vm0, %v579_v37  ;;  %616 = vst.msk [vmem:[#allocation2 + $0x100] sm:$0xff] %vm466_vm0, %v580_v38 }
  0x53   : > { %617 = vst.msk [vmem:[#allocation2 + $0x108] sm:$0xff] %vm466_vm0, %v581_v39  ;;  %618 = vst.msk [vmem:[#allocation2 + $0x110] sm:$0xff] %vm466_vm0, %v582_v40 }
  0x54   : > { %619 = vst.msk [vmem:[#allocation2 + $0x118] sm:$0xff] %vm466_vm0, %v583_v41  ;;  %620 = vst.msk [vmem:[#allocation2 + $0x120] sm:$0xff] %vm466_vm0, %v584_v42 }
  0x55   : > { %621 = vst.msk [vmem:[#allocation2 + $0x128] sm:$0xff] %vm466_vm0, %v585_v43  ;;  %622 = vst.msk [vmem:[#allocation2 + $0x130] sm:$0xff] %vm466_vm0, %v586_v44 }
  0x56 PF: > { %s623_s28 = smul.u32 72, %s17408_s21  ;;  %v684_v45 = vld [vmem:[#allocation2 + $0x6] sm:$0xff]  ;;  %vm720_vm1 = vcmask 64512   ;;  %v685_v47 = vld [vmem:[#allocation2 + $0xe] sm:$0xff]  ;;  %v686_v49 = vld [vmem:[#allocation2 + $0x16] sm:$0xff]  ;;  %s644_s20 = scalar_lea.vmem %s20290_s3, %s17408_s21  ;;  %vm17429_vm2 = vmmov 0  }
  0x57   : > { %14949 = vmatprep.mubr.msk.f32.mxu0 %vm720_vm1, %v684_v45  ;;  %v687_v50 = vld [vmem:[#allocation2 + $0x1e] sm:$0xff]  ;;  %v688_v51 = vld [vmem:[#allocation2 + $0x26] sm:$0xff]  ;;  %v689_v52 = vld [vmem:[#allocation2 + $0x2e] sm:$0xff]  ;;  %s13610_s22 = sshll.u32 %s17408_s21, 3  ;;  %vm8729_vm3 = vcmask 1041408   ;;  %s8644_s29 = scalar_lea.vmem %s20294_s7, %s17408_s21  ;;  %vm8725_vm4 = vcmask 15360  }
  0x58   : > { %s17974_s14 = scalar_lea.vmem %s20289_s2, %s623_s28  ;;  %v690_v53 = vld [vmem:[#allocation2 + $0x36] sm:$0xff]  ;;  %v695_v59 = vld [vmem:[#allocation2 + $0x5e] sm:$0xff]  ;;  %v696_v60 = vld [vmem:[#allocation2 + $0x66] sm:$0xff]  ;;  %s18445_s17 = scalar_lea.vmem %s20291_s4, %s623_s28 }
  0x59   : > { %v626_v46 = vld [vmem:[%s17974_s14 + $0x8] sm:$0xff]  ;;  %v625_v48 = vld [vmem:[%s17974_s14] sm:$0xff]  ;;  %v17983_v54 = vld [vmem:[%s17974_s14 + $0x10] sm:$0xff]  ;;  %s8642_s13 = scalar_lea.vmem %s20293_s6, %s13610_s22  ;;  %s8723_s15 = scalar_lea.vmem %s20296_s9, %s17408_s21 }
  0x5a   : > { %14947 = vmatprep.subr.mxu0 %v626_v46  ;;  %v694_v58 = vld [vmem:[#allocation2 + $0x56] sm:$0xff]  ;;  %v697_v61 = vld [vmem:[#allocation2 + $0x6e] sm:$0xff]  ;;  %v699_v63 = vld [vmem:[#allocation2 + $0x7e] sm:$0xff]  ;;  %p13616_p7 = scmp.ne.s32.totalorder %s17408_s21, 1 }
  0x5b   : > { %14948 = vmatpush3.msra.mxu0 %v626_v46  ;;  %v698_v62 = vld [vmem:[#allocation2 + $0x76] sm:$0xff]  ;;  %v700_v36 = vld [vmem:[#allocation2 + $0x86] sm:$0xff]  ;;  %v701_v37 = vld [vmem:[#allocation2 + $0x8e] sm:$0xff] }
  0x5c   : > { %14950 = vmatmul.mubr.msk.f32.vlgmr.msra.gmra.mrb[0].mxu0 %vm720_vm1, %v685_v47  ;;  %15003 = vmatprep.subr.mxu0 %v625_v48  ;;  %v702_v38 = vld [vmem:[#allocation2 + $0x96] sm:$0xff]  ;;  %v703_v39 = vld [vmem:[#allocation2 + $0x9e] sm:$0xff]  ;;  %v704_v40 = vld [vmem:[#allocation2 + $0xa6] sm:$0xff] }
  0x5d   : > { %15004 = vmatpush3.msra.mxu0 %v625_v48  ;;  %14952 = vmatprep.mubr.msk.f32.mxu0 %vm720_vm1, %v686_v49  ;;  %v691_v55 = vld [vmem:[#allocation2 + $0x3e] sm:$0xff]  ;;  %v692_v56 = vld [vmem:[#allocation2 + $0x46] sm:$0xff]  ;;  %v693_v57 = vld [vmem:[#allocation2 + $0x4e] sm:$0xff] }
  0x5e   : > { %15059 = vmatprep.subr.mxu0 %v17983_v54  ;;  %v705_v41 = vld [vmem:[#allocation2 + $0xae] sm:$0xff]  ;;  %v706_v42 = vld [vmem:[#allocation2 + $0xb6] sm:$0xff]  ;;  %v707_v43 = vld [vmem:[#allocation2 + $0xbe] sm:$0xff] }
  0x5f   : > { %v708_v44 = vld [vmem:[#allocation2 + $0xc6] sm:$0xff]  ;;  %v709_v45 = vld [vmem:[#allocation2 + $0xce] sm:$0xff]  ;;  %v710_v46 = vld [vmem:[#allocation2 + $0xd6] sm:$0xff] }
  0x60   : > { %14953 = vmatmul.mubr.msk.f32.gmra.mrb[2].mxu0 %vm720_vm1, %v687_v50  ;;  %v711_v47 = vld [vmem:[#allocation2 + $0xde] sm:$0xff]  ;;  %v712_v48 = vld [vmem:[#allocation2 + $0xe6] sm:$0xff]  ;;  %v713_v49 = vld [vmem:[#allocation2 + $0xee] sm:$0xff] }
  0x61   : > { %14955 = vmatprep.mubr.msk.f32.mxu0 %vm720_vm1, %v688_v51  ;;  %v714_v50 = vld [vmem:[#allocation2 + $0xf6] sm:$0xff]  ;;  %v715_v51 = vld [vmem:[#allocation2 + $0xfe] sm:$0xff]  ;;  %v1459_v32 = vld [vmem:[#allocation2 + $0x107] sm:$0xff] }
  0x62   : > { %v1456_v35 = vld [vmem:[#allocation2 + $0xef] sm:$0xff]  ;;  %v1457_v34 = vld [vmem:[#allocation2 + $0xf7] sm:$0xff]  ;;  %v1458_v33 = vld [vmem:[#allocation2 + $0xff] sm:$0xff] }
  0x63   : > { %v1460_v31 = vld [vmem:[#allocation2 + $0x10f] sm:$0xff]  ;;  %v1461_v30 = vld [vmem:[#allocation2 + $0x117] sm:$0xff]  ;;  %v1462_v29 = vld [vmem:[#allocation2 + $0x11f] sm:$0xff] }
  0x64   : > { %14956 = vmatmul.mubr.msk.f32.gmra.mrb[4].mxu0 %vm720_vm1, %v689_v52  ;;  %v716_v52 = vld [vmem:[#allocation2 + $0x106] sm:$0xff] }
  0x65   : > { %14958 = vmatprep.mubr.msk.f32.mxu0 %vm720_vm1, %v690_v53  ;;  %v717_v53 = vld [vmem:[#allocation2 + $0x10e] sm:$0xff] }
  0x66   : > { %v630_v28 = vld [vmem:[%s17974_s14 + $0x28] sm:$0xff] }
  0x68   : > { %14959 = vmatmul.mubr.msk.f32.gmra.mrb[6].mxu0 %vm720_vm1, %v691_v55  ;;  %v718_v55 = vld [vmem:[#allocation2 + $0x116] sm:$0xff] }
  0x69   : > { %14961 = vmatprep.mubr.msk.f32.mxu0 %vm720_vm1, %v692_v56  ;;  %v719_v56 = vld [vmem:[#allocation2 + $0x11e] sm:$0xff] }
  0x6c   : > { %14962 = vmatmul.mubr.msk.f32.gmra.mrb[8].mxu0 %vm720_vm1, %v693_v57  ;;  %v648_v57 = vld [vmem:[#allocation2 + $0x5] sm:$0xff] }
  0x6d   : > { %14964 = vmatprep.mubr.msk.f32.mxu0 %vm720_vm1, %v694_v58  ;;  %v649_v58 = vld [vmem:[#allocation2 + $0xd] sm:$0xff] }
  0x70   : > { %14965 = vmatmul.mubr.msk.f32.gmra.mrb[10].mxu0 %vm720_vm1, %v695_v59  ;;  %v650_v59 = vld [vmem:[#allocation2 + $0x15] sm:$0xff] }
  0x71   : > { %14967 = vmatprep.mubr.msk.f32.mxu0 %vm720_vm1, %v696_v60  ;;  %v18019_v60 = vld [vmem:[%s17974_s14 + $0x18] sm:$0xff] }
  0x74   : > { %14968 = vmatmul.mubr.msk.f32.gmra.mrb[12].mxu0 %vm720_vm1, %v697_v61  ;;  %v651_v61 = vld [vmem:[#allocation2 + $0x1d] sm:$0xff] }
  0x75   : > { %14970 = vmatprep.mubr.msk.f32.mxu0 %vm720_vm1, %v698_v62  ;;  %v652_v62 = vld [vmem:[#allocation2 + $0x25] sm:$0xff] }
  0x78   : > { %14971 = vmatmul.mubr.msk.f32.gmra.mrb[14].mxu0 %vm720_vm1, %v699_v63  ;;  %v653_v63 = vld [vmem:[#allocation2 + $0x2d] sm:$0xff] }
  0x79   : > { %14973 = vmatprep.mubr.msk.f32.mxu0 %vm720_vm1, %v700_v36  ;;  %v654_v36 = vld [vmem:[#allocation2 + $0x35] sm:$0xff] }
  0x7c   : > { %14974 = vmatmul.mubr.msk.f32.gmra.mrb[16].mxu0 %vm720_vm1, %v701_v37  ;;  %v655_v37 = vld [vmem:[#allocation2 + $0x3d] sm:$0xff] }
  0x7d   : > { %14976 = vmatprep.mubr.msk.f32.mxu0 %vm720_vm1, %v702_v38  ;;  %v656_v38 = vld [vmem:[#allocation2 + $0x45] sm:$0xff] }
  0x80   : > { %14977 = vmatmul.mubr.msk.f32.gmra.mrb[18].mxu0 %vm720_vm1, %v703_v39  ;;  %v658_v39 = vld [vmem:[#allocation2 + $0x55] sm:$0xff] }
  0x81   : > { %14979 = vmatprep.mubr.msk.f32.mxu0 %vm720_vm1, %v704_v40  ;;  %v659_v40 = vld [vmem:[#allocation2 + $0x5d] sm:$0xff] }
  0x84   : > { %14980 = vmatmul.mubr.msk.f32.gmra.mrb[20].mxu0 %vm720_vm1, %v705_v41  ;;  %v660_v41 = vld [vmem:[#allocation2 + $0x65] sm:$0xff] }
  0x85   : > { %14982 = vmatprep.mubr.msk.f32.mxu0 %vm720_vm1, %v706_v42  ;;  %v661_v42 = vld [vmem:[#allocation2 + $0x6d] sm:$0xff] }
  0x88   : > { %14983 = vmatmul.mubr.msk.f32.gmra.mrb[22].mxu0 %vm720_vm1, %v707_v43  ;;  %v662_v43 = vld [vmem:[#allocation2 + $0x75] sm:$0xff] }
  0x89   : > { %14985 = vmatprep.mubr.msk.f32.mxu0 %vm720_vm1, %v708_v44  ;;  %v663_v44 = vld [vmem:[#allocation2 + $0x7d] sm:$0xff] }
  0x8c   : > { %14986 = vmatmul.mubr.msk.f32.gmra.mrb[24].mxu0 %vm720_vm1, %v709_v45  ;;  %v664_v45 = vld [vmem:[#allocation2 + $0x85] sm:$0xff] }
  0x8d   : > { %14988 = vmatprep.mubr.msk.f32.mxu0 %vm720_vm1, %v710_v46  ;;  %v665_v46 = vld [vmem:[#allocation2 + $0x8d] sm:$0xff] }
  0x90   : > { %14989 = vmatmul.mubr.msk.f32.gmra.mrb[26].mxu0 %vm720_vm1, %v711_v47  ;;  %v666_v47 = vld [vmem:[#allocation2 + $0x95] sm:$0xff] }
  0x91   : > { %14991 = vmatprep.mubr.msk.f32.mxu0 %vm720_vm1, %v712_v48  ;;  %v667_v48 = vld [vmem:[#allocation2 + $0x9d] sm:$0xff] }
  0x94   : > { %14992 = vmatmul.mubr.msk.f32.gmra.mrb[28].mxu0 %vm720_vm1, %v713_v49  ;;  %v668_v49 = vld [vmem:[#allocation2 + $0xa5] sm:$0xff] }
  0x95   : > { %14994 = vmatprep.mubr.msk.f32.mxu0 %vm720_vm1, %v714_v50  ;;  %v669_v50 = vld [vmem:[#allocation2 + $0xad] sm:$0xff] }
  0x98   : > { %14995 = vmatmul.mubr.msk.f32.gmra.mrb[30].mxu0 %vm720_vm1, %v715_v51  ;;  %v670_v51 = vld [vmem:[#allocation2 + $0xb5] sm:$0xff] }
  0x99   : > { %14997 = vmatprep.mubr.msk.f32.mxu0 %vm720_vm1, %v716_v52  ;;  %v671_v52 = vld [vmem:[#allocation2 + $0xbd] sm:$0xff] }
  0x9c   : > { %14998 = vmatmul.mubr.msk.f32.gmra.mrb[32].mxu0 %vm720_vm1, %v717_v53  ;;  %v672_v53 = vld [vmem:[#allocation2 + $0xc5] sm:$0xff] }
  0x9d   : > { %15000 = vmatprep.mubr.msk.f32.mxu0 %vm720_vm1, %v718_v55  ;;  %v673_v55 = vld [vmem:[#allocation2 + $0xcd] sm:$0xff] }
  0xa0   : > { %15001 = vmatmul.mubr.msk.f32.gmra.mrb[34].mxu0 %vm720_vm1, %v719_v56  ;;  %v674_v56 = vld [vmem:[#allocation2 + $0xd5] sm:$0xff] }
  0xa1   : > { %15005 = vmatprep.mubr.msk.f32.mxu0 %vm720_vm1, %v648_v57  ;;  %v675_v57 = vld [vmem:[#allocation2 + $0xdd] sm:$0xff] }
  0xa4   : > { %15006 = vmatmul.mubr.msk.f32.vlgmr.msra.gmra.mrb[0].mxu0 %vm720_vm1, %v649_v58  ;;  %v676_v58 = vld [vmem:[#allocation2 + $0xe5] sm:$0xff] }
  0xa5   : > { %15060 = vmatpush3.msra.mxu0 %v17983_v54  ;;  %15008 = vmatprep.mubr.msk.f32.mxu0 %vm720_vm1, %v650_v59  ;;  %v657_v54 = vld [vmem:[#allocation2 + $0x4d] sm:$0xff] }
  0xa6   : > { %15115 = vmatprep.subr.mxu0 %v18019_v60  ;;  %v677_v59 = vld [vmem:[#allocation2 + $0xed] sm:$0xff] }
  0xa8   : > { %15009 = vmatmul.mubr.msk.f32.gmra.mrb[2].mxu0 %vm720_vm1, %v651_v61  ;;  %v678_v61 = vld [vmem:[#allocation2 + $0xf5] sm:$0xff] }
  0xa9   : > { %15011 = vmatprep.mubr.msk.f32.mxu0 %vm720_vm1, %v652_v62  ;;  %v679_v62 = vld [vmem:[#allocation2 + $0xfd] sm:$0xff] }
  0xac   : > { %15012 = vmatmul.mubr.msk.f32.gmra.mrb[4].mxu0 %vm720_vm1, %v653_v63  ;;  %v680_v63 = vld [vmem:[#allocation2 + $0x105] sm:$0xff] }
  0xad   : > { %15014 = vmatprep.mubr.msk.f32.mxu0 %vm720_vm1, %v654_v36  ;;  %v681_v36 = vld [vmem:[#allocation2 + $0x10d] sm:$0xff] }
  0xb0   : > { %15015 = vmatmul.mubr.msk.f32.gmra.mrb[6].mxu0 %vm720_vm1, %v655_v37  ;;  %v682_v37 = vld [vmem:[#allocation2 + $0x115] sm:$0xff] }
  0xb1   : > { %15017 = vmatprep.mubr.msk.f32.mxu0 %vm720_vm1, %v656_v38  ;;  %v683_v38 = vld [vmem:[#allocation2 + $0x11d] sm:$0xff] }
  0xb4   : > { %15018 = vmatmul.mubr.msk.f32.gmra.mrb[8].mxu0 %vm720_vm1, %v657_v54  ;;  %v1427_v54 = vld [vmem:[#allocation2 + $0x7] sm:$0xff] }
  0xb5   : > { %15020 = vmatprep.mubr.msk.f32.mxu0 %vm720_vm1, %v658_v39  ;;  %v1428_v39 = vld [vmem:[#allocation2 + $0xf] sm:$0xff] }
  0xb8   : > { %15021 = vmatmul.mubr.msk.f32.gmra.mrb[10].mxu0 %vm720_vm1, %v659_v40  ;;  %v18059_v40 = vld [vmem:[#allocation2 + $0x17] sm:$0xff] }
  0xb9   : > { %15023 = vmatprep.mubr.msk.f32.mxu0 %vm720_vm1, %v660_v41  ;;  %v18062_v41 = vld [vmem:[%s17974_s14 + $0x20] sm:$0xff] }
  0xbc   : > { %15024 = vmatmul.mubr.msk.f32.gmra.mrb[12].mxu0 %vm720_vm1, %v661_v42  ;;  %v18068_v42 = vld [vmem:[#allocation2 + $0x1f] sm:$0xff] }
  0xbd   : > { %15026 = vmatprep.mubr.msk.f32.mxu0 %vm720_vm1, %v662_v43  ;;  %v18070_v43 = vld [vmem:[#allocation2 + $0x27] sm:$0xff] }
  0xc0   : > { %15027 = vmatmul.mubr.msk.f32.gmra.mrb[14].mxu0 %vm720_vm1, %v663_v44  ;;  %v18077_v44 = vld [vmem:[#allocation2 + $0x2f] sm:$0xff] }
  0xc1   : > { %15029 = vmatprep.mubr.msk.f32.mxu0 %vm720_vm1, %v664_v45  ;;  %v18079_v45 = vld [vmem:[#allocation2 + $0x37] sm:$0xff] }
  0xc4   : > { %15030 = vmatmul.mubr.msk.f32.gmra.mrb[16].mxu0 %vm720_vm1, %v665_v46  ;;  %v18087_v46 = vld [vmem:[#allocation2 + $0x47] sm:$0xff] }
  0xc5   : > { %15032 = vmatprep.mubr.msk.f32.mxu0 %vm720_vm1, %v666_v47  ;;  %v18093_v47 = vld [vmem:[#allocation2 + $0x4f] sm:$0xff] }
  0xc8   : > { %15033 = vmatmul.mubr.msk.f32.gmra.mrb[18].mxu0 %vm720_vm1, %v667_v48  ;;  %v18095_v48 = vld [vmem:[#allocation2 + $0x57] sm:$0xff] }
  0xc9   : > { %15035 = vmatprep.mubr.msk.f32.mxu0 %vm720_vm1, %v668_v49  ;;  %v1438_v49 = vld [vmem:[#allocation2 + $0x5f] sm:$0xff] }
  0xcc   : > { %15036 = vmatmul.mubr.msk.f32.gmra.mrb[20].mxu0 %vm720_vm1, %v669_v50  ;;  %v1439_v50 = vld [vmem:[#allocation2 + $0x67] sm:$0xff] }
  0xcd   : > { %15038 = vmatprep.mubr.msk.f32.mxu0 %vm720_vm1, %v670_v51  ;;  %v1440_v51 = vld [vmem:[#allocation2 + $0x6f] sm:$0xff] }
  0xd0   : > { %15039 = vmatmul.mubr.msk.f32.gmra.mrb[22].mxu0 %vm720_vm1, %v671_v52  ;;  %v1441_v52 = vld [vmem:[#allocation2 + $0x77] sm:$0xff] }
  0xd1   : > { %15041 = vmatprep.mubr.msk.f32.mxu0 %vm720_vm1, %v672_v53  ;;  %v1442_v53 = vld [vmem:[#allocation2 + $0x7f] sm:$0xff] }
  0xd4   : > { %15042 = vmatmul.mubr.msk.f32.gmra.mrb[24].mxu0 %vm720_vm1, %v673_v55  ;;  %v1443_v55 = vld [vmem:[#allocation2 + $0x87] sm:$0xff] }
  0xd5   : > { %15044 = vmatprep.mubr.msk.f32.mxu0 %vm720_vm1, %v674_v56  ;;  %v1444_v56 = vld [vmem:[#allocation2 + $0x8f] sm:$0xff] }
  0xd8   : > { %15045 = vmatmul.mubr.msk.f32.gmra.mrb[26].mxu0 %vm720_vm1, %v675_v57  ;;  %v1445_v57 = vld [vmem:[#allocation2 + $0x97] sm:$0xff] }
  0xd9   : > { %15047 = vmatprep.mubr.msk.f32.mxu0 %vm720_vm1, %v676_v58  ;;  %v1446_v58 = vld [vmem:[#allocation2 + $0x9f] sm:$0xff] }
  0xdc   : > { %15048 = vmatmul.mubr.msk.f32.gmra.mrb[28].mxu0 %vm720_vm1, %v677_v59  ;;  %v1447_v59 = vld [vmem:[#allocation2 + $0xa7] sm:$0xff] }
  0xdd   : > { %15050 = vmatprep.mubr.msk.f32.mxu0 %vm720_vm1, %v678_v61  ;;  %v1448_v61 = vld [vmem:[#allocation2 + $0xaf] sm:$0xff] }
  0xe0   : > { %15051 = vmatmul.mubr.msk.f32.gmra.mrb[30].mxu0 %vm720_vm1, %v679_v62  ;;  %v1449_v62 = vld [vmem:[#allocation2 + $0xb7] sm:$0xff] }
  0xe1   : > { %15053 = vmatprep.mubr.msk.f32.mxu0 %vm720_vm1, %v680_v63  ;;  %v1450_v63 = vld [vmem:[#allocation2 + $0xbf] sm:$0xff] }
  0xe4   : > { %15054 = vmatmul.mubr.msk.f32.gmra.mrb[32].mxu0 %vm720_vm1, %v681_v36  ;;  %v1451_v36 = vld [vmem:[#allocation2 + $0xc7] sm:$0xff] }
  0xe5   : > { %15056 = vmatprep.mubr.msk.f32.mxu0 %vm720_vm1, %v682_v37  ;;  %v1452_v37 = vld [vmem:[#allocation2 + $0xcf] sm:$0xff] }
  0xe8   : > { %15057 = vmatmul.mubr.msk.f32.gmra.mrb[34].mxu0 %vm720_vm1, %v683_v38  ;;  %v1453_v38 = vld [vmem:[#allocation2 + $0xd7] sm:$0xff] }
  0xe9   : > { %15061 = vmatprep.mubr.msk.f32.mxu0 %vm720_vm1, %v1427_v54  ;;  %v1454_v54 = vld [vmem:[#allocation2 + $0xdf] sm:$0xff] }
  0xec   : > { %15062 = vmatmul.mubr.msk.f32.vlgmr.msra.gmra.mrb[0].mxu0 %vm720_vm1, %v1428_v39  ;;  %v1455_v39 = vld [vmem:[#allocation2 + $0xe7] sm:$0xff] }
  0xed   : > { %15116 = vmatpush3.msra.mxu0 %v18019_v60  ;;  %15064 = vmatprep.mubr.msk.f32.mxu0 %vm720_vm1, %v18059_v40  ;;  %v18085_v60 = vld [vmem:[#allocation2 + $0x3f] sm:$0xff] }
  0xee   : > { %15171 = vmatprep.subr.mxu0 %v18062_v41 }
  0xf0   : > { %15065 = vmatmul.mubr.msk.f32.gmra.mrb[2].mxu0 %vm720_vm1, %v18068_v42 }
  0xf1   : > { %15067 = vmatprep.mubr.msk.f32.mxu0 %vm720_vm1, %v18070_v43 }
  0xf4   : > { %15068 = vmatmul.mubr.msk.f32.gmra.mrb[4].mxu0 %vm720_vm1, %v18077_v44 }
  0xf5   : > { %15070 = vmatprep.mubr.msk.f32.mxu0 %vm720_vm1, %v18079_v45 }
  0xf8   : > { %15071 = vmatmul.mubr.msk.f32.gmra.mrb[6].mxu0 %vm720_vm1, %v18085_v60 }
  0xf9   : > { %15073 = vmatprep.mubr.msk.f32.mxu0 %vm720_vm1, %v18087_v46 }
  0xfc   : > { %15074 = vmatmul.mubr.msk.f32.gmra.mrb[8].mxu0 %vm720_vm1, %v18093_v47 }
  0xfd   : > { %15076 = vmatprep.mubr.msk.f32.mxu0 %vm720_vm1, %v18095_v48 }
 0x100   : > { %15077 = vmatmul.mubr.msk.f32.gmra.mrb[10].mxu0 %vm720_vm1, %v1438_v49 }
 0x101   : > { %15079 = vmatprep.mubr.msk.f32.mxu0 %vm720_vm1, %v1439_v50 }
 0x104   : > { %15080 = vmatmul.mubr.msk.f32.gmra.mrb[12].mxu0 %vm720_vm1, %v1440_v51 }
 0x105   : > { %15082 = vmatprep.mubr.msk.f32.mxu0 %vm720_vm1, %v1441_v52 }
 0x108   : > { %15083 = vmatmul.mubr.msk.f32.gmra.mrb[14].mxu0 %vm720_vm1, %v1442_v53 }
 0x109   : > { %15085 = vmatprep.mubr.msk.f32.mxu0 %vm720_vm1, %v1443_v55 }
 0x10c   : > { %15086 = vmatmul.mubr.msk.f32.gmra.mrb[16].mxu0 %vm720_vm1, %v1444_v56 }
 0x10d   : > { %15088 = vmatprep.mubr.msk.f32.mxu0 %vm720_vm1, %v1445_v57 }
 0x110   : > { %15089 = vmatmul.mubr.msk.f32.gmra.mrb[18].mxu0 %vm720_vm1, %v1446_v58 }
 0x111   : > { %15091 = vmatprep.mubr.msk.f32.mxu0 %vm720_vm1, %v1447_v59 }
 0x114   : > { %15092 = vmatmul.mubr.msk.f32.gmra.mrb[20].mxu0 %vm720_vm1, %v1448_v61 }
 0x115   : > { %15094 = vmatprep.mubr.msk.f32.mxu0 %vm720_vm1, %v1449_v62 }
 0x118   : > { %15095 = vmatmul.mubr.msk.f32.gmra.mrb[22].mxu0 %vm720_vm1, %v1450_v63 }
 0x119   : > { %15097 = vmatprep.mubr.msk.f32.mxu0 %vm720_vm1, %v1451_v36 }
 0x11c   : > { %15098 = vmatmul.mubr.msk.f32.gmra.mrb[24].mxu0 %vm720_vm1, %v1452_v37 }
 0x11d   : > { %15100 = vmatprep.mubr.msk.f32.mxu0 %vm720_vm1, %v1453_v38 }
 0x120   : > { %15101 = vmatmul.mubr.msk.f32.gmra.mrb[26].mxu0 %vm720_vm1, %v1454_v54 }
 0x121   : > { %15103 = vmatprep.mubr.msk.f32.mxu0 %vm720_vm1, %v1455_v39 }
 0x124   : > { %15104 = vmatmul.mubr.msk.f32.gmra.mrb[28].mxu0 %vm720_vm1, %v1456_v35 }
 0x125   : > { %15106 = vmatprep.mubr.msk.f32.mxu0 %vm720_vm1, %v1457_v34 }
 0x128   : > { %15107 = vmatmul.mubr.msk.f32.gmra.mrb[30].mxu0 %vm720_vm1, %v1458_v33 }
 0x129   : > { %15109 = vmatprep.mubr.msk.f32.mxu0 %vm720_vm1, %v1459_v32 }
 0x12c   : > { %15110 = vmatmul.mubr.msk.f32.gmra.mrb[32].mxu0 %vm720_vm1, %v1460_v31 }
 0x12d   : > { %15112 = vmatprep.mubr.msk.f32.mxu0 %vm720_vm1, %v1461_v30 }
 0x130   : > { %15113 = vmatmul.mubr.msk.f32.gmra.mrb[34].mxu0 %vm720_vm1, %v1462_v29 }
 0x131   : > { %15117 = vmatprep.mubr.msk.f32.mxu0 %vm720_vm1, %v18059_v40  ;;  %v1886_v40 = vld [vmem:[#allocation2 + $0x127] sm:$0xff] }
 0x134   : > { %15118 = vmatmul.mubr.msk.f32.vlgmr.msra.gmra.mrb[0].mxu0 %vm720_vm1, %v18068_v42  ;;  %v2277_v42 = vld [vmem:[#allocation2 + $0x18] sm:$0xff] }
 0x135   : > { %15172 = vmatpush3.msra.mxu0 %v18062_v41  ;;  %15120 = vmatprep.mubr.msk.f32.mxu0 %vm720_vm1, %v18070_v43  ;;  %v1887_v41 = vld [vmem:[#allocation2 + $0x12f] sm:$0xff] }
 0x136   : > { %15227 = vmatprep.subr.mxu0 %v630_v28  ;;  %v2284_v43 = vld [vmem:[#allocation2 + $0x50] sm:$0xff] }
 0x138   : > { %15121 = vmatmul.mubr.msk.f32.gmra.mrb[2].mxu0 %vm720_vm1, %v18077_v44  ;;  %v2285_v44 = vld [vmem:[#allocation2 + $0x58] sm:$0xff] }
 0x139   : > { %15123 = vmatprep.mubr.msk.f32.mxu0 %vm720_vm1, %v18079_v45  ;;  %v2287_v45 = vld [vmem:[#allocation2 + $0x68] sm:$0xff] }
 0x13c   : > { %15124 = vmatmul.mubr.msk.f32.gmra.mrb[4].mxu0 %vm720_vm1, %v18085_v60  ;;  %v2288_v60 = vld [vmem:[#allocation2 + $0x70] sm:$0xff] }
 0x13d   : > { %15126 = vmatprep.mubr.msk.f32.mxu0 %vm720_vm1, %v18087_v46  ;;  %v2289_v46 = vld [vmem:[#allocation2 + $0x78] sm:$0xff] }
 0x140   : > { %15127 = vmatmul.mubr.msk.f32.gmra.mrb[6].mxu0 %vm720_vm1, %v18093_v47  ;;  %v2290_v47 = vld [vmem:[#allocation2 + $0x80] sm:$0xff] }
 0x141   : > { %15129 = vmatprep.mubr.msk.f32.mxu0 %vm720_vm1, %v18095_v48  ;;  %v2291_v48 = vld [vmem:[#allocation2 + $0x88] sm:$0xff] }
 0x144   : > { %15130 = vmatmul.mubr.msk.f32.gmra.mrb[8].mxu0 %vm720_vm1, %v1438_v49  ;;  %v2292_v49 = vld [vmem:[#allocation2 + $0x90] sm:$0xff] }
 0x145   : > { %15132 = vmatprep.mubr.msk.f32.mxu0 %vm720_vm1, %v1439_v50  ;;  %v2293_v50 = vld [vmem:[#allocation2 + $0x98] sm:$0xff] }
 0x148   : > { %15133 = vmatmul.mubr.msk.f32.gmra.mrb[10].mxu0 %vm720_vm1, %v1440_v51  ;;  %v2294_v51 = vld [vmem:[#allocation2 + $0xa0] sm:$0xff] }
 0x149   : > { %15135 = vmatprep.mubr.msk.f32.mxu0 %vm720_vm1, %v1441_v52  ;;  %v2295_v52 = vld [vmem:[#allocation2 + $0xa8] sm:$0xff] }
 0x14c   : > { %15136 = vmatmul.mubr.msk.f32.gmra.mrb[12].mxu0 %vm720_vm1, %v1442_v53  ;;  %v2296_v53 = vld [vmem:[#allocation2 + $0xb0] sm:$0xff] }
 0x14d   : > { %15138 = vmatprep.mubr.msk.f32.mxu0 %vm720_vm1, %v1443_v55  ;;  %v2297_v55 = vld [vmem:[#allocation2 + $0xb8] sm:$0xff] }
 0x150   : > { %15139 = vmatmul.mubr.msk.f32.gmra.mrb[14].mxu0 %vm720_vm1, %v1444_v56  ;;  %v2298_v56 = vld [vmem:[#allocation2 + $0xc0] sm:$0xff] }
 0x151   : > { %15141 = vmatprep.mubr.msk.f32.mxu0 %vm720_vm1, %v1445_v57  ;;  %v2299_v57 = vld [vmem:[#allocation2 + $0xc8] sm:$0xff] }
 0x154   : > { %15142 = vmatmul.mubr.msk.f32.gmra.mrb[16].mxu0 %vm720_vm1, %v1446_v58  ;;  %v2300_v58 = vld [vmem:[#allocation2 + $0xd0] sm:$0xff] }
 0x155   : > { %15144 = vmatprep.mubr.msk.f32.mxu0 %vm720_vm1, %v1447_v59  ;;  %v2301_v59 = vld [vmem:[#allocation2 + $0xd8] sm:$0xff] }
 0x158   : > { %15145 = vmatmul.mubr.msk.f32.gmra.mrb[18].mxu0 %vm720_vm1, %v1448_v61  ;;  %v2302_v61 = vld [vmem:[#allocation2 + $0xe0] sm:$0xff] }
 0x159   : > { %15147 = vmatprep.mubr.msk.f32.mxu0 %vm720_vm1, %v1449_v62  ;;  %v2303_v62 = vld [vmem:[#allocation2 + $0xe8] sm:$0xff] }
 0x15c   : > { %15148 = vmatmul.mubr.msk.f32.gmra.mrb[20].mxu0 %vm720_vm1, %v1450_v63  ;;  %v2304_v63 = vld [vmem:[#allocation2 + $0xf0] sm:$0xff] }
 0x15d   : > { %15150 = vmatprep.mubr.msk.f32.mxu0 %vm720_vm1, %v1451_v36  ;;  %v2305_v36 = vld [vmem:[#allocation2 + $0xf8] sm:$0xff] }
 0x160   : > { %15151 = vmatmul.mubr.msk.f32.gmra.mrb[22].mxu0 %vm720_vm1, %v1452_v37  ;;  %v2306_v37 = vld [vmem:[#allocation2 + $0x100] sm:$0xff] }
 0x161   : > { %15153 = vmatprep.mubr.msk.f32.mxu0 %vm720_vm1, %v1453_v38  ;;  %v2307_v38 = vld [vmem:[#allocation2 + $0x108] sm:$0xff] }
 0x164   : > { %15154 = vmatmul.mubr.msk.f32.gmra.mrb[24].mxu0 %vm720_vm1, %v1454_v54  ;;  %v2308_v54 = vld [vmem:[#allocation2 + $0x110] sm:$0xff] }
 0x165   : > { %15156 = vmatprep.mubr.msk.f32.mxu0 %vm720_vm1, %v1455_v39  ;;  %v2309_v39 = vld [vmem:[#allocation2 + $0x118] sm:$0xff] }
 0x168   : > { %15157 = vmatmul.mubr.msk.f32.gmra.mrb[26].mxu0 %vm720_vm1, %v1456_v35  ;;  %v2279_v35 = vld [vmem:[#allocation2 + $0x28] sm:$0xff] }
 0x169   : > { %15159 = vmatprep.mubr.msk.f32.mxu0 %vm720_vm1, %v1457_v34  ;;  %v2278_v34 = vld [vmem:[#allocation2 + $0x20] sm:$0xff] }
 0x16c   : > { %15160 = vmatmul.mubr.msk.f32.gmra.mrb[28].mxu0 %vm720_vm1, %v1458_v33  ;;  %v18175_v33 = vld [vmem:[%s17974_s14 + $0x30] sm:$0xff] }
 0x16d   : > { %15162 = vmatprep.mubr.msk.f32.mxu0 %vm720_vm1, %v1459_v32  ;;  %v2283_v32 = vld [vmem:[#allocation2 + $0x48] sm:$0xff] }
 0x170   : > { %15163 = vmatmul.mubr.msk.f32.gmra.mrb[30].mxu0 %vm720_vm1, %v1460_v31  ;;  %v2281_v31 = vld [vmem:[#allocation2 + $0x38] sm:$0xff] }
 0x171   : > { %15165 = vmatprep.mubr.msk.f32.mxu0 %vm720_vm1, %v1461_v30  ;;  %v2280_v30 = vld [vmem:[#allocation2 + $0x30] sm:$0xff] }
 0x174   : > { %15166 = vmatmul.mubr.msk.f32.gmra.mrb[32].mxu0 %vm720_vm1, %v1462_v29  ;;  %v2282_v29 = vld [vmem:[#allocation2 + $0x40] sm:$0xff] }
 0x175   : > { %15168 = vmatprep.mubr.msk.f32.mxu0 %vm720_vm1, %v1886_v40  ;;  %v2310_v40 = vld [vmem:[#allocation2 + $0x120] sm:$0xff] }
 0x178   : > { %15169 = vmatmul.mubr.msk.f32.gmra.mrb[34].mxu0 %vm720_vm1, %v1887_v41  ;;  %v2311_v41 = vld [vmem:[#allocation2 + $0x128] sm:$0xff] }
 0x179   : > { %15173 = vmatprep.mubr.msk.f32.mxu0 %vm720_vm1, %v2277_v42  ;;  %v2312_v42 = vld [vmem:[#allocation2 + $0x130] sm:$0xff] }
 0x17c   : > { %15174 = vmatmul.mubr.msk.f32.vlgmr.msra.gmra.mrb[0].mxu0 %vm720_vm1, %v2278_v34  ;;  %v2702_v34 = vld [vmem:[#allocation2 + $0x19] sm:$0xff] }
 0x17d   : > { %15228 = vmatpush3.msra.mxu0 %v630_v28  ;;  %15176 = vmatprep.mubr.msk.f32.mxu0 %vm720_vm1, %v2279_v35  ;;  %v2286_v28 = vld [vmem:[#allocation2 + $0x60] sm:$0xff] }
 0x17e   : > { %15283 = vmatprep.subr.mxu0 %v18175_v33  ;;  %v2703_v35 = vld [vmem:[#allocation2 + $0x21] sm:$0xff] }
 0x180   : > { %15177 = vmatmul.mubr.msk.f32.gmra.mrb[2].mxu0 %vm720_vm1, %v2280_v30  ;;  %v18214_v30 = vld [vmem:[#allocation2 + $0x29] sm:$0xff] }
 0x181   : > { %15179 = vmatprep.mubr.msk.f32.mxu0 %vm720_vm1, %v2281_v31  ;;  %v18217_v31 = vld [vmem:[%s17974_s14 + $0x38] sm:$0xff] }
 0x184   : > { %15180 = vmatmul.mubr.msk.f32.gmra.mrb[4].mxu0 %vm720_vm1, %v2282_v29  ;;  %v18223_v29 = vld [vmem:[#allocation2 + $0x31] sm:$0xff] }
 0x185   : > { %15182 = vmatprep.mubr.msk.f32.mxu0 %vm720_vm1, %v2283_v32  ;;  %v18225_v32 = vld [vmem:[#allocation2 + $0x39] sm:$0xff] }
 0x188   : > { %15183 = vmatmul.mubr.msk.f32.gmra.mrb[6].mxu0 %vm720_vm1, %v2284_v43  ;;  %v18232_v43 = vld [vmem:[#allocation2 + $0x41] sm:$0xff] }
 0x189   : > { %15185 = vmatprep.mubr.msk.f32.mxu0 %vm720_vm1, %v2285_v44  ;;  %v18234_v44 = vld [vmem:[#allocation2 + $0x49] sm:$0xff] }
 0x18c   : > { %15186 = vmatmul.mubr.msk.f32.gmra.mrb[8].mxu0 %vm720_vm1, %v2286_v28  ;;  %v18242_v28 = vld [vmem:[#allocation2 + $0x59] sm:$0xff] }
 0x18d   : > { %15188 = vmatprep.mubr.msk.f32.mxu0 %vm720_vm1, %v2287_v45  ;;  %v18248_v45 = vld [vmem:[#allocation2 + $0x61] sm:$0xff] }
 0x190   : > { %15189 = vmatmul.mubr.msk.f32.gmra.mrb[10].mxu0 %vm720_vm1, %v2288_v60  ;;  %v18250_v60 = vld [vmem:[#allocation2 + $0x69] sm:$0xff] }
 0x191   : > { %15191 = vmatprep.mubr.msk.f32.mxu0 %vm720_vm1, %v2289_v46  ;;  %v2713_v46 = vld [vmem:[#allocation2 + $0x71] sm:$0xff] }
 0x194   : > { %15192 = vmatmul.mubr.msk.f32.gmra.mrb[12].mxu0 %vm720_vm1, %v2290_v47  ;;  %v2714_v47 = vld [vmem:[#allocation2 + $0x79] sm:$0xff] }
 0x195   : > { %15194 = vmatprep.mubr.msk.f32.mxu0 %vm720_vm1, %v2291_v48  ;;  %v2715_v48 = vld [vmem:[#allocation2 + $0x81] sm:$0xff] }
 0x198   : > { %15195 = vmatmul.mubr.msk.f32.gmra.mrb[14].mxu0 %vm720_vm1, %v2292_v49  ;;  %v2716_v49 = vld [vmem:[#allocation2 + $0x89] sm:$0xff] }
 0x199   : > { %15197 = vmatprep.mubr.msk.f32.mxu0 %vm720_vm1, %v2293_v50  ;;  %v2717_v50 = vld [vmem:[#allocation2 + $0x91] sm:$0xff] }
 0x19c   : > { %15198 = vmatmul.mubr.msk.f32.gmra.mrb[16].mxu0 %vm720_vm1, %v2294_v51  ;;  %v2718_v51 = vld [vmem:[#allocation2 + $0x99] sm:$0xff] }
 0x19d   : > { %15200 = vmatprep.mubr.msk.f32.mxu0 %vm720_vm1, %v2295_v52  ;;  %v2719_v52 = vld [vmem:[#allocation2 + $0xa1] sm:$0xff] }
 0x1a0   : > { %15201 = vmatmul.mubr.msk.f32.gmra.mrb[18].mxu0 %vm720_vm1, %v2296_v53  ;;  %v2720_v53 = vld [vmem:[#allocation2 + $0xa9] sm:$0xff] }
 0x1a1   : > { %15203 = vmatprep.mubr.msk.f32.mxu0 %vm720_vm1, %v2297_v55  ;;  %v2721_v55 = vld [vmem:[#allocation2 + $0xb1] sm:$0xff] }
 0x1a4   : > { %15204 = vmatmul.mubr.msk.f32.gmra.mrb[20].mxu0 %vm720_vm1, %v2298_v56  ;;  %v2722_v56 = vld [vmem:[#allocation2 + $0xb9] sm:$0xff] }
 0x1a5   : > { %15206 = vmatprep.mubr.msk.f32.mxu0 %vm720_vm1, %v2299_v57  ;;  %v2723_v57 = vld [vmem:[#allocation2 + $0xc1] sm:$0xff] }
 0x1a8   : > { %15207 = vmatmul.mubr.msk.f32.gmra.mrb[22].mxu0 %vm720_vm1, %v2300_v58  ;;  %v2724_v58 = vld [vmem:[#allocation2 + $0xc9] sm:$0xff] }
 0x1a9   : > { %15209 = vmatprep.mubr.msk.f32.mxu0 %vm720_vm1, %v2301_v59  ;;  %v2725_v59 = vld [vmem:[#allocation2 + $0xd1] sm:$0xff] }
 0x1ac   : > { %15210 = vmatmul.mubr.msk.f32.gmra.mrb[24].mxu0 %vm720_vm1, %v2302_v61  ;;  %v2726_v61 = vld [vmem:[#allocation2 + $0xd9] sm:$0xff] }
 0x1ad   : > { %15212 = vmatprep.mubr.msk.f32.mxu0 %vm720_vm1, %v2303_v62  ;;  %v2727_v62 = vld [vmem:[#allocation2 + $0xe1] sm:$0xff] }
 0x1b0   : > { %15213 = vmatmul.mubr.msk.f32.gmra.mrb[26].mxu0 %vm720_vm1, %v2304_v63  ;;  %v2728_v63 = vld [vmem:[#allocation2 + $0xe9] sm:$0xff] }
 0x1b1   : > { %15215 = vmatprep.mubr.msk.f32.mxu0 %vm720_vm1, %v2305_v36  ;;  %v2729_v36 = vld [vmem:[#allocation2 + $0xf1] sm:$0xff] }
 0x1b4   : > { %15216 = vmatmul.mubr.msk.f32.gmra.mrb[28].mxu0 %vm720_vm1, %v2306_v37  ;;  %v2730_v37 = vld [vmem:[#allocation2 + $0xf9] sm:$0xff] }
 0x1b5   : > { %15218 = vmatprep.mubr.msk.f32.mxu0 %vm720_vm1, %v2307_v38  ;;  %v2731_v38 = vld [vmem:[#allocation2 + $0x101] sm:$0xff] }
 0x1b8   : > { %15219 = vmatmul.mubr.msk.f32.gmra.mrb[30].mxu0 %vm720_vm1, %v2308_v54  ;;  %v2732_v54 = vld [vmem:[#allocation2 + $0x109] sm:$0xff] }
 0x1b9   : > { %15221 = vmatprep.mubr.msk.f32.mxu0 %vm720_vm1, %v2309_v39  ;;  %v2733_v39 = vld [vmem:[#allocation2 + $0x111] sm:$0xff] }
 0x1bc   : > { %15222 = vmatmul.mubr.msk.f32.gmra.mrb[32].mxu0 %vm720_vm1, %v2310_v40  ;;  %v2734_v40 = vld [vmem:[#allocation2 + $0x119] sm:$0xff] }
 0x1bd   : > { %15224 = vmatprep.mubr.msk.f32.mxu0 %vm720_vm1, %v2311_v41  ;;  %v2735_v41 = vld [vmem:[#allocation2 + $0x121] sm:$0xff] }
 0x1c0   : > { %15225 = vmatmul.mubr.msk.f32.gmra.mrb[34].mxu0 %vm720_vm1, %v2312_v42  ;;  %v2736_v42 = vld [vmem:[#allocation2 + $0x129] sm:$0xff] }
 0x1c1   : > { %15229 = vmatprep.mubr.msk.f32.mxu0 %vm720_vm1, %v2702_v34  ;;  %v2737_v34 = vld [vmem:[#allocation2 + $0x131] sm:$0xff] }
 0x1c4   : > { %15230 = vmatmul.mubr.msk.f32.vlgmr.msra.gmra.mrb[0].mxu0 %vm720_vm1, %v2703_v35  ;;  %v18284_v35 = vld [vmem:[%s17974_s14 + $0x40] sm:$0xff]  ;;  %s13612_s14 = sshll.u32 %s17408_s21, 1 }
 0x1c5   : > { %15284 = vmatpush3.msra.mxu0 %v18175_v33  ;;  %15232 = vmatprep.mubr.msk.f32.mxu0 %vm720_vm1, %v18214_v30  ;;  %v18240_v33 = vld [vmem:[#allocation2 + $0x51] sm:$0xff] }
 0x1c6   : > { %15339 = vmatprep.subr.mxu0 %v18217_v31 }
 0x1c8   : > { %15233 = vmatmul.mubr.msk.f32.gmra.mrb[2].mxu0 %vm720_vm1, %v18223_v29 }
 0x1c9   : > { %15235 = vmatprep.mubr.msk.f32.mxu0 %vm720_vm1, %v18225_v32 }
 0x1cc   : > { %15236 = vmatmul.mubr.msk.f32.gmra.mrb[4].mxu0 %vm720_vm1, %v18232_v43 }
 0x1cd   : > { %15238 = vmatprep.mubr.msk.f32.mxu0 %vm720_vm1, %v18234_v44 }
 0x1d0   : > { %15239 = vmatmul.mubr.msk.f32.gmra.mrb[6].mxu0 %vm720_vm1, %v18240_v33 }
 0x1d1   : > { %15241 = vmatprep.mubr.msk.f32.mxu0 %vm720_vm1, %v18242_v28 }
 0x1d4   : > { %15242 = vmatmul.mubr.msk.f32.gmra.mrb[8].mxu0 %vm720_vm1, %v18248_v45 }
 0x1d5   : > { %15244 = vmatprep.mubr.msk.f32.mxu0 %vm720_vm1, %v18250_v60 }
 0x1d8   : > { %15245 = vmatmul.mubr.msk.f32.gmra.mrb[10].mxu0 %vm720_vm1, %v2713_v46 }
 0x1d9   : > { %15247 = vmatprep.mubr.msk.f32.mxu0 %vm720_vm1, %v2714_v47 }
 0x1dc   : > { %15248 = vmatmul.mubr.msk.f32.gmra.mrb[12].mxu0 %vm720_vm1, %v2715_v48 }
 0x1dd   : > { %15250 = vmatprep.mubr.msk.f32.mxu0 %vm720_vm1, %v2716_v49 }
 0x1e0   : > { %15251 = vmatmul.mubr.msk.f32.gmra.mrb[14].mxu0 %vm720_vm1, %v2717_v50 }
 0x1e1   : > { %15253 = vmatprep.mubr.msk.f32.mxu0 %vm720_vm1, %v2718_v51 }
 0x1e4   : > { %15254 = vmatmul.mubr.msk.f32.gmra.mrb[16].mxu0 %vm720_vm1, %v2719_v52 }
 0x1e5   : > { %15256 = vmatprep.mubr.msk.f32.mxu0 %vm720_vm1, %v2720_v53 }
 0x1e8   : > { %15257 = vmatmul.mubr.msk.f32.gmra.mrb[18].mxu0 %vm720_vm1, %v2721_v55 }
 0x1e9   : > { %15259 = vmatprep.mubr.msk.f32.mxu0 %vm720_vm1, %v2722_v56 }
 0x1ec   : > { %15260 = vmatmul.mubr.msk.f32.gmra.mrb[20].mxu0 %vm720_vm1, %v2723_v57 }
 0x1ed   : > { %15262 = vmatprep.mubr.msk.f32.mxu0 %vm720_vm1, %v2724_v58 }
 0x1f0   : > { %15263 = vmatmul.mubr.msk.f32.gmra.mrb[22].mxu0 %vm720_vm1, %v2725_v59 }
 0x1f1   : > { %15265 = vmatprep.mubr.msk.f32.mxu0 %vm720_vm1, %v2726_v61 }
 0x1f4   : > { %15266 = vmatmul.mubr.msk.f32.gmra.mrb[24].mxu0 %vm720_vm1, %v2727_v62 }
 0x1f5   : > { %15268 = vmatprep.mubr.msk.f32.mxu0 %vm720_vm1, %v2728_v63 }
 0x1f8   : > { %15269 = vmatmul.mubr.msk.f32.gmra.mrb[26].mxu0 %vm720_vm1, %v2729_v36 }
 0x1f9   : > { %15271 = vmatprep.mubr.msk.f32.mxu0 %vm720_vm1, %v2730_v37 }
 0x1fc   : > { %15272 = vmatmul.mubr.msk.f32.gmra.mrb[28].mxu0 %vm720_vm1, %v2731_v38 }
 0x1fd   : > { %15274 = vmatprep.mubr.msk.f32.mxu0 %vm720_vm1, %v2732_v54 }
 0x200   : > { %15275 = vmatmul.mubr.msk.f32.gmra.mrb[30].mxu0 %vm720_vm1, %v2733_v39 }
 0x201   : > { %15277 = vmatprep.mubr.msk.f32.mxu0 %vm720_vm1, %v2734_v40 }
 0x204   : > { %15278 = vmatmul.mubr.msk.f32.gmra.mrb[32].mxu0 %vm720_vm1, %v2735_v41 }
 0x205   : > { %15280 = vmatprep.mubr.msk.f32.mxu0 %vm720_vm1, %v2736_v42 }
 0x208   : > { %15281 = vmatmul.mubr.msk.f32.gmra.mrb[34].mxu0 %vm720_vm1, %v2737_v34 }
 0x209   : > { %15285 = vmatprep.mubr.msk.f32.mxu0 %vm720_vm1, %v18214_v30  ;;  %v17427_v30 = vmov 0  }
 0x20a   : > { %17380 = vset.pattern.permute.xlu0 %v17427_v30  ;;  %17381 = vset.pattern.permute.xlu1 %v17427_v30  ;;  %v3994_v30 = vld [vmem:[#allocation2 + $0xb3] sm:$0xff] }
 0x20b   : > { %4482 = vperm.xlu0 %17380, %v17530_v0   ;;  %4492 = vperm.xlu1 %17381, %v17540_v2   ;;  %v3161_v0 = vld [vmem:[#allocation2 + $0x139] sm:$0xff]  ;;  %v3552_v2 = vld [vmem:[#allocation2 + $0x2a] sm:$0xff] }
 0x20c   : > { %15286 = vmatmul.mubr.msk.f32.vlgmr.msra.gmra.mrb[0].mxu0 %vm720_vm1, %v18223_v29  ;;  %v3571_v29 = vld [vmem:[#allocation2 + $0xc2] sm:$0xff] }
 0x20d   : > { %15340 = vmatpush3.msra.mxu0 %v18217_v31  ;;  %15288 = vmatprep.mubr.msk.f32.mxu0 %vm720_vm1, %v18225_v32  ;;  %v20324_v31 = vld [vmem:[#allocation12_spill] sm:$0xff]  ;;  %v3572_v32 = vld [vmem:[#allocation2 + $0xca] sm:$0xff] }
 0x20e   : > { %15395 = vmatprep.subr.mxu0 %v18284_v35 }
 0x20f   : > { %4487 = vperm.xlu0 %17380, %v17535_v1   ;;  %4497 = vperm.xlu1 %17381, %v17545_v3   ;;  %v3162_v1 = vld [vmem:[#allocation2 + $0x141] sm:$0xff]  ;;  %v3553_v3 = vld [vmem:[#allocation2 + $0x32] sm:$0xff] }
 0x210   : > { %15289 = vmatmul.mubr.msk.f32.gmra.mrb[2].mxu0 %vm720_vm1, %v18232_v43  ;;  %v3573_v43 = vld [vmem:[#allocation2 + $0xd2] sm:$0xff] }
 0x211   : > { %15291 = vmatprep.mubr.msk.f32.mxu0 %vm720_vm1, %v18234_v44  ;;  %v3574_v44 = vld [vmem:[#allocation2 + $0xda] sm:$0xff] }
 0x213   : > { %4502 = vperm.xlu0 %17380, %v17550_v4   ;;  %4507 = vperm.xlu1 %17381, %v17555_v5   ;;  %v3554_v4 = vld [vmem:[#allocation2 + $0x3a] sm:$0xff]  ;;  %v3555_v5 = vld [vmem:[#allocation2 + $0x42] sm:$0xff] }
 0x214   : > { %15292 = vmatmul.mubr.msk.f32.gmra.mrb[4].mxu0 %vm720_vm1, %v18240_v33  ;;  %v3575_v33 = vld [vmem:[#allocation2 + $0xe2] sm:$0xff] }
 0x215   : > { %15294 = vmatprep.mubr.msk.f32.mxu0 %vm720_vm1, %v18242_v28  ;;  %v3576_v28 = vld [vmem:[#allocation2 + $0xea] sm:$0xff] }
 0x217   : > { %4512 = vperm.xlu0 %17380, %v17560_v6   ;;  %4517 = vperm.xlu1 %17381, %v17565_v7   ;;  %v3556_v6 = vld [vmem:[#allocation2 + $0x4a] sm:$0xff]  ;;  %v3557_v7 = vld [vmem:[#allocation2 + $0x52] sm:$0xff] }
 0x218   : > { %15295 = vmatmul.mubr.msk.f32.gmra.mrb[6].mxu0 %vm720_vm1, %v18248_v45  ;;  %v3577_v45 = vld [vmem:[#allocation2 + $0xf2] sm:$0xff] }
 0x219   : > { %15297 = vmatprep.mubr.msk.f32.mxu0 %vm720_vm1, %v18250_v60  ;;  %v3578_v60 = vld [vmem:[#allocation2 + $0xfa] sm:$0xff] }
 0x21b   : > { %4522 = vperm.xlu0 %17380, %v17570_v8   ;;  %4527 = vperm.xlu1 %17381, %v17575_v9   ;;  %v3558_v8 = vld [vmem:[#allocation2 + $0x5a] sm:$0xff]  ;;  %v3559_v9 = vld [vmem:[#allocation2 + $0x62] sm:$0xff] }
 0x21c   : > { %15298 = vmatmul.mubr.msk.f32.gmra.mrb[8].mxu0 %vm720_vm1, %v2713_v46  ;;  %v3579_v46 = vld [vmem:[#allocation2 + $0x102] sm:$0xff] }
 0x21d   : > { %15300 = vmatprep.mubr.msk.f32.mxu0 %vm720_vm1, %v2714_v47  ;;  %v3580_v47 = vld [vmem:[#allocation2 + $0x10a] sm:$0xff] }
 0x21f   : > { %4532 = vperm.xlu0 %17380, %v17580_v10   ;;  %4537 = vperm.xlu1 %17381, %v17585_v11   ;;  %v3560_v10 = vld [vmem:[#allocation2 + $0x6a] sm:$0xff]  ;;  %v3561_v11 = vld [vmem:[#allocation2 + $0x72] sm:$0xff] }
 0x220   : > { %15301 = vmatmul.mubr.msk.f32.gmra.mrb[10].mxu0 %vm720_vm1, %v2715_v48  ;;  %v3581_v48 = vld [vmem:[#allocation2 + $0x112] sm:$0xff] }
 0x221   : > { %15303 = vmatprep.mubr.msk.f32.mxu0 %vm720_vm1, %v2716_v49  ;;  %v3582_v49 = vld [vmem:[#allocation2 + $0x11a] sm:$0xff] }
 0x223   : > { %4542 = vperm.xlu0 %17380, %v17590_v12   ;;  %4547 = vperm.xlu1 %17381, %v17595_v13   ;;  %v3562_v12 = vld [vmem:[#allocation2 + $0x7a] sm:$0xff]  ;;  %v3563_v13 = vld [vmem:[#allocation2 + $0x82] sm:$0xff] }
 0x224   : > { %15304 = vmatmul.mubr.msk.f32.gmra.mrb[12].mxu0 %vm720_vm1, %v2717_v50  ;;  %v3583_v50 = vld [vmem:[#allocation2 + $0x122] sm:$0xff] }
 0x225   : > { %15306 = vmatprep.mubr.msk.f32.mxu0 %vm720_vm1, %v2718_v51  ;;  %v3584_v51 = vld [vmem:[#allocation2 + $0x12a] sm:$0xff] }
 0x227   : > { %4552 = vperm.xlu0 %17380, %v17600_v14   ;;  %4557 = vperm.xlu1 %17381, %v17605_v15   ;;  %v3564_v14 = vld [vmem:[#allocation2 + $0x8a] sm:$0xff]  ;;  %v20317_v15 = vld [vmem:[#allocation5_spill] sm:$0xff] }
 0x228   : > { %15307 = vmatmul.mubr.msk.f32.gmra.mrb[14].mxu0 %vm720_vm1, %v2719_v52  ;;  %v3585_v52 = vld [vmem:[#allocation2 + $0x132] sm:$0xff] }
 0x229   : > { %15309 = vmatprep.mubr.msk.f32.mxu0 %vm720_vm1, %v2720_v53  ;;  %v3586_v53 = vld [vmem:[#allocation2 + $0x13a] sm:$0xff] }
 0x22b   : > { %4562 = vperm.xlu0 %17380, %v17610_v16   ;;  %4567 = vperm.xlu1 %17381, %v17615_v17   ;;  %v20318_v16 = vld [vmem:[#allocation6_spill] sm:$0xff]  ;;  %v3565_v17 = vld [vmem:[#allocation2 + $0x92] sm:$0xff] }
 0x22c   : > { %15310 = vmatmul.mubr.msk.f32.gmra.mrb[16].mxu0 %vm720_vm1, %v2721_v55  ;;  %v3587_v55 = vld [vmem:[#allocation2 + $0x142] sm:$0xff] }
 0x22d   : > { %15312 = vmatprep.mubr.msk.f32.mxu0 %vm720_vm1, %v2722_v56  ;;  %v3977_v56 = vld [vmem:[#allocation2 + $0x2b] sm:$0xff] }
 0x22f   : > { %4572 = vperm.xlu0 %17380, %v17630_v18   ;;  %4577 = vperm.xlu1 %17381, %v17635_v19   ;;  %v3566_v18 = vld [vmem:[#allocation2 + $0x9a] sm:$0xff]  ;;  %v20319_v19 = vld [vmem:[#allocation7_spill] sm:$0xff] }
 0x230   : > { %15313 = vmatmul.mubr.msk.f32.gmra.mrb[18].mxu0 %vm720_vm1, %v2723_v57  ;;  %v3978_v57 = vld [vmem:[#allocation2 + $0x33] sm:$0xff] }
 0x231   : > { %15315 = vmatprep.mubr.msk.f32.mxu0 %vm720_vm1, %v2724_v58  ;;  %v3979_v58 = vld [vmem:[#allocation2 + $0x3b] sm:$0xff] }
 0x233   : > { %4582 = vperm.xlu0 %17380, %v17640_v20   ;;  %4587 = vperm.xlu1 %17381, %v17645_v21   ;;  %v20320_v20 = vld [vmem:[#allocation8_spill] sm:$0xff]  ;;  %v3567_v21 = vld [vmem:[#allocation2 + $0xa2] sm:$0xff] }
 0x234   : > { %15316 = vmatmul.mubr.msk.f32.gmra.mrb[20].mxu0 %vm720_vm1, %v2725_v59  ;;  %v3980_v59 = vld [vmem:[#allocation2 + $0x43] sm:$0xff] }
 0x235   : > { %15318 = vmatprep.mubr.msk.f32.mxu0 %vm720_vm1, %v2726_v61  ;;  %v3981_v61 = vld [vmem:[#allocation2 + $0x4b] sm:$0xff] }
 0x237   : > { %4592 = vperm.xlu0 %17380, %v17650_v22   ;;  %4597 = vperm.xlu1 %17381, %v17655_v23   ;;  %v3568_v22 = vld [vmem:[#allocation2 + $0xaa] sm:$0xff]  ;;  %v20321_v23 = vld [vmem:[#allocation9_spill] sm:$0xff] }
 0x238   : > { %15319 = vmatmul.mubr.msk.f32.gmra.mrb[22].mxu0 %vm720_vm1, %v2727_v62  ;;  %v3982_v62 = vld [vmem:[#allocation2 + $0x53] sm:$0xff] }
 0x239   : > { %15321 = vmatprep.mubr.msk.f32.mxu0 %vm720_vm1, %v2728_v63  ;;  %v3983_v63 = vld [vmem:[#allocation2 + $0x5b] sm:$0xff] }
 0x23b   : > { %4602 = vperm.xlu0 %17380, %v17660_v24   ;;  %4607 = vperm.xlu1 %17381, %v17665_v25   ;;  %v20322_v24 = vld [vmem:[#allocation10_spill] sm:$0xff]  ;;  %v3569_v25 = vld [vmem:[#allocation2 + $0xb2] sm:$0xff] }
 0x23c   : > { %15322 = vmatmul.mubr.msk.f32.gmra.mrb[24].mxu0 %vm720_vm1, %v2729_v36  ;;  %v3984_v36 = vld [vmem:[#allocation2 + $0x63] sm:$0xff] }
 0x23d   : > { %15324 = vmatprep.mubr.msk.f32.mxu0 %vm720_vm1, %v2730_v37  ;;  %v3985_v37 = vld [vmem:[#allocation2 + $0x6b] sm:$0xff] }
 0x23f   : > { %4612 = vperm.xlu0 %17380, %v17670_v26   ;;  %4617 = vperm.xlu1 %17381, %v17675_v27   ;;  %v3570_v26 = vld [vmem:[#allocation2 + $0xba] sm:$0xff]  ;;  %v20323_v27 = vld [vmem:[#allocation11_spill] sm:$0xff] }
 0x240   : > { %15325 = vmatmul.mubr.msk.f32.gmra.mrb[26].mxu0 %vm720_vm1, %v2731_v38  ;;  %v3986_v38 = vld [vmem:[#allocation2 + $0x73] sm:$0xff] }
 0x241   : > { %15327 = vmatprep.mubr.msk.f32.mxu0 %vm720_vm1, %v2732_v54  ;;  %v3987_v54 = vld [vmem:[#allocation2 + $0x7b] sm:$0xff] }
 0x243   : > { %4622 = vperm.xlu0 %17380, %v20317_v15   ;;  %4627 = vperm.xlu1 %17381, %v20318_v16   ;;  %v4010_v15 = vld [vmem:[#allocation2 + $0x133] sm:$0xff]  ;;  %v4011_v16 = vld [vmem:[#allocation2 + $0x13b] sm:$0xff] }
 0x244   : > { %15328 = vmatmul.mubr.msk.f32.gmra.mrb[28].mxu0 %vm720_vm1, %v2733_v39  ;;  %v3988_v39 = vld [vmem:[#allocation2 + $0x83] sm:$0xff] }
 0x245   : > { %15330 = vmatprep.mubr.msk.f32.mxu0 %vm720_vm1, %v2734_v40  ;;  %v3989_v40 = vld [vmem:[#allocation2 + $0x8b] sm:$0xff] }
 0x247   : > { %4632 = vperm.xlu0 %17380, %v20319_v19   ;;  %4637 = vperm.xlu1 %17381, %v20320_v20   ;;  %v4768_v19 = vld [vmem:[#allocation3 + $0x6] sm:$0xff]  ;;  %v4769_v20 = vld [vmem:[#allocation3 + $0xe] sm:$0xff] }
 0x248   : > { %15331 = vmatmul.mubr.msk.f32.gmra.mrb[30].mxu0 %vm720_vm1, %v2735_v41  ;;  %v3990_v41 = vld [vmem:[#allocation2 + $0x93] sm:$0xff]  ;;  %15453 = vmatprep.mubr.msk.f32.mxu1 %vm720_vm1, %v4768_v19 }
 0x249   : > { %15333 = vmatprep.mubr.msk.f32.mxu0 %vm720_vm1, %v2736_v42  ;;  %v3991_v42 = vld [vmem:[#allocation2 + $0x9b] sm:$0xff] }
 0x24b   : > { %4642 = vperm.xlu0 %17380, %v20321_v23   ;;  %4647 = vperm.xlu1 %17381, %v20322_v24  }
 0x24c   : > { %15334 = vmatmul.mubr.msk.f32.gmra.mrb[32].mxu0 %vm720_vm1, %v2737_v34  ;;  %v3992_v34 = vld [vmem:[#allocation2 + $0xa3] sm:$0xff] }
 0x24d   : > { %15336 = vmatprep.mubr.msk.f32.mxu0 %vm720_vm1, %v3161_v0  ;;  %v3995_v0 = vld [vmem:[#allocation2 + $0xbb] sm:$0xff] }
 0x24f   : > { %4652 = vperm.xlu0 %17380, %v20323_v27   ;;  %4657 = vperm.xlu1 %17381, %v20324_v31  }
 0x250   : > { %15337 = vmatmul.mubr.msk.f32.gmra.mrb[34].mxu0 %vm720_vm1, %v3162_v1  ;;  %v3996_v1 = vld [vmem:[#allocation2 + $0xc3] sm:$0xff] }
 0x251   : > { %15341 = vmatprep.mubr.msk.f32.mxu0 %vm720_vm1, %v3552_v2  ;;  %v3997_v2 = vld [vmem:[#allocation2 + $0xcb] sm:$0xff] }
 0x254   : > { %15342 = vmatmul.mubr.msk.f32.vlgmr.msra.gmra.mrb[0].mxu0 %vm720_vm1, %v3553_v3  ;;  %v3998_v3 = vld [vmem:[#allocation2 + $0xd3] sm:$0xff] }
 0x255   : > { %15396 = vmatpush3.msra.mxu0 %v18284_v35  ;;  %15344 = vmatprep.mubr.msk.f32.mxu0 %vm720_vm1, %v3554_v4  ;;  %v3993_v35 = vld [vmem:[#allocation2 + $0xab] sm:$0xff]  ;;  %v3999_v4 = vld [vmem:[#allocation2 + $0xdb] sm:$0xff] }
 0x258   : > { %15345 = vmatmul.mubr.msk.f32.gmra.mrb[2].mxu0 %vm720_vm1, %v3555_v5  ;;  %v4000_v5 = vld [vmem:[#allocation2 + $0xe3] sm:$0xff] }
 0x259   : > { %15347 = vmatprep.mubr.msk.f32.mxu0 %vm720_vm1, %v3556_v6  ;;  %v4001_v6 = vld [vmem:[#allocation2 + $0xeb] sm:$0xff] }
 0x25c   : > { %15348 = vmatmul.mubr.msk.f32.gmra.mrb[4].mxu0 %vm720_vm1, %v3557_v7  ;;  %v4002_v7 = vld [vmem:[#allocation2 + $0xf3] sm:$0xff] }
 0x25d   : > { %15350 = vmatprep.mubr.msk.f32.mxu0 %vm720_vm1, %v3558_v8  ;;  %v4003_v8 = vld [vmem:[#allocation2 + $0xfb] sm:$0xff] }
 0x260   : > { %15351 = vmatmul.mubr.msk.f32.gmra.mrb[6].mxu0 %vm720_vm1, %v3559_v9  ;;  %v4004_v9 = vld [vmem:[#allocation2 + $0x103] sm:$0xff] }
 0x261   : > { %15353 = vmatprep.mubr.msk.f32.mxu0 %vm720_vm1, %v3560_v10  ;;  %v4005_v10 = vld [vmem:[#allocation2 + $0x10b] sm:$0xff] }
 0x264   : > { %15354 = vmatmul.mubr.msk.f32.gmra.mrb[8].mxu0 %vm720_vm1, %v3561_v11  ;;  %v4006_v11 = vld [vmem:[#allocation2 + $0x113] sm:$0xff] }
 0x265   : > { %15356 = vmatprep.mubr.msk.f32.mxu0 %vm720_vm1, %v3562_v12  ;;  %v4007_v12 = vld [vmem:[#allocation2 + $0x11b] sm:$0xff] }
 0x268   : > { %15357 = vmatmul.mubr.msk.f32.gmra.mrb[10].mxu0 %vm720_vm1, %v3563_v13  ;;  %v4008_v13 = vld [vmem:[#allocation2 + $0x123] sm:$0xff] }
 0x269   : > { %15359 = vmatprep.mubr.msk.f32.mxu0 %vm720_vm1, %v3564_v14  ;;  %v4009_v14 = vld [vmem:[#allocation2 + $0x12b] sm:$0xff] }
 0x26c   : > { %15360 = vmatmul.mubr.msk.f32.gmra.mrb[12].mxu0 %vm720_vm1, %v3565_v17  ;;  %v4012_v17 = vld [vmem:[#allocation2 + $0x143] sm:$0xff] }
 0x26d   : > { %15362 = vmatprep.mubr.msk.f32.mxu0 %vm720_vm1, %v3566_v18  ;;  %v636_v18 = vld [vmem:[%s18445_s17 + $0x8] sm:$0xff] }
 0x26e   : > { %15451 = vmatprep.subr.mxu1 %v636_v18 }
 0x26f   : > { %15452 = vmatpush3.msra.mxu1 %v636_v18 }
 0x270   : > { %15363 = vmatmul.mubr.msk.f32.gmra.mrb[14].mxu0 %vm720_vm1, %v3567_v21  ;;  %15454 = vmatmul.mubr.msk.f32.vlgmr.msra.gmra.mrb[0].mxu1 %vm720_vm1, %v4769_v20  ;;  %v635_v21 = vld [vmem:[%s18445_s17] sm:$0xff] }
 0x271   : > { %15365 = vmatprep.mubr.msk.f32.mxu0 %vm720_vm1, %v3568_v22  ;;  %15507 = vmatprep.subr.mxu1 %v635_v21  ;;  %v18452_v22 = vld [vmem:[%s18445_s17 + $0x10] sm:$0xff] }
 0x272   : > { %15508 = vmatpush3.msra.mxu1 %v635_v21 }
 0x273   : > { %15563 = vmatprep.subr.mxu1 %v18452_v22 }
 0x274   : > { %15366 = vmatmul.mubr.msk.f32.gmra.mrb[16].mxu0 %vm720_vm1, %v3569_v25 }
 0x275   : > { %15368 = vmatprep.mubr.msk.f32.mxu0 %vm720_vm1, %v3570_v26 }
 0x278   : > { %15369 = vmatmul.mubr.msk.f32.gmra.mrb[18].mxu0 %vm720_vm1, %v3571_v29 }
 0x279   : > { %15371 = vmatprep.mubr.msk.f32.mxu0 %vm720_vm1, %v3572_v32 }
 0x27c   : > { %15372 = vmatmul.mubr.msk.f32.gmra.mrb[20].mxu0 %vm720_vm1, %v3573_v43 }
 0x27d   : > { %15374 = vmatprep.mubr.msk.f32.mxu0 %vm720_vm1, %v3574_v44 }
 0x280   : > { %15375 = vmatmul.mubr.msk.f32.gmra.mrb[22].mxu0 %vm720_vm1, %v3575_v33  ;;  %v18479_v33 = vld [vmem:[%s644_s20] ss:$0 sm:$0xff]  ;;  %s646_s20 = scalar_lea.vmem %s20292_s5, %s17408_s21 }
 0x281   : > { %15377 = vmatprep.mubr.msk.f32.mxu0 %vm720_vm1, %v3576_v28 }
 0x284   : > { %15378 = vmatmul.mubr.msk.f32.gmra.mrb[24].mxu0 %vm720_vm1, %v3577_v45 }
 0x285   : > { %15380 = vmatprep.mubr.msk.f32.mxu0 %vm720_vm1, %v3578_v60 }
 0x288   : > { %15381 = vmatmul.mubr.msk.f32.gmra.mrb[26].mxu0 %vm720_vm1, %v3579_v46 }
 0x289   : > { %15383 = vmatprep.mubr.msk.f32.mxu0 %vm720_vm1, %v3580_v47 }
 0x28a   : > { %v18455_v23 = vpop.permute.xlu1 %4492  ;;  %v18457_v24 = vpop.permute.xlu0 %4482 }
 0x28c   : > { %15384 = vmatmul.mubr.msk.f32.gmra.mrb[28].mxu0 %vm720_vm1, %v3581_v48 }
 0x28d   : > { %15386 = vmatprep.mubr.msk.f32.mxu0 %vm720_vm1, %v3582_v49 }
 0x28e   : > { %v18459_v25 = vpop.permute.xlu1 %4497  ;;  %v18461_v26 = vpop.permute.xlu0 %4487 }
 0x290   : > { %15387 = vmatmul.mubr.msk.f32.gmra.mrb[30].mxu0 %vm720_vm1, %v3583_v50 }
 0x291   : > { %15389 = vmatprep.mubr.msk.f32.mxu0 %vm720_vm1, %v3584_v51 }
 0x292   : > { %v18463_v27 = vpop.permute.xlu1 %4507  ;;  %v18465_v31 = vpop.permute.xlu0 %4502 }
 0x294   : > { %15390 = vmatmul.mubr.msk.f32.gmra.mrb[32].mxu0 %vm720_vm1, %v3585_v52 }
 0x295   : > { %15392 = vmatprep.mubr.msk.f32.mxu0 %vm720_vm1, %v3586_v53 }
 0x296   : > { %v18467_v29 = vpop.permute.xlu1 %4517  ;;  %v18469_v32 = vpop.permute.xlu0 %4512 }
 0x298   : > { %15393 = vmatmul.mubr.msk.f32.gmra.mrb[34].mxu0 %vm720_vm1, %v3587_v55 }
 0x299   : > { %15397 = vmatprep.mubr.msk.f32.mxu0 %vm720_vm1, %v3977_v56 }
 0x29a   : > { %v18471_v43 = vpop.permute.xlu1 %4527  ;;  %v18473_v44 = vpop.permute.xlu0 %4522 }
 0x29c   : > { %15398 = vmatmul.mubr.msk.f32.vlgmr.msra.gmra.mrb[0].mxu0 %vm720_vm1, %v3978_v57 }
 0x29d   : > { %15400 = vmatprep.mubr.msk.f32.mxu0 %vm720_vm1, %v3979_v58 }
 0x29e   : > { %v18481_v28 = vpop.permute.xlu1 %4537  ;;  %v18483_v60 = vpop.permute.xlu0 %4532 }
 0x2a0   : > { %15401 = vmatmul.mubr.msk.f32.gmra.mrb[2].mxu0 %vm720_vm1, %v3980_v59 }
 0x2a1   : > { %15403 = vmatprep.mubr.msk.f32.mxu0 %vm720_vm1, %v3981_v61 }
 0x2a2   : > { %v18489_v56 = vpop.permute.xlu1 %4547  ;;  %v18493_v59 = vpop.permute.xlu0 %4542 }
 0x2a4   : > { %15404 = vmatmul.mubr.msk.f32.gmra.mrb[4].mxu0 %vm720_vm1, %v3982_v62 }
 0x2a5   : > { %15406 = vmatprep.mubr.msk.f32.mxu0 %vm720_vm1, %v3983_v63 }
 0x2a8   : > { %15407 = vmatmul.mubr.msk.f32.gmra.mrb[6].mxu0 %vm720_vm1, %v3984_v36 }
 0x2a9   : > { %15409 = vmatprep.mubr.msk.f32.mxu0 %vm720_vm1, %v3985_v37 }
 0x2ac   : > { %15410 = vmatmul.mubr.msk.f32.gmra.mrb[8].mxu0 %vm720_vm1, %v3986_v38 }
 0x2ad   : > { %15412 = vmatprep.mubr.msk.f32.mxu0 %vm720_vm1, %v3987_v54 }
 0x2b0   : > { %15413 = vmatmul.mubr.msk.f32.gmra.mrb[10].mxu0 %vm720_vm1, %v3988_v39 }
 0x2b1   : > { %15415 = vmatprep.mubr.msk.f32.mxu0 %vm720_vm1, %v3989_v40 }
 0x2b4   : > { %15416 = vmatmul.mubr.msk.f32.gmra.mrb[12].mxu0 %vm720_vm1, %v3990_v41  ;;  %v18502_v41 = vpop.permute.xlu1 %4557 }
 0x2b5   : > { %15418 = vmatprep.mubr.msk.f32.mxu0 %vm720_vm1, %v3991_v42 }
 0x2b8   : > { %15419 = vmatmul.mubr.msk.f32.gmra.mrb[14].mxu0 %vm720_vm1, %v3992_v34 }
 0x2b9   : > { %15421 = vmatprep.mubr.msk.f32.mxu0 %vm720_vm1, %v3993_v35  ;;  %v18505_v35 = vpop.permute.xlu0 %4552 }
 0x2bc   : > { %15422 = vmatmul.mubr.msk.f32.gmra.mrb[16].mxu0 %vm720_vm1, %v3994_v30 }
 0x2bd   : > { %15424 = vmatprep.mubr.msk.f32.mxu0 %vm720_vm1, %v3995_v0 }
 0x2c0   : > { %15425 = vmatmul.mubr.msk.f32.gmra.mrb[18].mxu0 %vm720_vm1, %v3996_v1 }
 0x2c1   : > { %15427 = vmatprep.mubr.msk.f32.mxu0 %vm720_vm1, %v3997_v2 }
 0x2c4   : > { %15428 = vmatmul.mubr.msk.f32.gmra.mrb[20].mxu0 %vm720_vm1, %v3998_v3 }
 0x2c5   : > { %15430 = vmatprep.mubr.msk.f32.mxu0 %vm720_vm1, %v3999_v4 }
 0x2c8   : > { %15431 = vmatmul.mubr.msk.f32.gmra.mrb[22].mxu0 %vm720_vm1, %v4000_v5 }
 0x2c9   : > { %15433 = vmatprep.mubr.msk.f32.mxu0 %vm720_vm1, %v4001_v6 }
 0x2cc   : > { %15434 = vmatmul.mubr.msk.f32.gmra.mrb[24].mxu0 %vm720_vm1, %v4002_v7 }
 0x2cd   : > { %15436 = vmatprep.mubr.msk.f32.mxu0 %vm720_vm1, %v4003_v8 }
 0x2d0   : > { %15437 = vmatmul.mubr.msk.f32.gmra.mrb[26].mxu0 %vm720_vm1, %v4004_v9 }
 0x2d1   : > { %15439 = vmatprep.mubr.msk.f32.mxu0 %vm720_vm1, %v4005_v10 }
 0x2d4   : > { %15440 = vmatmul.mubr.msk.f32.gmra.mrb[28].mxu0 %vm720_vm1, %v4006_v11 }
 0x2d5   : > { %15442 = vmatprep.mubr.msk.f32.mxu0 %vm720_vm1, %v4007_v12  ;;  %v18517_v12 = vpop.permute.xlu1 %4567 }
 0x2d8   : > { %15443 = vmatmul.mubr.msk.f32.gmra.mrb[30].mxu0 %vm720_vm1, %v4008_v13 }
 0x2d9   : > { %15445 = vmatprep.mubr.msk.f32.mxu0 %vm720_vm1, %v4009_v14 }
 0x2dc   : > { %15446 = vmatmul.mubr.msk.f32.gmra.mrb[32].mxu0 %vm720_vm1, %v4010_v15  ;;  %v18521_v15 = vpop.permute.xlu0 %4562 }
 0x2dd   : > { %15448 = vmatprep.mubr.msk.f32.mxu0 %vm720_vm1, %v4011_v16 }
 0x2e0   : > { %15449 = vmatmul.mubr.msk.f32.gmra.mrb[34].mxu0 %vm720_vm1, %v4012_v17 }
 0x36f   : > { %v15399_v45 = vpop.f32.mrb[0].mxu0 }
 0x370   : > { %v4409_v46 = vadd.f32 %v15399_v45, %v18479_v33  ;;  %v4187_v47 = vpop.f32.mrb[1].mxu0 }
 0x371   : > { %v4408_v48 = vadd.f32 %v18479_v33, %v4187_v47 }
 0x372   : > { %v4445_v49 = vmax.f32 %v4409_v46, 0.0 }
 0x373   : > { %v4444_v50 = vmax.f32 %v4408_v48, 0.0  ;;  %v15402_v51 = vpop.f32.mrb[2].mxu0 }
 0x374   : > { %v4661_v52 = vmul.f32 %v18461_v26, %v4445_v49  ;;  %v4411_v53 = vadd.f32 %v15402_v51, %v18479_v33  ;;  %v4197_v55 = vpop.f32.mrb[3].mxu0 }
 0x375   : > { %v4660_v57 = vmul.f32 %v18457_v24, %v4444_v50  ;;  %v4410_v58 = vadd.f32 %v18479_v33, %v4197_v55 }
 0x376   : > { %4697 = vst.msk [vmem:[#allocation3 + $0x20] sm:$0xff] %vm720_vm1, %v4661_v52  ;;  %v4447_v61 = vmax.f32 %v4411_v53, 0.0  ;;  %v18532_v52 = vpop.permute.xlu1 %4577 }
 0x377   : > { %4696 = vst.msk [vmem:[#allocation3 + $0x18] sm:$0xff] %vm720_vm1, %v4660_v57  ;;  %v4446_v62 = vmax.f32 %v4410_v58, 0.0  ;;  %v15405_v63 = vpop.f32.mrb[4].mxu0  ;;  %v18536_v57 = vpop.permute.xlu0 %4572 }
 0x378   : > { %v4663_v36 = vmul.f32 %v18459_v25, %v4447_v61  ;;  %v4413_v37 = vadd.f32 %v15405_v63, %v18479_v33  ;;  %v4207_v38 = vpop.f32.mrb[5].mxu0 }
 0x379   : > { %v4662_v54 = vmul.f32 %v18455_v23, %v4446_v62  ;;  %v4412_v39 = vadd.f32 %v18479_v33, %v4207_v38 }
 0x37a   : > { %4699 = vst.msk [vmem:[#allocation3 + $0x30] sm:$0xff] %vm720_vm1, %v4663_v36  ;;  %v4449_v40 = vmax.f32 %v4413_v37, 0.0 }
 0x37b   : > { %4698 = vst.msk [vmem:[#allocation3 + $0x28] sm:$0xff] %vm720_vm1, %v4662_v54  ;;  %v4448_v42 = vmax.f32 %v4412_v39, 0.0  ;;  %v15408_v34 = vpop.f32.mrb[6].mxu0 }
 0x37c   : > { %v4665_v30 = vmul.f32 %v18463_v27, %v4449_v40  ;;  %v4415_v0 = vadd.f32 %v15408_v34, %v18479_v33  ;;  %v4217_v1 = vpop.f32.mrb[7].mxu0 }
 0x37d   : > { %v4664_v2 = vmul.f32 %v18465_v31, %v4448_v42  ;;  %v4414_v3 = vadd.f32 %v18479_v33, %v4217_v1 }
 0x37e   : > { %4701 = vst.msk [vmem:[#allocation3 + $0x40] sm:$0xff] %vm720_vm1, %v4665_v30  ;;  %v4451_v4 = vmax.f32 %v4415_v0, 0.0  ;;  %v4770_v5 = vld [vmem:[#allocation3 + $0x16] sm:$0xff]  ;;  %v4771_v6 = vld [vmem:[#allocation3 + $0x1e] sm:$0xff]  ;;  %v18549_v0 = vpop.permute.xlu1 %4587 }
 0x37f   : > { %4700 = vst.msk [vmem:[#allocation3 + $0x38] sm:$0xff] %vm720_vm1, %v4664_v2  ;;  %v4450_v7 = vmax.f32 %v4414_v3, 0.0  ;;  %v15411_v8 = vpop.f32.mrb[8].mxu0  ;;  %15456 = vmatprep.mubr.msk.f32.mxu1 %vm720_vm1, %v4770_v5  ;;  %v18553_v3 = vpop.permute.xlu0 %4582 }
 0x380   : > { %v4667_v9 = vmul.f32 %v18467_v29, %v4451_v4  ;;  %v4417_v10 = vadd.f32 %v15411_v8, %v18479_v33  ;;  %v4227_v11 = vpop.f32.mrb[9].mxu0  ;;  %15457 = vmatmul.mubr.msk.f32.gmra.mrb[2].mxu1 %vm720_vm1, %v4771_v6 }
 0x381   : > { %v4666_v13 = vmul.f32 %v18469_v32, %v4450_v7  ;;  %v4416_v14 = vadd.f32 %v18479_v33, %v4227_v11 }
 0x382   : > { %4703 = vst.msk [vmem:[#allocation3 + $0x50] sm:$0xff] %vm720_vm1, %v4667_v9  ;;  %v4453_v16 = vmax.f32 %v4417_v10, 0.0  ;;  %v4772_v17 = vld [vmem:[#allocation3 + $0x26] sm:$0xff]  ;;  %v4773_v18 = vld [vmem:[#allocation3 + $0x2e] sm:$0xff] }
 0x383   : > { %4702 = vst.msk [vmem:[#allocation3 + $0x48] sm:$0xff] %vm720_vm1, %v4666_v13  ;;  %v4452_v19 = vmax.f32 %v4416_v14, 0.0  ;;  %v15414_v20 = vpop.f32.mrb[10].mxu0  ;;  %15459 = vmatprep.mubr.msk.f32.mxu1 %vm720_vm1, %v4772_v17 }
 0x384   : > { %v4669_v21 = vmul.f32 %v18471_v43, %v4453_v16  ;;  %v4419_v45 = vadd.f32 %v15414_v20, %v18479_v33  ;;  %v4237_v46 = vpop.f32.mrb[11].mxu0  ;;  %15460 = vmatmul.mubr.msk.f32.gmra.mrb[4].mxu1 %vm720_vm1, %v4773_v18 }
 0x385   : > { %v4668_v47 = vmul.f32 %v18473_v44, %v4452_v19  ;;  %v4418_v48 = vadd.f32 %v18479_v33, %v4237_v46  ;;  %v18564_v19 = vpop.permute.xlu1 %4597 }
 0x386   : > { %4705 = vst.msk [vmem:[#allocation3 + $0x60] sm:$0xff] %vm720_vm1, %v4669_v21  ;;  %v4455_v49 = vmax.f32 %v4419_v45, 0.0  ;;  %v4774_v50 = vld [vmem:[#allocation3 + $0x36] sm:$0xff]  ;;  %v4775_v51 = vld [vmem:[#allocation3 + $0x3e] sm:$0xff]  ;;  %v18568_v45 = vpop.permute.xlu0 %4592 }
 0x387   : > { %4704 = vst.msk [vmem:[#allocation3 + $0x58] sm:$0xff] %vm720_vm1, %v4668_v47  ;;  %v4454_v53 = vmax.f32 %v4418_v48, 0.0  ;;  %v15417_v55 = vpop.f32.mrb[12].mxu0  ;;  %15462 = vmatprep.mubr.msk.f32.mxu1 %vm720_vm1, %v4774_v50 }
 0x388   : > { %v4671_v58 = vmul.f32 %v18481_v28, %v4455_v49  ;;  %v4421_v61 = vadd.f32 %v15417_v55, %v18479_v33  ;;  %v4247_v62 = vpop.f32.mrb[13].mxu0  ;;  %15463 = vmatmul.mubr.msk.f32.gmra.mrb[6].mxu1 %vm720_vm1, %v4775_v51 }
 0x389   : > { %v4670_v63 = vmul.f32 %v18483_v60, %v4454_v53  ;;  %v4420_v36 = vadd.f32 %v18479_v33, %v4247_v62 }
 0x38a   : > { %4707 = vst.msk [vmem:[#allocation3 + $0x70] sm:$0xff] %vm720_vm1, %v4671_v58  ;;  %v4457_v37 = vmax.f32 %v4421_v61, 0.0  ;;  %v4776_v38 = vld [vmem:[#allocation3 + $0x46] sm:$0xff]  ;;  %v4777_v54 = vld [vmem:[#allocation3 + $0x4e] sm:$0xff] }
 0x38b   : > { %4706 = vst.msk [vmem:[#allocation3 + $0x68] sm:$0xff] %vm720_vm1, %v4670_v63  ;;  %v4456_v39 = vmax.f32 %v4420_v36, 0.0  ;;  %v15420_v40 = vpop.f32.mrb[14].mxu0  ;;  %15465 = vmatprep.mubr.msk.f32.mxu1 %vm720_vm1, %v4776_v38 }
 0x38c   : > { %v4673_v42 = vmul.f32 %v18489_v56, %v4457_v37  ;;  %v4423_v34 = vadd.f32 %v15420_v40, %v18479_v33  ;;  %v4257_v30 = vpop.f32.mrb[15].mxu0  ;;  %15466 = vmatmul.mubr.msk.f32.gmra.mrb[8].mxu1 %vm720_vm1, %v4777_v54  ;;  %v18581_v37 = vpop.permute.xlu1 %4607 }
 0x38d   : > { %v4672_v1 = vmul.f32 %v18493_v59, %v4456_v39  ;;  %v4422_v2 = vadd.f32 %v18479_v33, %v4257_v30  ;;  %v18585_v39 = vpop.permute.xlu0 %4602 }
 0x38e   : > { %4709 = vst.msk [vmem:[#allocation3 + $0x80] sm:$0xff] %vm720_vm1, %v4673_v42  ;;  %v4459_v4 = vmax.f32 %v4423_v34, 0.0  ;;  %v4778_v5 = vld [vmem:[#allocation3 + $0x56] sm:$0xff]  ;;  %v4779_v6 = vld [vmem:[#allocation3 + $0x5e] sm:$0xff] }
 0x38f   : > { %4708 = vst.msk [vmem:[#allocation3 + $0x78] sm:$0xff] %vm720_vm1, %v4672_v1  ;;  %v4458_v7 = vmax.f32 %v4422_v2, 0.0  ;;  %v15423_v8 = vpop.f32.mrb[16].mxu0  ;;  %15468 = vmatprep.mubr.msk.f32.mxu1 %vm720_vm1, %v4778_v5 }
 0x390   : > { %v4675_v9 = vmul.f32 %v18502_v41, %v4459_v4  ;;  %v4425_v10 = vadd.f32 %v15423_v8, %v18479_v33  ;;  %v4267_v11 = vpop.f32.mrb[17].mxu0  ;;  %15469 = vmatmul.mubr.msk.f32.gmra.mrb[10].mxu1 %vm720_vm1, %v4779_v6 }
 0x391   : > { %v4674_v13 = vmul.f32 %v18505_v35, %v4458_v7  ;;  %v4424_v14 = vadd.f32 %v18479_v33, %v4267_v11  ;;  %v18596_v11 = vpop.permute.xlu1 %4617 }
 0x392   : > { %4711 = vst.msk [vmem:[#allocation3 + $0x90] sm:$0xff] %vm720_vm1, %v4675_v9  ;;  %v4461_v16 = vmax.f32 %v4425_v10, 0.0  ;;  %v4780_v17 = vld [vmem:[#allocation3 + $0x66] sm:$0xff]  ;;  %v4781_v18 = vld [vmem:[#allocation3 + $0x6e] sm:$0xff] }
 0x393   : > { %4710 = vst.msk [vmem:[#allocation3 + $0x88] sm:$0xff] %vm720_vm1, %v4674_v13  ;;  %v4460_v20 = vmax.f32 %v4424_v14, 0.0  ;;  %v15426_v21 = vpop.f32.mrb[18].mxu0  ;;  %15471 = vmatprep.mubr.msk.f32.mxu1 %vm720_vm1, %v4780_v17 }
 0x394   : > { %v4677_v46 = vmul.f32 %v18517_v12, %v4461_v16  ;;  %v4427_v47 = vadd.f32 %v15426_v21, %v18479_v33  ;;  %v4277_v48 = vpop.f32.mrb[19].mxu0  ;;  %15472 = vmatmul.mubr.msk.f32.gmra.mrb[12].mxu1 %vm720_vm1, %v4781_v18  ;;  %v18600_v16 = vpop.permute.xlu0 %4612 }
 0x395   : > { %v4676_v49 = vmul.f32 %v18521_v15, %v4460_v20  ;;  %v4426_v50 = vadd.f32 %v18479_v33, %v4277_v48 }
 0x396   : > { %4713 = vst.msk [vmem:[#allocation3 + $0xa0] sm:$0xff] %vm720_vm1, %v4677_v46  ;;  %v4463_v51 = vmax.f32 %v4427_v47, 0.0  ;;  %v4782_v53 = vld [vmem:[#allocation3 + $0x76] sm:$0xff]  ;;  %v4783_v55 = vld [vmem:[#allocation3 + $0x7e] sm:$0xff] }
 0x397   : > { %4712 = vst.msk [vmem:[#allocation3 + $0x98] sm:$0xff] %vm720_vm1, %v4676_v49  ;;  %v4462_v58 = vmax.f32 %v4426_v50, 0.0  ;;  %v15429_v61 = vpop.f32.mrb[20].mxu0  ;;  %15474 = vmatprep.mubr.msk.f32.mxu1 %vm720_vm1, %v4782_v53 }
 0x398   : > { %v4679_v62 = vmul.f32 %v18532_v52, %v4463_v51  ;;  %v4429_v63 = vadd.f32 %v15429_v61, %v18479_v33  ;;  %v4287_v36 = vpop.f32.mrb[21].mxu0  ;;  %15475 = vmatmul.mubr.msk.f32.gmra.mrb[14].mxu1 %vm720_vm1, %v4783_v55  ;;  %v18613_v61 = vpop.permute.xlu1 %4627 }
 0x399   : > { %v4678_v38 = vmul.f32 %v18536_v57, %v4462_v58  ;;  %v4428_v54 = vadd.f32 %v18479_v33, %v4287_v36  ;;  %20325 = vst [vmem:[#allocation5_spill] sm:$0xff] %v18613_v61  ;;  %v18617_v36 = vpop.permute.xlu0 %4622 }
 0x39a   : > { %4715 = vst.msk [vmem:[#allocation3 + $0xb0] sm:$0xff] %vm720_vm1, %v4679_v62  ;;  %v4465_v40 = vmax.f32 %v4429_v63, 0.0  ;;  %v4784_v42 = vld [vmem:[#allocation3 + $0x86] sm:$0xff]  ;;  %v4785_v34 = vld [vmem:[#allocation3 + $0x8e] sm:$0xff]  ;;  %20326 = vst [vmem:[#allocation6_spill] sm:$0xff] %v18617_v36 }
 0x39b   : > { %4714 = vst.msk [vmem:[#allocation3 + $0xa8] sm:$0xff] %vm720_vm1, %v4678_v38  ;;  %v4464_v30 = vmax.f32 %v4428_v54, 0.0  ;;  %v15432_v1 = vpop.f32.mrb[22].mxu0  ;;  %15477 = vmatprep.mubr.msk.f32.mxu1 %vm720_vm1, %v4784_v42 }
 0x39c   : > { %v4681_v2 = vmul.f32 %v18549_v0, %v4465_v40  ;;  %v4431_v4 = vadd.f32 %v15432_v1, %v18479_v33  ;;  %v4297_v5 = vpop.f32.mrb[23].mxu0  ;;  %15478 = vmatmul.mubr.msk.f32.gmra.mrb[16].mxu1 %vm720_vm1, %v4785_v34 }
 0x39d   : > { %v4680_v6 = vmul.f32 %v18553_v3, %v4464_v30  ;;  %v4430_v7 = vadd.f32 %v18479_v33, %v4297_v5 }
 0x39e   : > { %4717 = vst.msk [vmem:[#allocation3 + $0xc0] sm:$0xff] %vm720_vm1, %v4681_v2  ;;  %v4467_v8 = vmax.f32 %v4431_v4, 0.0  ;;  %v4786_v9 = vld [vmem:[#allocation3 + $0x96] sm:$0xff]  ;;  %v4787_v10 = vld [vmem:[#allocation3 + $0x9e] sm:$0xff] }
 0x39f   : > { %4716 = vst.msk [vmem:[#allocation3 + $0xb8] sm:$0xff] %vm720_vm1, %v4680_v6  ;;  %v4466_v13 = vmax.f32 %v4430_v7, 0.0  ;;  %v15435_v14 = vpop.f32.mrb[24].mxu0  ;;  %15480 = vmatprep.mubr.msk.f32.mxu1 %vm720_vm1, %v4786_v9  ;;  %v18628_v9 = vpop.permute.xlu1 %4637 }
 0x3a0   : > { %v4683_v17 = vmul.f32 %v18564_v19, %v4467_v8  ;;  %v4433_v18 = vadd.f32 %v15435_v14, %v18479_v33  ;;  %v4307_v20 = vpop.f32.mrb[25].mxu0  ;;  %15481 = vmatmul.mubr.msk.f32.gmra.mrb[18].mxu1 %vm720_vm1, %v4787_v10  ;;  %20327 = vst [vmem:[#allocation7_spill] sm:$0xff] %v18628_v9  ;;  %v18632_v14 = vpop.permute.xlu0 %4632 }
 0x3a1   : > { %v4682_v21 = vmul.f32 %v18568_v45, %v4466_v13  ;;  %v4432_v46 = vadd.f32 %v18479_v33, %v4307_v20  ;;  %20328 = vst [vmem:[#allocation8_spill] sm:$0xff] %v18632_v14 }
 0x3a2   : > { %4719 = vst.msk [vmem:[#allocation3 + $0xd0] sm:$0xff] %vm720_vm1, %v4683_v17  ;;  %v4469_v47 = vmax.f32 %v4433_v18, 0.0  ;;  %v4788_v48 = vld [vmem:[#allocation3 + $0xa6] sm:$0xff]  ;;  %v4789_v49 = vld [vmem:[#allocation3 + $0xae] sm:$0xff] }
 0x3a3   : > { %4718 = vst.msk [vmem:[#allocation3 + $0xc8] sm:$0xff] %vm720_vm1, %v4682_v21  ;;  %v4468_v50 = vmax.f32 %v4432_v46, 0.0  ;;  %v15438_v51 = vpop.f32.mrb[26].mxu0  ;;  %15483 = vmatprep.mubr.msk.f32.mxu1 %vm720_vm1, %v4788_v48 }
 0x3a4   : > { %v4685_v53 = vmul.f32 %v18581_v37, %v4469_v47  ;;  %v4435_v55 = vadd.f32 %v15438_v51, %v18479_v33  ;;  %v4317_v58 = vpop.f32.mrb[27].mxu0  ;;  %15484 = vmatmul.mubr.msk.f32.gmra.mrb[20].mxu1 %vm720_vm1, %v4789_v49 }
 0x3a5   : > { %v4684_v62 = vmul.f32 %v18585_v39, %v4468_v50  ;;  %v4434_v63 = vadd.f32 %v18479_v33, %v4317_v58 }
 0x3a6   : > { %4721 = vst.msk [vmem:[#allocation3 + $0xe0] sm:$0xff] %vm720_vm1, %v4685_v53  ;;  %v4471_v38 = vmax.f32 %v4435_v55, 0.0  ;;  %v4790_v54 = vld [vmem:[#allocation3 + $0xb6] sm:$0xff]  ;;  %v4791_v40 = vld [vmem:[#allocation3 + $0xbe] sm:$0xff] }
 0x3a7   : > { %4720 = vst.msk [vmem:[#allocation3 + $0xd8] sm:$0xff] %vm720_vm1, %v4684_v62  ;;  %v4470_v42 = vmax.f32 %v4434_v63, 0.0  ;;  %v15441_v34 = vpop.f32.mrb[28].mxu0  ;;  %15486 = vmatprep.mubr.msk.f32.mxu1 %vm720_vm1, %v4790_v54  ;;  %v18645_v62 = vpop.permute.xlu1 %4647 }
 0x3a8   : > { %v4687_v30 = vmul.f32 %v18596_v11, %v4471_v38  ;;  %v4437_v1 = vadd.f32 %v15441_v34, %v18479_v33  ;;  %v4327_v2 = vpop.f32.mrb[29].mxu0  ;;  %15487 = vmatmul.mubr.msk.f32.gmra.mrb[22].mxu1 %vm720_vm1, %v4791_v40  ;;  %20329 = vst [vmem:[#allocation9_spill] sm:$0xff] %v18645_v62  ;;  %v18649_v54 = vpop.permute.xlu0 %4642 }
 0x3a9   : > { %v4686_v4 = vmul.f32 %v18600_v16, %v4470_v42  ;;  %v4436_v5 = vadd.f32 %v18479_v33, %v4327_v2  ;;  %20330 = vst [vmem:[#allocation10_spill] sm:$0xff] %v18649_v54 }
 0x3aa   : > { %4723 = vst.msk [vmem:[#allocation3 + $0xf0] sm:$0xff] %vm720_vm1, %v4687_v30  ;;  %v4473_v6 = vmax.f32 %v4437_v1, 0.0  ;;  %v4792_v7 = vld [vmem:[#allocation3 + $0xc6] sm:$0xff]  ;;  %v4793_v8 = vld [vmem:[#allocation3 + $0xce] sm:$0xff] }
 0x3ab   : > { %4722 = vst.msk [vmem:[#allocation3 + $0xe8] sm:$0xff] %vm720_vm1, %v4686_v4  ;;  %v4472_v10 = vmax.f32 %v4436_v5, 0.0  ;;  %v15444_v13 = vpop.f32.mrb[30].mxu0  ;;  %15489 = vmatprep.mubr.msk.f32.mxu1 %vm720_vm1, %v4792_v7 }
 0x3ac   : > { %v4689_v17 = vmul.f32 %v18613_v61, %v4473_v6  ;;  %v4439_v18 = vadd.f32 %v15444_v13, %v18479_v33  ;;  %v4337_v20 = vpop.f32.mrb[31].mxu0  ;;  %15490 = vmatmul.mubr.msk.f32.gmra.mrb[24].mxu1 %vm720_vm1, %v4793_v8  ;;  %v640_v61 = vld [vmem:[%s18445_s17 + $0x28] sm:$0xff] }
 0x3ad   : > { %v4688_v21 = vmul.f32 %v18617_v36, %v4472_v10  ;;  %v4438_v46 = vadd.f32 %v18479_v33, %v4337_v20  ;;  %v18664_v20 = vpop.permute.xlu0 %4652 }
 0x3ae   : > { %4725 = vst.msk [vmem:[#allocation3 + $0x100] sm:$0xff] %vm720_vm1, %v4689_v17  ;;  %v4475_v47 = vmax.f32 %v4439_v18, 0.0  ;;  %v4794_v48 = vld [vmem:[#allocation3 + $0xd6] sm:$0xff]  ;;  %v4795_v49 = vld [vmem:[#allocation3 + $0xde] sm:$0xff]  ;;  %v18660_v17 = vpop.permute.xlu1 %4657  ;;  %20332 = vst [vmem:[#allocation12_spill] sm:$0xff] %v18664_v20 }
 0x3af   : > { %4724 = vst.msk [vmem:[#allocation3 + $0xf8] sm:$0xff] %vm720_vm1, %v4688_v21  ;;  %v4474_v50 = vmax.f32 %v4438_v46, 0.0  ;;  %v15447_v51 = vpop.f32.mrb[32].mxu0  ;;  %15492 = vmatprep.mubr.msk.f32.mxu1 %vm720_vm1, %v4794_v48  ;;  %20331 = vst [vmem:[#allocation11_spill] sm:$0xff] %v18660_v17 }
 0x3b0   : > { %v4691_v53 = vmul.f32 %v18628_v9, %v4475_v47  ;;  %v4441_v55 = vadd.f32 %v15447_v51, %v18479_v33  ;;  %v4347_v58 = vpop.f32.mrb[33].mxu0  ;;  %15493 = vmatmul.mubr.msk.f32.gmra.mrb[26].mxu1 %vm720_vm1, %v4795_v49  ;;  %v4733_v51 = vld [vmem:[#allocation3 + $0xd] sm:$0xff] }
 0x3b1   : > { %v4690_v63 = vmul.f32 %v18632_v14, %v4474_v50  ;;  %v4440_v38 = vadd.f32 %v18479_v33, %v4347_v58  ;;  %v4732_v50 = vld [vmem:[#allocation3 + $0x5] sm:$0xff]  ;;  %v4735_v58 = vld [vmem:[#allocation3 + $0x1d] sm:$0xff] }
 0x3b2   : > { %4727 = vst.msk [vmem:[#allocation3 + $0x110] sm:$0xff] %vm720_vm1, %v4691_v53  ;;  %v4477_v40 = vmax.f32 %v4441_v55, 0.0  ;;  %v4796_v42 = vld [vmem:[#allocation3 + $0xe6] sm:$0xff]  ;;  %v4797_v34 = vld [vmem:[#allocation3 + $0xee] sm:$0xff] }
 0x3b3   : > { %4726 = vst.msk [vmem:[#allocation3 + $0x108] sm:$0xff] %vm720_vm1, %v4690_v63  ;;  %v4476_v30 = vmax.f32 %v4440_v38, 0.0  ;;  %v15450_v1 = vpop.f32.mrb[34].mxu0  ;;  %15495 = vmatprep.mubr.msk.f32.mxu1 %vm720_vm1, %v4796_v42  ;;  %v18677_v53 = vld [vmem:[%s18445_s17 + $0x18] sm:$0xff]  ;;  %v4734_v55 = vld [vmem:[#allocation3 + $0x15] sm:$0xff]  ;;  %v4739_v42 = vld [vmem:[#allocation3 + $0x3d] sm:$0xff] }
 0x3b4   : > { %v4693_v2 = vmul.f32 %v18645_v62, %v4477_v40  ;;  %v4443_v4 = vadd.f32 %v15450_v1, %v18479_v33  ;;  %v4357_v5 = vpop.f32.mrb[35].mxu0  ;;  %15496 = vmatmul.mubr.msk.f32.gmra.mrb[28].mxu1 %vm720_vm1, %v4797_v34  ;;  %v4736_v63 = vld [vmem:[#allocation3 + $0x25] sm:$0xff]  ;;  %v4737_v38 = vld [vmem:[#allocation3 + $0x2d] sm:$0xff]  ;;  %v4738_v40 = vld [vmem:[#allocation3 + $0x35] sm:$0xff] }
 0x3b5   : > { %v4692_v6 = vmul.f32 %v18649_v54, %v4476_v30  ;;  %v4442_v7 = vadd.f32 %v18479_v33, %v4357_v5  ;;  %v4740_v34 = vld [vmem:[#allocation3 + $0x45] sm:$0xff]  ;;  %v4742_v30 = vld [vmem:[#allocation3 + $0x55] sm:$0xff]  ;;  %v4743_v1 = vld [vmem:[#allocation3 + $0x5d] sm:$0xff] }
 0x3b6   : > { %4729 = vst.msk [vmem:[#allocation3 + $0x120] sm:$0xff] %vm720_vm1, %v4693_v2  ;;  %v4479_v8 = vmax.f32 %v4443_v4, 0.0  ;;  %v4798_v10 = vld [vmem:[#allocation3 + $0xf6] sm:$0xff]  ;;  %v4799_v13 = vld [vmem:[#allocation3 + $0xfe] sm:$0xff]  ;;  %v4745_v4 = vld [vmem:[#allocation3 + $0x6d] sm:$0xff] }
 0x3b7   : > { %4728 = vst.msk [vmem:[#allocation3 + $0x118] sm:$0xff] %vm720_vm1, %v4692_v6  ;;  %v4478_v18 = vmax.f32 %v4442_v7, 0.0  ;;  %15498 = vmatprep.mubr.msk.f32.mxu1 %vm720_vm1, %v4798_v10  ;;  %v4744_v2 = vld [vmem:[#allocation3 + $0x65] sm:$0xff]  ;;  %v4746_v5 = vld [vmem:[#allocation3 + $0x75] sm:$0xff]  ;;  %v4747_v6 = vld [vmem:[#allocation3 + $0x7d] sm:$0xff] }
 0x3b8   : > { %v4695_v21 = vmul.f32 %v18660_v17, %v4479_v8  ;;  %15499 = vmatmul.mubr.msk.f32.gmra.mrb[30].mxu1 %vm720_vm1, %v4799_v13  ;;  %v4748_v7 = vld [vmem:[#allocation3 + $0x85] sm:$0xff]  ;;  %v4749_v8 = vld [vmem:[#allocation3 + $0x8d] sm:$0xff]  ;;  %v4750_v10 = vld [vmem:[#allocation3 + $0x95] sm:$0xff] }
 0x3b9   : > { %v4694_v33 = vmul.f32 %v18664_v20, %v4478_v18  ;;  %v4751_v13 = vld [vmem:[#allocation3 + $0x9d] sm:$0xff]  ;;  %v4752_v18 = vld [vmem:[#allocation3 + $0xa5] sm:$0xff]  ;;  %v5539_v20 = vld [vmem:[#allocation3 + $0xef] sm:$0xff] }
 0x3ba   : > { %4731 = vst.msk [vmem:[#allocation3 + $0x130] sm:$0xff] %vm720_vm1, %v4695_v21  ;;  %v4800_v46 = vld [vmem:[#allocation3 + $0x106] sm:$0xff]  ;;  %v4801_v47 = vld [vmem:[#allocation3 + $0x10e] sm:$0xff]  ;;  %v5540_v17 = vld [vmem:[#allocation3 + $0xf7] sm:$0xff] }
 0x3bb   : > { %4730 = vst.msk [vmem:[#allocation3 + $0x128] sm:$0xff] %vm720_vm1, %v4694_v33  ;;  %15501 = vmatprep.mubr.msk.f32.mxu1 %vm720_vm1, %v4800_v46  ;;  %v4753_v21 = vld [vmem:[#allocation3 + $0xad] sm:$0xff]  ;;  %v4754_v33 = vld [vmem:[#allocation3 + $0xb5] sm:$0xff]  ;;  %v4755_v46 = vld [vmem:[#allocation3 + $0xbd] sm:$0xff] }
 0x3bc   : > { %15502 = vmatmul.mubr.msk.f32.gmra.mrb[32].mxu1 %vm720_vm1, %v4801_v47  ;;  %v4756_v47 = vld [vmem:[#allocation3 + $0xc5] sm:$0xff]  ;;  %v5543_v14 = vld [vmem:[#allocation3 + $0x10f] sm:$0xff] }
 0x3bd   : > { %v5541_v54 = vld [vmem:[#allocation3 + $0xff] sm:$0xff]  ;;  %v5542_v62 = vld [vmem:[#allocation3 + $0x107] sm:$0xff] }
 0x3be   : > { %v4802_v48 = vld [vmem:[#allocation3 + $0x116] sm:$0xff]  ;;  %v4803_v49 = vld [vmem:[#allocation3 + $0x11e] sm:$0xff] }
 0x3bf   : > { %15504 = vmatprep.mubr.msk.f32.mxu1 %vm720_vm1, %v4802_v48  ;;  %v4757_v48 = vld [vmem:[#allocation3 + $0xcd] sm:$0xff]  ;;  %v5544_v9 = vld [vmem:[#allocation3 + $0x117] sm:$0xff]  ;;  %v5545_v36 = vld [vmem:[#allocation3 + $0x11f] sm:$0xff] }
 0x3c0   : > { %15505 = vmatmul.mubr.msk.f32.gmra.mrb[34].mxu1 %vm720_vm1, %v4803_v49  ;;  %v4758_v49 = vld [vmem:[#allocation3 + $0xd5] sm:$0xff] }
 0x3c1   : > { %15509 = vmatprep.mubr.msk.f32.mxu1 %vm720_vm1, %v4732_v50  ;;  %v4759_v50 = vld [vmem:[#allocation3 + $0xdd] sm:$0xff] }
 0x3c4   : > { %15510 = vmatmul.mubr.msk.f32.vlgmr.msra.gmra.mrb[0].mxu1 %vm720_vm1, %v4733_v51  ;;  %v4760_v51 = vld [vmem:[#allocation3 + $0xe5] sm:$0xff] }
 0x3c5   : > { %15512 = vmatprep.mubr.msk.f32.mxu1 %vm720_vm1, %v4734_v55  ;;  %15564 = vmatpush3.msra.mxu1 %v18452_v22  ;;  %v4741_v22 = vld [vmem:[#allocation3 + $0x4d] sm:$0xff] }
 0x3c6   : > { %15619 = vmatprep.subr.mxu1 %v18677_v53  ;;  %v4761_v55 = vld [vmem:[#allocation3 + $0xed] sm:$0xff] }
 0x3c8   : > { %15513 = vmatmul.mubr.msk.f32.gmra.mrb[2].mxu1 %vm720_vm1, %v4735_v58  ;;  %v4762_v58 = vld [vmem:[#allocation3 + $0xf5] sm:$0xff] }
 0x3c9   : > { %15515 = vmatprep.mubr.msk.f32.mxu1 %vm720_vm1, %v4736_v63  ;;  %v4763_v63 = vld [vmem:[#allocation3 + $0xfd] sm:$0xff] }
 0x3cc   : > { %15516 = vmatmul.mubr.msk.f32.gmra.mrb[4].mxu1 %vm720_vm1, %v4737_v38  ;;  %v4764_v38 = vld [vmem:[#allocation3 + $0x105] sm:$0xff] }
 0x3cd   : > { %15518 = vmatprep.mubr.msk.f32.mxu1 %vm720_vm1, %v4738_v40  ;;  %v4765_v40 = vld [vmem:[#allocation3 + $0x10d] sm:$0xff] }
 0x3d0   : > { %15519 = vmatmul.mubr.msk.f32.gmra.mrb[6].mxu1 %vm720_vm1, %v4739_v42  ;;  %v4766_v42 = vld [vmem:[#allocation3 + $0x115] sm:$0xff] }
 0x3d1   : > { %15521 = vmatprep.mubr.msk.f32.mxu1 %vm720_vm1, %v4740_v34  ;;  %v5510_v34 = vld [vmem:[#allocation3 + $0x7] sm:$0xff] }
 0x3d4   : > { %15522 = vmatmul.mubr.msk.f32.gmra.mrb[8].mxu1 %vm720_vm1, %v4741_v22  ;;  %v4767_v22 = vld [vmem:[#allocation3 + $0x11d] sm:$0xff] }
 0x3d5   : > { %15524 = vmatprep.mubr.msk.f32.mxu1 %vm720_vm1, %v4742_v30  ;;  %v5511_v30 = vld [vmem:[#allocation3 + $0xf] sm:$0xff] }
 0x3d8   : > { %15525 = vmatmul.mubr.msk.f32.gmra.mrb[10].mxu1 %vm720_vm1, %v4743_v1  ;;  %v18718_v1 = vld [vmem:[%s18445_s17 + $0x20] sm:$0xff] }
 0x3d9   : > { %15527 = vmatprep.mubr.msk.f32.mxu1 %vm720_vm1, %v4744_v2  ;;  %v18721_v2 = vld [vmem:[#allocation3 + $0x17] sm:$0xff] }
 0x3dc   : > { %15528 = vmatmul.mubr.msk.f32.gmra.mrb[12].mxu1 %vm720_vm1, %v4745_v4  ;;  %v18727_v4 = vld [vmem:[#allocation3 + $0x1f] sm:$0xff] }
 0x3dd   : > { %15530 = vmatprep.mubr.msk.f32.mxu1 %vm720_vm1, %v4746_v5  ;;  %v18731_v5 = vld [vmem:[#allocation3 + $0x27] sm:$0xff] }
 0x3e0   : > { %15531 = vmatmul.mubr.msk.f32.gmra.mrb[14].mxu1 %vm720_vm1, %v4747_v6  ;;  %v18735_v6 = vld [vmem:[#allocation3 + $0x2f] sm:$0xff] }
 0x3e1   : > { %15533 = vmatprep.mubr.msk.f32.mxu1 %vm720_vm1, %v4748_v7  ;;  %v18739_v7 = vld [vmem:[#allocation3 + $0x37] sm:$0xff] }
 0x3e4   : > { %15534 = vmatmul.mubr.msk.f32.gmra.mrb[16].mxu1 %vm720_vm1, %v4749_v8  ;;  %v18747_v8 = vld [vmem:[#allocation3 + $0x47] sm:$0xff] }
 0x3e5   : > { %15536 = vmatprep.mubr.msk.f32.mxu1 %vm720_vm1, %v4750_v10  ;;  %v18751_v10 = vld [vmem:[#allocation3 + $0x4f] sm:$0xff] }
 0x3e8   : > { %15537 = vmatmul.mubr.msk.f32.gmra.mrb[18].mxu1 %vm720_vm1, %v4751_v13  ;;  %v18755_v13 = vld [vmem:[#allocation3 + $0x57] sm:$0xff] }
 0x3e9   : > { %15539 = vmatprep.mubr.msk.f32.mxu1 %vm720_vm1, %v4752_v18  ;;  %v5521_v18 = vld [vmem:[#allocation3 + $0x5f] sm:$0xff] }
 0x3ec   : > { %15540 = vmatmul.mubr.msk.f32.gmra.mrb[20].mxu1 %vm720_vm1, %v4753_v21  ;;  %v5522_v21 = vld [vmem:[#allocation3 + $0x67] sm:$0xff] }
 0x3ed   : > { %15542 = vmatprep.mubr.msk.f32.mxu1 %vm720_vm1, %v4754_v33  ;;  %v5523_v33 = vld [vmem:[#allocation3 + $0x6f] sm:$0xff] }
 0x3f0   : > { %15543 = vmatmul.mubr.msk.f32.gmra.mrb[22].mxu1 %vm720_vm1, %v4755_v46  ;;  %v5524_v46 = vld [vmem:[#allocation3 + $0x77] sm:$0xff] }
 0x3f1   : > { %15545 = vmatprep.mubr.msk.f32.mxu1 %vm720_vm1, %v4756_v47  ;;  %v5525_v47 = vld [vmem:[#allocation3 + $0x7f] sm:$0xff] }
 0x3f4   : > { %15546 = vmatmul.mubr.msk.f32.gmra.mrb[24].mxu1 %vm720_vm1, %v4757_v48  ;;  %v5526_v48 = vld [vmem:[#allocation3 + $0x87] sm:$0xff] }
 0x3f5   : > { %15548 = vmatprep.mubr.msk.f32.mxu1 %vm720_vm1, %v4758_v49  ;;  %v5527_v49 = vld [vmem:[#allocation3 + $0x8f] sm:$0xff] }
 0x3f8   : > { %15549 = vmatmul.mubr.msk.f32.gmra.mrb[26].mxu1 %vm720_vm1, %v4759_v50  ;;  %v5528_v50 = vld [vmem:[#allocation3 + $0x97] sm:$0xff] }
 0x3f9   : > { %15551 = vmatprep.mubr.msk.f32.mxu1 %vm720_vm1, %v4760_v51  ;;  %v5529_v51 = vld [vmem:[#allocation3 + $0x9f] sm:$0xff] }
 0x3fc   : > { %15552 = vmatmul.mubr.msk.f32.gmra.mrb[28].mxu1 %vm720_vm1, %v4761_v55  ;;  %v5530_v55 = vld [vmem:[#allocation3 + $0xa7] sm:$0xff] }
 0x3fd   : > { %15554 = vmatprep.mubr.msk.f32.mxu1 %vm720_vm1, %v4762_v58  ;;  %v5531_v58 = vld [vmem:[#allocation3 + $0xaf] sm:$0xff] }
 0x400   : > { %15555 = vmatmul.mubr.msk.f32.gmra.mrb[30].mxu1 %vm720_vm1, %v4763_v63  ;;  %v5532_v63 = vld [vmem:[#allocation3 + $0xb7] sm:$0xff] }
 0x401   : > { %15557 = vmatprep.mubr.msk.f32.mxu1 %vm720_vm1, %v4764_v38  ;;  %v5533_v38 = vld [vmem:[#allocation3 + $0xbf] sm:$0xff] }
 0x404   : > { %15558 = vmatmul.mubr.msk.f32.gmra.mrb[32].mxu1 %vm720_vm1, %v4765_v40  ;;  %v5534_v40 = vld [vmem:[#allocation3 + $0xc7] sm:$0xff] }
 0x405   : > { %15560 = vmatprep.mubr.msk.f32.mxu1 %vm720_vm1, %v4766_v42  ;;  %v5535_v42 = vld [vmem:[#allocation3 + $0xcf] sm:$0xff] }
 0x408   : > { %15561 = vmatmul.mubr.msk.f32.gmra.mrb[34].mxu1 %vm720_vm1, %v4767_v22  ;;  %v5537_v22 = vld [vmem:[#allocation3 + $0xdf] sm:$0xff] }
 0x409   : > { %15565 = vmatprep.mubr.msk.f32.mxu1 %vm720_vm1, %v5510_v34  ;;  %v5536_v34 = vld [vmem:[#allocation3 + $0xd7] sm:$0xff] }
 0x40c   : > { %15566 = vmatmul.mubr.msk.f32.vlgmr.msra.gmra.mrb[0].mxu1 %vm720_vm1, %v5511_v30  ;;  %v5538_v30 = vld [vmem:[#allocation3 + $0xe7] sm:$0xff] }
 0x40d   : > { %15568 = vmatprep.mubr.msk.f32.mxu1 %vm720_vm1, %v18721_v2  ;;  %15620 = vmatpush3.msra.mxu1 %v18677_v53  ;;  %v18743_v53 = vld [vmem:[#allocation3 + $0x3f] sm:$0xff] }
 0x40e   : > { %15675 = vmatprep.subr.mxu1 %v18718_v1 }
 0x410   : > { %15569 = vmatmul.mubr.msk.f32.gmra.mrb[2].mxu1 %vm720_vm1, %v18727_v4 }
 0x411   : > { %15571 = vmatprep.mubr.msk.f32.mxu1 %vm720_vm1, %v18731_v5 }
 0x414   : > { %15572 = vmatmul.mubr.msk.f32.gmra.mrb[4].mxu1 %vm720_vm1, %v18735_v6 }
 0x415   : > { %15574 = vmatprep.mubr.msk.f32.mxu1 %vm720_vm1, %v18739_v7 }
 0x418   : > { %15575 = vmatmul.mubr.msk.f32.gmra.mrb[6].mxu1 %vm720_vm1, %v18743_v53 }
 0x419   : > { %15577 = vmatprep.mubr.msk.f32.mxu1 %vm720_vm1, %v18747_v8 }
 0x41c   : > { %15578 = vmatmul.mubr.msk.f32.gmra.mrb[8].mxu1 %vm720_vm1, %v18751_v10 }
 0x41d   : > { %15580 = vmatprep.mubr.msk.f32.mxu1 %vm720_vm1, %v18755_v13 }
 0x420   : > { %15581 = vmatmul.mubr.msk.f32.gmra.mrb[10].mxu1 %vm720_vm1, %v5521_v18 }
 0x421   : > { %15583 = vmatprep.mubr.msk.f32.mxu1 %vm720_vm1, %v5522_v21 }
 0x424   : > { %15584 = vmatmul.mubr.msk.f32.gmra.mrb[12].mxu1 %vm720_vm1, %v5523_v33 }
 0x425   : > { %15586 = vmatprep.mubr.msk.f32.mxu1 %vm720_vm1, %v5524_v46 }
 0x428   : > { %15587 = vmatmul.mubr.msk.f32.gmra.mrb[14].mxu1 %vm720_vm1, %v5525_v47 }
 0x429   : > { %15589 = vmatprep.mubr.msk.f32.mxu1 %vm720_vm1, %v5526_v48 }
 0x42c   : > { %15590 = vmatmul.mubr.msk.f32.gmra.mrb[16].mxu1 %vm720_vm1, %v5527_v49 }
 0x42d   : > { %15592 = vmatprep.mubr.msk.f32.mxu1 %vm720_vm1, %v5528_v50 }
 0x430   : > { %15593 = vmatmul.mubr.msk.f32.gmra.mrb[18].mxu1 %vm720_vm1, %v5529_v51 }
 0x431   : > { %15595 = vmatprep.mubr.msk.f32.mxu1 %vm720_vm1, %v5530_v55 }
 0x434   : > { %15596 = vmatmul.mubr.msk.f32.gmra.mrb[20].mxu1 %vm720_vm1, %v5531_v58 }
 0x435   : > { %15598 = vmatprep.mubr.msk.f32.mxu1 %vm720_vm1, %v5532_v63 }
 0x438   : > { %15599 = vmatmul.mubr.msk.f32.gmra.mrb[22].mxu1 %vm720_vm1, %v5533_v38 }
 0x439   : > { %15601 = vmatprep.mubr.msk.f32.mxu1 %vm720_vm1, %v5534_v40 }
 0x43c   : > { %15602 = vmatmul.mubr.msk.f32.gmra.mrb[24].mxu1 %vm720_vm1, %v5535_v42 }
 0x43d   : > { %15604 = vmatprep.mubr.msk.f32.mxu1 %vm720_vm1, %v5536_v34 }
 0x440   : > { %15605 = vmatmul.mubr.msk.f32.gmra.mrb[26].mxu1 %vm720_vm1, %v5537_v22 }
 0x441   : > { %15607 = vmatprep.mubr.msk.f32.mxu1 %vm720_vm1, %v5538_v30 }
 0x444   : > { %15608 = vmatmul.mubr.msk.f32.gmra.mrb[28].mxu1 %vm720_vm1, %v5539_v20 }
 0x445   : > { %15610 = vmatprep.mubr.msk.f32.mxu1 %vm720_vm1, %v5540_v17 }
 0x448   : > { %15611 = vmatmul.mubr.msk.f32.gmra.mrb[30].mxu1 %vm720_vm1, %v5541_v54 }
 0x449   : > { %15613 = vmatprep.mubr.msk.f32.mxu1 %vm720_vm1, %v5542_v62 }
 0x44c   : > { %15614 = vmatmul.mubr.msk.f32.gmra.mrb[32].mxu1 %vm720_vm1, %v5543_v14 }
 0x44d   : > { %15616 = vmatprep.mubr.msk.f32.mxu1 %vm720_vm1, %v5544_v9 }
 0x450   : > { %15617 = vmatmul.mubr.msk.f32.gmra.mrb[34].mxu1 %vm720_vm1, %v5545_v36 }
 0x451   : > { %15621 = vmatprep.mubr.msk.f32.mxu1 %vm720_vm1, %v18721_v2  ;;  %v5970_v2 = vld [vmem:[#allocation3 + $0x12f] sm:$0xff] }
 0x454   : > { %15622 = vmatmul.mubr.msk.f32.vlgmr.msra.gmra.mrb[0].mxu1 %vm720_vm1, %v18727_v4  ;;  %v6360_v4 = vld [vmem:[#allocation3 + $0x18] sm:$0xff] }
 0x455   : > { %15624 = vmatprep.mubr.msk.f32.mxu1 %vm720_vm1, %v18731_v5  ;;  %15676 = vmatpush3.msra.mxu1 %v18718_v1  ;;  %v5969_v1 = vld [vmem:[#allocation3 + $0x127] sm:$0xff]  ;;  %v6367_v5 = vld [vmem:[#allocation3 + $0x50] sm:$0xff] }
 0x456   : > { %15731 = vmatprep.subr.mxu1 %v640_v61 }
 0x458   : > { %15625 = vmatmul.mubr.msk.f32.gmra.mrb[2].mxu1 %vm720_vm1, %v18735_v6  ;;  %v6368_v6 = vld [vmem:[#allocation3 + $0x58] sm:$0xff] }
 0x459   : > { %15627 = vmatprep.mubr.msk.f32.mxu1 %vm720_vm1, %v18739_v7  ;;  %v6370_v7 = vld [vmem:[#allocation3 + $0x68] sm:$0xff] }
 0x45c   : > { %15628 = vmatmul.mubr.msk.f32.gmra.mrb[4].mxu1 %vm720_vm1, %v18743_v53  ;;  %v6371_v53 = vld [vmem:[#allocation3 + $0x70] sm:$0xff] }
 0x45d   : > { %15630 = vmatprep.mubr.msk.f32.mxu1 %vm720_vm1, %v18747_v8  ;;  %v6372_v8 = vld [vmem:[#allocation3 + $0x78] sm:$0xff] }
 0x460   : > { %15631 = vmatmul.mubr.msk.f32.gmra.mrb[6].mxu1 %vm720_vm1, %v18751_v10  ;;  %v6373_v10 = vld [vmem:[#allocation3 + $0x80] sm:$0xff] }
 0x461   : > { %15633 = vmatprep.mubr.msk.f32.mxu1 %vm720_vm1, %v18755_v13  ;;  %v6374_v13 = vld [vmem:[#allocation3 + $0x88] sm:$0xff] }
 0x464   : > { %15634 = vmatmul.mubr.msk.f32.gmra.mrb[8].mxu1 %vm720_vm1, %v5521_v18  ;;  %v6375_v18 = vld [vmem:[#allocation3 + $0x90] sm:$0xff] }
 0x465   : > { %15636 = vmatprep.mubr.msk.f32.mxu1 %vm720_vm1, %v5522_v21  ;;  %v6376_v21 = vld [vmem:[#allocation3 + $0x98] sm:$0xff] }
 0x468   : > { %15637 = vmatmul.mubr.msk.f32.gmra.mrb[10].mxu1 %vm720_vm1, %v5523_v33  ;;  %v6377_v33 = vld [vmem:[#allocation3 + $0xa0] sm:$0xff] }
 0x469   : > { %15639 = vmatprep.mubr.msk.f32.mxu1 %vm720_vm1, %v5524_v46  ;;  %v6378_v46 = vld [vmem:[#allocation3 + $0xa8] sm:$0xff] }
 0x46c   : > { %15640 = vmatmul.mubr.msk.f32.gmra.mrb[12].mxu1 %vm720_vm1, %v5525_v47  ;;  %v6379_v47 = vld [vmem:[#allocation3 + $0xb0] sm:$0xff] }
 0x46d   : > { %15642 = vmatprep.mubr.msk.f32.mxu1 %vm720_vm1, %v5526_v48  ;;  %v6380_v48 = vld [vmem:[#allocation3 + $0xb8] sm:$0xff] }
 0x470   : > { %15643 = vmatmul.mubr.msk.f32.gmra.mrb[14].mxu1 %vm720_vm1, %v5527_v49  ;;  %v6381_v49 = vld [vmem:[#allocation3 + $0xc0] sm:$0xff] }
 0x471   : > { %15645 = vmatprep.mubr.msk.f32.mxu1 %vm720_vm1, %v5528_v50  ;;  %v6382_v50 = vld [vmem:[#allocation3 + $0xc8] sm:$0xff] }
 0x474   : > { %15646 = vmatmul.mubr.msk.f32.gmra.mrb[16].mxu1 %vm720_vm1, %v5529_v51  ;;  %v6383_v51 = vld [vmem:[#allocation3 + $0xd0] sm:$0xff] }
 0x475   : > { %15648 = vmatprep.mubr.msk.f32.mxu1 %vm720_vm1, %v5530_v55  ;;  %v6384_v55 = vld [vmem:[#allocation3 + $0xd8] sm:$0xff] }
 0x478   : > { %15649 = vmatmul.mubr.msk.f32.gmra.mrb[18].mxu1 %vm720_vm1, %v5531_v58  ;;  %v6385_v58 = vld [vmem:[#allocation3 + $0xe0] sm:$0xff] }
 0x479   : > { %15651 = vmatprep.mubr.msk.f32.mxu1 %vm720_vm1, %v5532_v63  ;;  %v6386_v63 = vld [vmem:[#allocation3 + $0xe8] sm:$0xff] }
 0x47c   : > { %15652 = vmatmul.mubr.msk.f32.gmra.mrb[20].mxu1 %vm720_vm1, %v5533_v38  ;;  %v6387_v38 = vld [vmem:[#allocation3 + $0xf0] sm:$0xff] }
 0x47d   : > { %15654 = vmatprep.mubr.msk.f32.mxu1 %vm720_vm1, %v5534_v40  ;;  %v6388_v40 = vld [vmem:[#allocation3 + $0xf8] sm:$0xff] }
 0x480   : > { %15655 = vmatmul.mubr.msk.f32.gmra.mrb[22].mxu1 %vm720_vm1, %v5535_v42  ;;  %v6389_v42 = vld [vmem:[#allocation3 + $0x100] sm:$0xff] }
 0x481   : > { %15657 = vmatprep.mubr.msk.f32.mxu1 %vm720_vm1, %v5536_v34  ;;  %v6390_v34 = vld [vmem:[#allocation3 + $0x108] sm:$0xff] }
 0x484   : > { %15658 = vmatmul.mubr.msk.f32.gmra.mrb[24].mxu1 %vm720_vm1, %v5537_v22  ;;  %v6391_v22 = vld [vmem:[#allocation3 + $0x110] sm:$0xff] }
 0x485   : > { %15660 = vmatprep.mubr.msk.f32.mxu1 %vm720_vm1, %v5538_v30  ;;  %v6392_v30 = vld [vmem:[#allocation3 + $0x118] sm:$0xff] }
 0x488   : > { %15661 = vmatmul.mubr.msk.f32.gmra.mrb[26].mxu1 %vm720_vm1, %v5539_v20  ;;  %v18833_v20 = vld [vmem:[%s18445_s17 + $0x30] sm:$0xff] }
 0x489   : > { %15663 = vmatprep.mubr.msk.f32.mxu1 %vm720_vm1, %v5540_v17  ;;  %v6361_v17 = vld [vmem:[#allocation3 + $0x20] sm:$0xff] }
 0x48c   : > { %15664 = vmatmul.mubr.msk.f32.gmra.mrb[28].mxu1 %vm720_vm1, %v5541_v54  ;;  %v6366_v54 = vld [vmem:[#allocation3 + $0x48] sm:$0xff] }
 0x48d   : > { %15666 = vmatprep.mubr.msk.f32.mxu1 %vm720_vm1, %v5542_v62  ;;  %v6362_v62 = vld [vmem:[#allocation3 + $0x28] sm:$0xff] }
 0x490   : > { %15667 = vmatmul.mubr.msk.f32.gmra.mrb[30].mxu1 %vm720_vm1, %v5543_v14  ;;  %v6365_v14 = vld [vmem:[#allocation3 + $0x40] sm:$0xff] }
 0x491   : > { %15669 = vmatprep.mubr.msk.f32.mxu1 %vm720_vm1, %v5544_v9  ;;  %v6364_v9 = vld [vmem:[#allocation3 + $0x38] sm:$0xff] }
 0x494   : > { %15670 = vmatmul.mubr.msk.f32.gmra.mrb[32].mxu1 %vm720_vm1, %v5545_v36  ;;  %v6363_v36 = vld [vmem:[#allocation3 + $0x30] sm:$0xff] }
 0x495   : > { %15672 = vmatprep.mubr.msk.f32.mxu1 %vm720_vm1, %v5969_v1  ;;  %v6393_v1 = vld [vmem:[#allocation3 + $0x120] sm:$0xff] }
 0x498   : > { %15673 = vmatmul.mubr.msk.f32.gmra.mrb[34].mxu1 %vm720_vm1, %v5970_v2  ;;  %v6394_v2 = vld [vmem:[#allocation3 + $0x128] sm:$0xff] }
 0x499   : > { %15677 = vmatprep.mubr.msk.f32.mxu1 %vm720_vm1, %v6360_v4  ;;  %v6395_v4 = vld [vmem:[#allocation3 + $0x130] sm:$0xff] }
 0x49c   : > { %15678 = vmatmul.mubr.msk.f32.vlgmr.msra.gmra.mrb[0].mxu1 %vm720_vm1, %v6361_v17  ;;  %v6785_v17 = vld [vmem:[#allocation3 + $0x19] sm:$0xff] }
 0x49d   : > { %15680 = vmatprep.mubr.msk.f32.mxu1 %vm720_vm1, %v6362_v62  ;;  %15732 = vmatpush3.msra.mxu1 %v640_v61  ;;  %v6369_v61 = vld [vmem:[#allocation3 + $0x60] sm:$0xff] }
 0x49e   : > { %15787 = vmatprep.subr.mxu1 %v18833_v20  ;;  %v6786_v62 = vld [vmem:[#allocation3 + $0x21] sm:$0xff] }
 0x4a0   : > { %15681 = vmatmul.mubr.msk.f32.gmra.mrb[2].mxu1 %vm720_vm1, %v6363_v36  ;;  %v18873_v36 = vld [vmem:[%s18445_s17 + $0x38] sm:$0xff] }
 0x4a1   : > { %15683 = vmatprep.mubr.msk.f32.mxu1 %vm720_vm1, %v6364_v9  ;;  %v18876_v9 = vld [vmem:[#allocation3 + $0x29] sm:$0xff] }
 0x4a4   : > { %15684 = vmatmul.mubr.msk.f32.gmra.mrb[4].mxu1 %vm720_vm1, %v6365_v14  ;;  %v18882_v14 = vld [vmem:[#allocation3 + $0x31] sm:$0xff] }
 0x4a5   : > { %15686 = vmatprep.mubr.msk.f32.mxu1 %vm720_vm1, %v6366_v54  ;;  %v18886_v54 = vld [vmem:[#allocation3 + $0x39] sm:$0xff] }
 0x4a8   : > { %15687 = vmatmul.mubr.msk.f32.gmra.mrb[6].mxu1 %vm720_vm1, %v6367_v5  ;;  %v18890_v5 = vld [vmem:[#allocation3 + $0x41] sm:$0xff] }
 0x4a9   : > { %15689 = vmatprep.mubr.msk.f32.mxu1 %vm720_vm1, %v6368_v6  ;;  %v18894_v6 = vld [vmem:[#allocation3 + $0x49] sm:$0xff] }
 0x4ac   : > { %15690 = vmatmul.mubr.msk.f32.gmra.mrb[8].mxu1 %vm720_vm1, %v6369_v61  ;;  %v18902_v61 = vld [vmem:[#allocation3 + $0x59] sm:$0xff] }
 0x4ad   : > { %15692 = vmatprep.mubr.msk.f32.mxu1 %vm720_vm1, %v6370_v7  ;;  %v18906_v7 = vld [vmem:[#allocation3 + $0x61] sm:$0xff] }
 0x4b0   : > { %15693 = vmatmul.mubr.msk.f32.gmra.mrb[10].mxu1 %vm720_vm1, %v6371_v53  ;;  %v18910_v53 = vld [vmem:[#allocation3 + $0x69] sm:$0xff] }
 0x4b1   : > { %15695 = vmatprep.mubr.msk.f32.mxu1 %vm720_vm1, %v6372_v8  ;;  %v6796_v8 = vld [vmem:[#allocation3 + $0x71] sm:$0xff] }
 0x4b4   : > { %15696 = vmatmul.mubr.msk.f32.gmra.mrb[12].mxu1 %vm720_vm1, %v6373_v10  ;;  %v6797_v10 = vld [vmem:[#allocation3 + $0x79] sm:$0xff] }
 0x4b5   : > { %15698 = vmatprep.mubr.msk.f32.mxu1 %vm720_vm1, %v6374_v13  ;;  %v6798_v13 = vld [vmem:[#allocation3 + $0x81] sm:$0xff] }
 0x4b8   : > { %15699 = vmatmul.mubr.msk.f32.gmra.mrb[14].mxu1 %vm720_vm1, %v6375_v18  ;;  %v6799_v18 = vld [vmem:[#allocation3 + $0x89] sm:$0xff] }
 0x4b9   : > { %15701 = vmatprep.mubr.msk.f32.mxu1 %vm720_vm1, %v6376_v21  ;;  %v6800_v21 = vld [vmem:[#allocation3 + $0x91] sm:$0xff] }
 0x4bc   : > { %15702 = vmatmul.mubr.msk.f32.gmra.mrb[16].mxu1 %vm720_vm1, %v6377_v33  ;;  %v6801_v33 = vld [vmem:[#allocation3 + $0x99] sm:$0xff] }
 0x4bd   : > { %15704 = vmatprep.mubr.msk.f32.mxu1 %vm720_vm1, %v6378_v46  ;;  %v6802_v46 = vld [vmem:[#allocation3 + $0xa1] sm:$0xff] }
 0x4c0   : > { %15705 = vmatmul.mubr.msk.f32.gmra.mrb[18].mxu1 %vm720_vm1, %v6379_v47  ;;  %v6803_v47 = vld [vmem:[#allocation3 + $0xa9] sm:$0xff] }
 0x4c1   : > { %15707 = vmatprep.mubr.msk.f32.mxu1 %vm720_vm1, %v6380_v48  ;;  %v6804_v48 = vld [vmem:[#allocation3 + $0xb1] sm:$0xff] }
 0x4c4   : > { %15708 = vmatmul.mubr.msk.f32.gmra.mrb[20].mxu1 %vm720_vm1, %v6381_v49  ;;  %v6805_v49 = vld [vmem:[#allocation3 + $0xb9] sm:$0xff] }
 0x4c5   : > { %15710 = vmatprep.mubr.msk.f32.mxu1 %vm720_vm1, %v6382_v50  ;;  %v6806_v50 = vld [vmem:[#allocation3 + $0xc1] sm:$0xff] }
 0x4c8   : > { %15711 = vmatmul.mubr.msk.f32.gmra.mrb[22].mxu1 %vm720_vm1, %v6383_v51  ;;  %v6807_v51 = vld [vmem:[#allocation3 + $0xc9] sm:$0xff] }
 0x4c9   : > { %15713 = vmatprep.mubr.msk.f32.mxu1 %vm720_vm1, %v6384_v55  ;;  %v6808_v55 = vld [vmem:[#allocation3 + $0xd1] sm:$0xff] }
 0x4cc   : > { %15714 = vmatmul.mubr.msk.f32.gmra.mrb[24].mxu1 %vm720_vm1, %v6385_v58  ;;  %v6809_v58 = vld [vmem:[#allocation3 + $0xd9] sm:$0xff] }
 0x4cd   : > { %15716 = vmatprep.mubr.msk.f32.mxu1 %vm720_vm1, %v6386_v63  ;;  %v6810_v63 = vld [vmem:[#allocation3 + $0xe1] sm:$0xff] }
 0x4d0   : > { %15717 = vmatmul.mubr.msk.f32.gmra.mrb[26].mxu1 %vm720_vm1, %v6387_v38  ;;  %v6811_v38 = vld [vmem:[#allocation3 + $0xe9] sm:$0xff] }
 0x4d1   : > { %15719 = vmatprep.mubr.msk.f32.mxu1 %vm720_vm1, %v6388_v40  ;;  %v6812_v40 = vld [vmem:[#allocation3 + $0xf1] sm:$0xff] }
 0x4d4   : > { %15720 = vmatmul.mubr.msk.f32.gmra.mrb[28].mxu1 %vm720_vm1, %v6389_v42  ;;  %v6813_v42 = vld [vmem:[#allocation3 + $0xf9] sm:$0xff] }
 0x4d5   : > { %15722 = vmatprep.mubr.msk.f32.mxu1 %vm720_vm1, %v6390_v34  ;;  %v6814_v34 = vld [vmem:[#allocation3 + $0x101] sm:$0xff] }
 0x4d8   : > { %15723 = vmatmul.mubr.msk.f32.gmra.mrb[30].mxu1 %vm720_vm1, %v6391_v22  ;;  %v6815_v22 = vld [vmem:[#allocation3 + $0x109] sm:$0xff] }
 0x4d9   : > { %15725 = vmatprep.mubr.msk.f32.mxu1 %vm720_vm1, %v6392_v30  ;;  %v6816_v30 = vld [vmem:[#allocation3 + $0x111] sm:$0xff] }
 0x4dc   : > { %15726 = vmatmul.mubr.msk.f32.gmra.mrb[32].mxu1 %vm720_vm1, %v6393_v1  ;;  %v6817_v1 = vld [vmem:[#allocation3 + $0x119] sm:$0xff] }
 0x4dd   : > { %15728 = vmatprep.mubr.msk.f32.mxu1 %vm720_vm1, %v6394_v2  ;;  %v6818_v2 = vld [vmem:[#allocation3 + $0x121] sm:$0xff] }
 0x4e0   : > { %15729 = vmatmul.mubr.msk.f32.gmra.mrb[34].mxu1 %vm720_vm1, %v6395_v4  ;;  %v6819_v4 = vld [vmem:[#allocation3 + $0x129] sm:$0xff] }
 0x4e1   : > { %15733 = vmatprep.mubr.msk.f32.mxu1 %vm720_vm1, %v6785_v17  ;;  %v6820_v17 = vld [vmem:[#allocation3 + $0x131] sm:$0xff] }
 0x4e4   : > { %15734 = vmatmul.mubr.msk.f32.vlgmr.msra.gmra.mrb[0].mxu1 %vm720_vm1, %v6786_v62  ;;  %v643_v62 = vld [vmem:[%s18445_s17 + $0x40] sm:$0xff]  ;;  %s8721_s17 = scalar_lea.vmem %s20295_s8, %s13612_s14 }
 0x4e5   : > { %15736 = vmatprep.mubr.msk.f32.mxu1 %vm720_vm1, %v18876_v9  ;;  %15788 = vmatpush3.msra.mxu1 %v18833_v20  ;;  %v18898_v20 = vld [vmem:[#allocation3 + $0x51] sm:$0xff] }
 0x4e6   : > { %15843 = vmatprep.subr.mxu1 %v18873_v36 }
 0x4e8   : > { %15737 = vmatmul.mubr.msk.f32.gmra.mrb[2].mxu1 %vm720_vm1, %v18882_v14 }
 0x4e9   : > { %15739 = vmatprep.mubr.msk.f32.mxu1 %vm720_vm1, %v18886_v54 }
 0x4ec   : > { %15740 = vmatmul.mubr.msk.f32.gmra.mrb[4].mxu1 %vm720_vm1, %v18890_v5 }
 0x4ed   : > { %15742 = vmatprep.mubr.msk.f32.mxu1 %vm720_vm1, %v18894_v6 }
 0x4f0   : > { %15743 = vmatmul.mubr.msk.f32.gmra.mrb[6].mxu1 %vm720_vm1, %v18898_v20 }
 0x4f1   : > { %15745 = vmatprep.mubr.msk.f32.mxu1 %vm720_vm1, %v18902_v61 }
 0x4f4   : > { %15746 = vmatmul.mubr.msk.f32.gmra.mrb[8].mxu1 %vm720_vm1, %v18906_v7 }
 0x4f5   : > { %15748 = vmatprep.mubr.msk.f32.mxu1 %vm720_vm1, %v18910_v53 }
 0x4f8   : > { %15749 = vmatmul.mubr.msk.f32.gmra.mrb[10].mxu1 %vm720_vm1, %v6796_v8 }
 0x4f9   : > { %15751 = vmatprep.mubr.msk.f32.mxu1 %vm720_vm1, %v6797_v10 }
 0x4fc   : > { %15752 = vmatmul.mubr.msk.f32.gmra.mrb[12].mxu1 %vm720_vm1, %v6798_v13 }
 0x4fd   : > { %15754 = vmatprep.mubr.msk.f32.mxu1 %vm720_vm1, %v6799_v18 }
 0x500   : > { %15755 = vmatmul.mubr.msk.f32.gmra.mrb[14].mxu1 %vm720_vm1, %v6800_v21 }
 0x501   : > { %15757 = vmatprep.mubr.msk.f32.mxu1 %vm720_vm1, %v6801_v33 }
 0x504   : > { %15758 = vmatmul.mubr.msk.f32.gmra.mrb[16].mxu1 %vm720_vm1, %v6802_v46 }
 0x505   : > { %15760 = vmatprep.mubr.msk.f32.mxu1 %vm720_vm1, %v6803_v47 }
 0x508   : > { %15761 = vmatmul.mubr.msk.f32.gmra.mrb[18].mxu1 %vm720_vm1, %v6804_v48 }
 0x509   : > { %15763 = vmatprep.mubr.msk.f32.mxu1 %vm720_vm1, %v6805_v49 }
 0x50c   : > { %15764 = vmatmul.mubr.msk.f32.gmra.mrb[20].mxu1 %vm720_vm1, %v6806_v50 }
 0x50d   : > { %15766 = vmatprep.mubr.msk.f32.mxu1 %vm720_vm1, %v6807_v51 }
 0x510   : > { %15767 = vmatmul.mubr.msk.f32.gmra.mrb[22].mxu1 %vm720_vm1, %v6808_v55 }
 0x511   : > { %15769 = vmatprep.mubr.msk.f32.mxu1 %vm720_vm1, %v6809_v58 }
 0x514   : > { %15770 = vmatmul.mubr.msk.f32.gmra.mrb[24].mxu1 %vm720_vm1, %v6810_v63 }
 0x515   : > { %15772 = vmatprep.mubr.msk.f32.mxu1 %vm720_vm1, %v6811_v38 }
 0x518   : > { %15773 = vmatmul.mubr.msk.f32.gmra.mrb[26].mxu1 %vm720_vm1, %v6812_v40 }
 0x519   : > { %15775 = vmatprep.mubr.msk.f32.mxu1 %vm720_vm1, %v6813_v42 }
 0x51c   : > { %15776 = vmatmul.mubr.msk.f32.gmra.mrb[28].mxu1 %vm720_vm1, %v6814_v34 }
 0x51d   : > { %15778 = vmatprep.mubr.msk.f32.mxu1 %vm720_vm1, %v6815_v22 }
 0x520   : > { %15779 = vmatmul.mubr.msk.f32.gmra.mrb[30].mxu1 %vm720_vm1, %v6816_v30 }
 0x521   : > { %15781 = vmatprep.mubr.msk.f32.mxu1 %vm720_vm1, %v6817_v1 }
 0x524   : > { %15782 = vmatmul.mubr.msk.f32.gmra.mrb[32].mxu1 %vm720_vm1, %v6818_v2 }
 0x525   : > { %15784 = vmatprep.mubr.msk.f32.mxu1 %vm720_vm1, %v6819_v4 }
 0x528   : > { %15785 = vmatmul.mubr.msk.f32.gmra.mrb[34].mxu1 %vm720_vm1, %v6820_v17 }
 0x529   : > { %15789 = vmatprep.mubr.msk.f32.mxu1 %vm720_vm1, %v18876_v9  ;;  %v7245_v9 = vld [vmem:[#allocation3 + $0x141] sm:$0xff] }
 0x52c   : > { %15790 = vmatmul.mubr.msk.f32.vlgmr.msra.gmra.mrb[0].mxu1 %vm720_vm1, %v18882_v14  ;;  %v7635_v14 = vld [vmem:[#allocation3 + $0x2a] sm:$0xff] }
 0x52d   : > { %15792 = vmatprep.mubr.msk.f32.mxu1 %vm720_vm1, %v18886_v54  ;;  %15844 = vmatpush3.msra.mxu1 %v18873_v36  ;;  %v7244_v36 = vld [vmem:[#allocation3 + $0x139] sm:$0xff] }
 0x52e   : > { %15899 = vmatprep.subr.mxu1 %v643_v62  ;;  %v7636_v54 = vld [vmem:[#allocation3 + $0x32] sm:$0xff] }
 0x530   : > { %15793 = vmatmul.mubr.msk.f32.gmra.mrb[2].mxu1 %vm720_vm1, %v18890_v5  ;;  %v7637_v5 = vld [vmem:[#allocation3 + $0x3a] sm:$0xff] }
 0x531   : > { %15795 = vmatprep.mubr.msk.f32.mxu1 %vm720_vm1, %v18894_v6  ;;  %v7638_v6 = vld [vmem:[#allocation3 + $0x42] sm:$0xff] }
 0x534   : > { %15796 = vmatmul.mubr.msk.f32.gmra.mrb[4].mxu1 %vm720_vm1, %v18898_v20  ;;  %v7639_v20 = vld [vmem:[#allocation3 + $0x4a] sm:$0xff] }
 0x535   : > { %15798 = vmatprep.mubr.msk.f32.mxu1 %vm720_vm1, %v18902_v61  ;;  %v7640_v61 = vld [vmem:[#allocation3 + $0x52] sm:$0xff] }
 0x538   : > { %15799 = vmatmul.mubr.msk.f32.gmra.mrb[6].mxu1 %vm720_vm1, %v18906_v7  ;;  %v7641_v7 = vld [vmem:[#allocation3 + $0x5a] sm:$0xff] }
 0x539   : > { %15801 = vmatprep.mubr.msk.f32.mxu1 %vm720_vm1, %v18910_v53  ;;  %v7642_v53 = vld [vmem:[#allocation3 + $0x62] sm:$0xff] }
 0x53c   : > { %15802 = vmatmul.mubr.msk.f32.gmra.mrb[8].mxu1 %vm720_vm1, %v6796_v8  ;;  %v7643_v8 = vld [vmem:[#allocation3 + $0x6a] sm:$0xff] }
 0x53d   : > { %15804 = vmatprep.mubr.msk.f32.mxu1 %vm720_vm1, %v6797_v10  ;;  %v7644_v10 = vld [vmem:[#allocation3 + $0x72] sm:$0xff] }
 0x540   : > { %15805 = vmatmul.mubr.msk.f32.gmra.mrb[10].mxu1 %vm720_vm1, %v6798_v13  ;;  %v7645_v13 = vld [vmem:[#allocation3 + $0x7a] sm:$0xff] }
 0x541   : > { %15807 = vmatprep.mubr.msk.f32.mxu1 %vm720_vm1, %v6799_v18  ;;  %v7646_v18 = vld [vmem:[#allocation3 + $0x82] sm:$0xff] }
 0x544   : > { %15808 = vmatmul.mubr.msk.f32.gmra.mrb[12].mxu1 %vm720_vm1, %v6800_v21  ;;  %v7647_v21 = vld [vmem:[#allocation3 + $0x8a] sm:$0xff] }
 0x545   : > { %15810 = vmatprep.mubr.msk.f32.mxu1 %vm720_vm1, %v6801_v33  ;;  %v7648_v33 = vld [vmem:[#allocation3 + $0x92] sm:$0xff] }
 0x548   : > { %15811 = vmatmul.mubr.msk.f32.gmra.mrb[14].mxu1 %vm720_vm1, %v6802_v46  ;;  %v7649_v46 = vld [vmem:[#allocation3 + $0x9a] sm:$0xff] }
 0x549   : > { %15813 = vmatprep.mubr.msk.f32.mxu1 %vm720_vm1, %v6803_v47  ;;  %v7650_v47 = vld [vmem:[#allocation3 + $0xa2] sm:$0xff] }
 0x54c   : > { %15814 = vmatmul.mubr.msk.f32.gmra.mrb[16].mxu1 %vm720_vm1, %v6804_v48  ;;  %v7651_v48 = vld [vmem:[#allocation3 + $0xaa] sm:$0xff] }
 0x54d   : > { %15816 = vmatprep.mubr.msk.f32.mxu1 %vm720_vm1, %v6805_v49  ;;  %v7652_v49 = vld [vmem:[#allocation3 + $0xb2] sm:$0xff] }
 0x550   : > { %15817 = vmatmul.mubr.msk.f32.gmra.mrb[18].mxu1 %vm720_vm1, %v6806_v50  ;;  %v7653_v50 = vld [vmem:[#allocation3 + $0xba] sm:$0xff] }
 0x551   : > { %15819 = vmatprep.mubr.msk.f32.mxu1 %vm720_vm1, %v6807_v51  ;;  %v7654_v51 = vld [vmem:[#allocation3 + $0xc2] sm:$0xff] }
 0x554   : > { %15820 = vmatmul.mubr.msk.f32.gmra.mrb[20].mxu1 %vm720_vm1, %v6808_v55  ;;  %v7655_v55 = vld [vmem:[#allocation3 + $0xca] sm:$0xff] }
 0x555   : > { %15822 = vmatprep.mubr.msk.f32.mxu1 %vm720_vm1, %v6809_v58  ;;  %v7656_v58 = vld [vmem:[#allocation3 + $0xd2] sm:$0xff] }
 0x558   : > { %15823 = vmatmul.mubr.msk.f32.gmra.mrb[22].mxu1 %vm720_vm1, %v6810_v63  ;;  %v7657_v63 = vld [vmem:[#allocation3 + $0xda] sm:$0xff] }
 0x559   : > { %15825 = vmatprep.mubr.msk.f32.mxu1 %vm720_vm1, %v6811_v38  ;;  %v7658_v38 = vld [vmem:[#allocation3 + $0xe2] sm:$0xff] }
 0x55c   : > { %15826 = vmatmul.mubr.msk.f32.gmra.mrb[24].mxu1 %vm720_vm1, %v6812_v40  ;;  %v7659_v40 = vld [vmem:[#allocation3 + $0xea] sm:$0xff] }
 0x55d   : > { %15828 = vmatprep.mubr.msk.f32.mxu1 %vm720_vm1, %v6813_v42  ;;  %v7660_v42 = vld [vmem:[#allocation3 + $0xf2] sm:$0xff] }
 0x560   : > { %15829 = vmatmul.mubr.msk.f32.gmra.mrb[26].mxu1 %vm720_vm1, %v6814_v34  ;;  %v7661_v34 = vld [vmem:[#allocation3 + $0xfa] sm:$0xff] }
 0x561   : > { %15831 = vmatprep.mubr.msk.f32.mxu1 %vm720_vm1, %v6815_v22  ;;  %v7662_v22 = vld [vmem:[#allocation3 + $0x102] sm:$0xff] }
 0x564   : > { %15832 = vmatmul.mubr.msk.f32.gmra.mrb[28].mxu1 %vm720_vm1, %v6816_v30  ;;  %v7663_v30 = vld [vmem:[#allocation3 + $0x10a] sm:$0xff] }
 0x565   : > { %15834 = vmatprep.mubr.msk.f32.mxu1 %vm720_vm1, %v6817_v1  ;;  %v7664_v1 = vld [vmem:[#allocation3 + $0x112] sm:$0xff] }
 0x568   : > { %15835 = vmatmul.mubr.msk.f32.gmra.mrb[30].mxu1 %vm720_vm1, %v6818_v2  ;;  %v7665_v2 = vld [vmem:[#allocation3 + $0x11a] sm:$0xff] }
 0x569   : > { %15837 = vmatprep.mubr.msk.f32.mxu1 %vm720_vm1, %v6819_v4  ;;  %v7666_v4 = vld [vmem:[#allocation3 + $0x122] sm:$0xff] }
 0x56c   : > { %15838 = vmatmul.mubr.msk.f32.gmra.mrb[32].mxu1 %vm720_vm1, %v6820_v17  ;;  %v7667_v17 = vld [vmem:[#allocation3 + $0x12a] sm:$0xff] }
 0x56d   : > { %15840 = vmatprep.mubr.msk.f32.mxu1 %vm720_vm1, %v7244_v36  ;;  %v7668_v36 = vld [vmem:[#allocation3 + $0x132] sm:$0xff] }
 0x570   : > { %15841 = vmatmul.mubr.msk.f32.gmra.mrb[34].mxu1 %vm720_vm1, %v7245_v9  ;;  %v7670_v9 = vld [vmem:[#allocation3 + $0x142] sm:$0xff] }
 0x571   : > { %15845 = vmatprep.mubr.msk.f32.mxu1 %vm720_vm1, %v7635_v14  ;;  %v8060_v14 = vld [vmem:[#allocation3 + $0x2b] sm:$0xff] }
 0x574   : > { %15846 = vmatmul.mubr.msk.f32.vlgmr.msra.gmra.mrb[0].mxu1 %vm720_vm1, %v7636_v54  ;;  %v8061_v54 = vld [vmem:[#allocation3 + $0x33] sm:$0xff] }
 0x575   : > { %15848 = vmatprep.mubr.msk.f32.mxu1 %vm720_vm1, %v7637_v5  ;;  %15900 = vmatpush3.msra.mxu1 %v643_v62  ;;  %v7669_v62 = vld [vmem:[#allocation3 + $0x13a] sm:$0xff] }
 0x576   : > { %v8062_v5 = vld [vmem:[#allocation3 + $0x3b] sm:$0xff] }
 0x578   : > { %15849 = vmatmul.mubr.msk.f32.gmra.mrb[2].mxu1 %vm720_vm1, %v7638_v6  ;;  %v8063_v6 = vld [vmem:[#allocation3 + $0x43] sm:$0xff] }
 0x579   : > { %15851 = vmatprep.mubr.msk.f32.mxu1 %vm720_vm1, %v7639_v20  ;;  %v8064_v20 = vld [vmem:[#allocation3 + $0x4b] sm:$0xff] }
 0x57c   : > { %15852 = vmatmul.mubr.msk.f32.gmra.mrb[4].mxu1 %vm720_vm1, %v7640_v61  ;;  %v8065_v61 = vld [vmem:[#allocation3 + $0x53] sm:$0xff] }
 0x57d   : > { %15854 = vmatprep.mubr.msk.f32.mxu1 %vm720_vm1, %v7641_v7  ;;  %v8066_v7 = vld [vmem:[#allocation3 + $0x5b] sm:$0xff] }
 0x580   : > { %15855 = vmatmul.mubr.msk.f32.gmra.mrb[6].mxu1 %vm720_vm1, %v7642_v53  ;;  %v8067_v53 = vld [vmem:[#allocation3 + $0x63] sm:$0xff] }
 0x581   : > { %15857 = vmatprep.mubr.msk.f32.mxu1 %vm720_vm1, %v7643_v8  ;;  %v8068_v8 = vld [vmem:[#allocation3 + $0x6b] sm:$0xff] }
 0x584   : > { %15858 = vmatmul.mubr.msk.f32.gmra.mrb[8].mxu1 %vm720_vm1, %v7644_v10  ;;  %v8069_v10 = vld [vmem:[#allocation3 + $0x73] sm:$0xff] }
 0x585   : > { %15860 = vmatprep.mubr.msk.f32.mxu1 %vm720_vm1, %v7645_v13  ;;  %v8070_v13 = vld [vmem:[#allocation3 + $0x7b] sm:$0xff] }
 0x588   : > { %15861 = vmatmul.mubr.msk.f32.gmra.mrb[10].mxu1 %vm720_vm1, %v7646_v18  ;;  %v8071_v18 = vld [vmem:[#allocation3 + $0x83] sm:$0xff] }
 0x589   : > { %15863 = vmatprep.mubr.msk.f32.mxu1 %vm720_vm1, %v7647_v21  ;;  %v8072_v21 = vld [vmem:[#allocation3 + $0x8b] sm:$0xff] }
 0x58c   : > { %15864 = vmatmul.mubr.msk.f32.gmra.mrb[12].mxu1 %vm720_vm1, %v7648_v33  ;;  %v8073_v33 = vld [vmem:[#allocation3 + $0x93] sm:$0xff] }
 0x58d   : > { %15866 = vmatprep.mubr.msk.f32.mxu1 %vm720_vm1, %v7649_v46  ;;  %v8074_v46 = vld [vmem:[#allocation3 + $0x9b] sm:$0xff] }
 0x590   : > { %15867 = vmatmul.mubr.msk.f32.gmra.mrb[14].mxu1 %vm720_vm1, %v7650_v47  ;;  %v8075_v47 = vld [vmem:[#allocation3 + $0xa3] sm:$0xff] }
 0x591   : > { %15869 = vmatprep.mubr.msk.f32.mxu1 %vm720_vm1, %v7651_v48  ;;  %v8076_v48 = vld [vmem:[#allocation3 + $0xab] sm:$0xff] }
 0x594   : > { %15870 = vmatmul.mubr.msk.f32.gmra.mrb[16].mxu1 %vm720_vm1, %v7652_v49  ;;  %v8077_v49 = vld [vmem:[#allocation3 + $0xb3] sm:$0xff] }
 0x595   : > { %15872 = vmatprep.mubr.msk.f32.mxu1 %vm720_vm1, %v7653_v50  ;;  %v8078_v50 = vld [vmem:[#allocation3 + $0xbb] sm:$0xff] }
 0x598   : > { %15873 = vmatmul.mubr.msk.f32.gmra.mrb[18].mxu1 %vm720_vm1, %v7654_v51  ;;  %v8079_v51 = vld [vmem:[#allocation3 + $0xc3] sm:$0xff] }
 0x599   : > { %15875 = vmatprep.mubr.msk.f32.mxu1 %vm720_vm1, %v7655_v55  ;;  %v8080_v55 = vld [vmem:[#allocation3 + $0xcb] sm:$0xff] }
 0x59c   : > { %15876 = vmatmul.mubr.msk.f32.gmra.mrb[20].mxu1 %vm720_vm1, %v7656_v58  ;;  %v8081_v58 = vld [vmem:[#allocation3 + $0xd3] sm:$0xff] }
 0x59d   : > { %15878 = vmatprep.mubr.msk.f32.mxu1 %vm720_vm1, %v7657_v63  ;;  %v8082_v63 = vld [vmem:[#allocation3 + $0xdb] sm:$0xff] }
 0x5a0   : > { %15879 = vmatmul.mubr.msk.f32.gmra.mrb[22].mxu1 %vm720_vm1, %v7658_v38  ;;  %v8083_v38 = vld [vmem:[#allocation3 + $0xe3] sm:$0xff] }
 0x5a1   : > { %15881 = vmatprep.mubr.msk.f32.mxu1 %vm720_vm1, %v7659_v40  ;;  %v8084_v40 = vld [vmem:[#allocation3 + $0xeb] sm:$0xff] }
 0x5a4   : > { %15882 = vmatmul.mubr.msk.f32.gmra.mrb[24].mxu1 %vm720_vm1, %v7660_v42  ;;  %v8085_v42 = vld [vmem:[#allocation3 + $0xf3] sm:$0xff] }
 0x5a5   : > { %15884 = vmatprep.mubr.msk.f32.mxu1 %vm720_vm1, %v7661_v34  ;;  %v8086_v34 = vld [vmem:[#allocation3 + $0xfb] sm:$0xff] }
 0x5a8   : > { %15885 = vmatmul.mubr.msk.f32.gmra.mrb[26].mxu1 %vm720_vm1, %v7662_v22  ;;  %v8087_v22 = vld [vmem:[#allocation3 + $0x103] sm:$0xff] }
 0x5a9   : > { %15887 = vmatprep.mubr.msk.f32.mxu1 %vm720_vm1, %v7663_v30  ;;  %v8088_v30 = vld [vmem:[#allocation3 + $0x10b] sm:$0xff] }
 0x5ac   : > { %15888 = vmatmul.mubr.msk.f32.gmra.mrb[28].mxu1 %vm720_vm1, %v7664_v1  ;;  %v8089_v1 = vld [vmem:[#allocation3 + $0x113] sm:$0xff] }
 0x5ad   : > { %15890 = vmatprep.mubr.msk.f32.mxu1 %vm720_vm1, %v7665_v2  ;;  %v8090_v2 = vld [vmem:[#allocation3 + $0x11b] sm:$0xff] }
 0x5b0   : > { %15891 = vmatmul.mubr.msk.f32.gmra.mrb[30].mxu1 %vm720_vm1, %v7666_v4  ;;  %v8091_v4 = vld [vmem:[#allocation3 + $0x123] sm:$0xff] }
 0x5b1   : > { %15893 = vmatprep.mubr.msk.f32.mxu1 %vm720_vm1, %v7667_v17  ;;  %v8092_v17 = vld [vmem:[#allocation3 + $0x12b] sm:$0xff] }
 0x5b4   : > { %15894 = vmatmul.mubr.msk.f32.gmra.mrb[32].mxu1 %vm720_vm1, %v7668_v36  ;;  %v8093_v36 = vld [vmem:[#allocation3 + $0x133] sm:$0xff] }
 0x5b5   : > { %15896 = vmatprep.mubr.msk.f32.mxu1 %vm720_vm1, %v7669_v62  ;;  %v8094_v62 = vld [vmem:[#allocation3 + $0x13b] sm:$0xff] }
 0x5b8   : > { %15897 = vmatmul.mubr.msk.f32.gmra.mrb[34].mxu1 %vm720_vm1, %v7670_v9  ;;  %v8095_v9 = vld [vmem:[#allocation3 + $0x143] sm:$0xff] }
 0x5b9   : > { %15901 = vmatprep.mubr.msk.f32.mxu1 %vm720_vm1, %v8060_v14  ;;  %v17428_v14 = vmov 0.0  }
 0x5ba   : > { %15955 = vmatprep.subr.mxu0 %v17428_v14  ;;  %15960 = vmatprep.subr.mxu1 %v17428_v14 }
 0x5bb   : > { %15957 = vmatprep.mubr.msk.f32.mxu0 %vm17429_vm2, %v17428_v14 }
 0x5bc   : > { %15902 = vmatmul.mubr.msk.f32.vlgmr.msra.gmra.mrb[0].mxu1 %vm720_vm1, %v8061_v54  ;;  %v8643_v54 = vld [vmem:[%s8642_s13] sm:$0xff] }
 0x5bd   : > { %15904 = vmatprep.mubr.msk.f32.mxu1 %vm720_vm1, %v8062_v5  ;;  %15956 = vmatpush3.msra.mxu0 %v8643_v54  ;;  %v8722_v5 = vld [vmem:[%s8721_s17] sm:$0x3] }
 0x5be   : > { %15961 = vmatpush3.msk.msra.mxu1 %vm8729_vm3, %v8722_v5 }
 0x5c0   : > { %15905 = vmatmul.mubr.msk.f32.gmra.mrb[2].mxu1 %vm720_vm1, %v8063_v6  ;;  %v19070_v6 = vld [vmem:[%s646_s20] ss:$0 sm:$0xff] }
 0x5c1   : > { %15907 = vmatprep.mubr.msk.f32.mxu1 %vm720_vm1, %v8064_v20 }
 0x5c4   : > { %15908 = vmatmul.mubr.msk.f32.gmra.mrb[4].mxu1 %vm720_vm1, %v8065_v61 }
 0x5c5   : > { %15910 = vmatprep.mubr.msk.f32.mxu1 %vm720_vm1, %v8066_v7 }
 0x5c8   : > { %15911 = vmatmul.mubr.msk.f32.gmra.mrb[6].mxu1 %vm720_vm1, %v8067_v53 }
 0x5c9   : > { %15913 = vmatprep.mubr.msk.f32.mxu1 %vm720_vm1, %v8068_v8 }
 0x5cc   : > { %15914 = vmatmul.mubr.msk.f32.gmra.mrb[8].mxu1 %vm720_vm1, %v8069_v10 }
 0x5cd   : > { %15916 = vmatprep.mubr.msk.f32.mxu1 %vm720_vm1, %v8070_v13 }
 0x5d0   : > { %15917 = vmatmul.mubr.msk.f32.gmra.mrb[10].mxu1 %vm720_vm1, %v8071_v18 }
 0x5d1   : > { %15919 = vmatprep.mubr.msk.f32.mxu1 %vm720_vm1, %v8072_v21 }
 0x5d4   : > { %15920 = vmatmul.mubr.msk.f32.gmra.mrb[12].mxu1 %vm720_vm1, %v8073_v33 }
 0x5d5   : > { %15922 = vmatprep.mubr.msk.f32.mxu1 %vm720_vm1, %v8074_v46 }
 0x5d8   : > { %15923 = vmatmul.mubr.msk.f32.gmra.mrb[14].mxu1 %vm720_vm1, %v8075_v47 }
 0x5d9   : > { %15925 = vmatprep.mubr.msk.f32.mxu1 %vm720_vm1, %v8076_v48 }
 0x5dc   : > { %15926 = vmatmul.mubr.msk.f32.gmra.mrb[16].mxu1 %vm720_vm1, %v8077_v49 }
 0x5dd   : > { %15928 = vmatprep.mubr.msk.f32.mxu1 %vm720_vm1, %v8078_v50 }
 0x5e0   : > { %15929 = vmatmul.mubr.msk.f32.gmra.mrb[18].mxu1 %vm720_vm1, %v8079_v51 }
 0x5e1   : > { %15931 = vmatprep.mubr.msk.f32.mxu1 %vm720_vm1, %v8080_v55 }
 0x5e4   : > { %15932 = vmatmul.mubr.msk.f32.gmra.mrb[20].mxu1 %vm720_vm1, %v8081_v58 }
 0x5e5   : > { %15934 = vmatprep.mubr.msk.f32.mxu1 %vm720_vm1, %v8082_v63 }
 0x5e8   : > { %15935 = vmatmul.mubr.msk.f32.gmra.mrb[22].mxu1 %vm720_vm1, %v8083_v38 }
 0x5e9   : > { %15937 = vmatprep.mubr.msk.f32.mxu1 %vm720_vm1, %v8084_v40 }
 0x5ec   : > { %15938 = vmatmul.mubr.msk.f32.gmra.mrb[24].mxu1 %vm720_vm1, %v8085_v42 }
 0x5ed   : > { %15940 = vmatprep.mubr.msk.f32.mxu1 %vm720_vm1, %v8086_v34 }
 0x5f0   : > { %15941 = vmatmul.mubr.msk.f32.gmra.mrb[26].mxu1 %vm720_vm1, %v8087_v22 }
 0x5f1   : > { %15943 = vmatprep.mubr.msk.f32.mxu1 %vm720_vm1, %v8088_v30 }
 0x5f4   : > { %15944 = vmatmul.mubr.msk.f32.gmra.mrb[28].mxu1 %vm720_vm1, %v8089_v1 }
 0x5f5   : > { %15946 = vmatprep.mubr.msk.f32.mxu1 %vm720_vm1, %v8090_v2 }
 0x5f8   : > { %15947 = vmatmul.mubr.msk.f32.gmra.mrb[30].mxu1 %vm720_vm1, %v8091_v4 }
 0x5f9   : > { %15949 = vmatprep.mubr.msk.f32.mxu1 %vm720_vm1, %v8092_v17 }
 0x5fc   : > { %15950 = vmatmul.mubr.msk.f32.gmra.mrb[32].mxu1 %vm720_vm1, %v8093_v36 }
 0x5fd   : > { %15952 = vmatprep.mubr.msk.f32.mxu1 %vm720_vm1, %v8094_v62 }
 0x600   : > { %15953 = vmatmul.mubr.msk.f32.gmra.mrb[34].mxu1 %vm720_vm1, %v8095_v9 }
 0x601   : > { %15962 = vmatprep.mubr.msk.f32.mxu1 %vm17429_vm2, %v17428_v14 }
 0x68f   : > { %v15903_v20 = vpop.f32.mrb[0].mxu1 }
 0x690   : > { %v8492_v61 = vadd.f32 %v15903_v20, %v19070_v6  ;;  %v8270_v7 = vpop.f32.mrb[1].mxu1 }
 0x691   : > { %v8491_v53 = vadd.f32 %v19070_v6, %v8270_v7 }
 0x692   : > { %v19075_v8 = vmul.f32 %v8492_v61, %v18461_v26 }
 0x693   : > { %v19078_v10 = vmul.f32 %v8491_v53, %v18457_v24  ;;  %v15906_v13 = vpop.f32.mrb[2].mxu1 }
 0x694   : > { %v8494_v18 = vadd.f32 %v15906_v13, %v19070_v6  ;;  %v8280_v21 = vpop.f32.mrb[3].mxu1  ;;  %v8564_v33 = vsel %vm720_vm1, %v19075_v8, 0.0 }
 0x695   : > { %v8563_v46 = vsel %vm720_vm1, %v19078_v10, 0.0  ;;  %v8493_v47 = vadd.f32 %v19070_v6, %v8280_v21 }
 0x696   : > { %v19087_v48 = vmul.f32 %v8494_v18, %v18459_v25  ;;  %v8565_v49 = vadd.f32 %v8564_v33, %v8563_v46 }
 0x697   : > { %v19090_v26 = vmul.f32 %v8493_v47, %v18455_v23  ;;  %v15909_v24 = vpop.f32.mrb[4].mxu1 }
 0x698   : > { %v8496_v50 = vadd.f32 %v15909_v24, %v19070_v6  ;;  %v8290_v51 = vpop.f32.mrb[5].mxu1  ;;  %v8568_v38 = vsel %vm720_vm1, %v19087_v48, 0.0 }
 0x699   : > { %v8566_v55 = vsel %vm720_vm1, %v19090_v26, 0.0  ;;  %v8495_v58 = vadd.f32 %v19070_v6, %v8290_v51 }
 0x69a   : > { %v8567_v63 = vadd.f32 %v8566_v55, %v8565_v49  ;;  %v19099_v25 = vmul.f32 %v8496_v50, %v18463_v27 }
 0x69b   : > { %v19102_v23 = vmul.f32 %v8495_v58, %v18465_v31  ;;  %v15912_v40 = vpop.f32.mrb[6].mxu1 }
 0x69c   : > { %v8569_v42 = vadd.f32 %v8568_v38, %v8567_v63  ;;  %v8498_v34 = vadd.f32 %v15912_v40, %v19070_v6  ;;  %v8300_v22 = vpop.f32.mrb[7].mxu1  ;;  %v8572_v4 = vsel %vm720_vm1, %v19099_v25, 0.0 }
 0x69d   : > { %v8570_v30 = vsel %vm720_vm1, %v19102_v23, 0.0  ;;  %v8497_v1 = vadd.f32 %v19070_v6, %v8300_v22 }
 0x69e   : > { %v8571_v2 = vadd.f32 %v8570_v30, %v8569_v42  ;;  %v19111_v27 = vmul.f32 %v8498_v34, %v18467_v29 }
 0x69f   : > { %v19114_v31 = vmul.f32 %v8497_v1, %v18469_v32  ;;  %v15915_v17 = vpop.f32.mrb[8].mxu1 }
 0x6a0   : > { %v8573_v62 = vadd.f32 %v8572_v4, %v8571_v2  ;;  %v8500_v36 = vadd.f32 %v15915_v17, %v19070_v6  ;;  %v8310_v9 = vpop.f32.mrb[9].mxu1  ;;  %v8576_v20 = vsel %vm720_vm1, %v19111_v27, 0.0 }
 0x6a1   : > { %v8574_v14 = vsel %vm720_vm1, %v19114_v31, 0.0  ;;  %v8499_v54 = vadd.f32 %v19070_v6, %v8310_v9 }
 0x6a2   : > { %v8575_v5 = vadd.f32 %v8574_v14, %v8573_v62  ;;  %v19123_v29 = vmul.f32 %v8500_v36, %v18471_v43 }
 0x6a3   : > { %v19126_v32 = vmul.f32 %v8499_v54, %v18473_v44  ;;  %v15918_v61 = vpop.f32.mrb[10].mxu1 }
 0x6a4   : > { %v8577_v7 = vadd.f32 %v8576_v20, %v8575_v5  ;;  %v8502_v53 = vadd.f32 %v15918_v61, %v19070_v6  ;;  %v8320_v13 = vpop.f32.mrb[11].mxu1  ;;  %v8580_v46 = vsel %vm720_vm1, %v19123_v29, 0.0 }
 0x6a5   : > { %v8578_v18 = vsel %vm720_vm1, %v19126_v32, 0.0  ;;  %v8501_v21 = vadd.f32 %v19070_v6, %v8320_v13 }
 0x6a6   : > { %v8579_v33 = vadd.f32 %v8578_v18, %v8577_v7  ;;  %v19135_v43 = vmul.f32 %v8502_v53, %v18481_v28 }
 0x6a7   : > { %v19138_v44 = vmul.f32 %v8501_v21, %v18483_v60  ;;  %v15921_v47 = vpop.f32.mrb[12].mxu1 }
 0x6a8   : > { %v8581_v24 = vadd.f32 %v8580_v46, %v8579_v33  ;;  %v8504_v49 = vadd.f32 %v15921_v47, %v19070_v6  ;;  %v8330_v50 = vpop.f32.mrb[13].mxu1  ;;  %v8584_v63 = vsel %vm720_vm1, %v19135_v43, 0.0 }
 0x6a9   : > { %v8582_v51 = vsel %vm720_vm1, %v19138_v44, 0.0  ;;  %v8503_v55 = vadd.f32 %v19070_v6, %v8330_v50 }
 0x6aa   : > { %v8583_v58 = vadd.f32 %v8582_v51, %v8581_v24  ;;  %v19147_v28 = vmul.f32 %v8504_v49, %v18489_v56 }
 0x6ab   : > { %v19150_v60 = vmul.f32 %v8503_v55, %v18493_v59  ;;  %v15924_v38 = vpop.f32.mrb[14].mxu1 }
 0x6ac   : > { %v8585_v40 = vadd.f32 %v8584_v63, %v8583_v58  ;;  %v8506_v42 = vadd.f32 %v15924_v38, %v19070_v6  ;;  %v8340_v34 = vpop.f32.mrb[15].mxu1  ;;  %v8588_v2 = vsel %vm720_vm1, %v19147_v28, 0.0 }
 0x6ad   : > { %v8586_v22 = vsel %vm720_vm1, %v19150_v60, 0.0  ;;  %v8505_v30 = vadd.f32 %v19070_v6, %v8340_v34 }
 0x6ae   : > { %v8587_v1 = vadd.f32 %v8586_v22, %v8585_v40  ;;  %v19159_v56 = vmul.f32 %v8506_v42, %v18502_v41 }
 0x6af   : > { %v19162_v59 = vmul.f32 %v8505_v30, %v18505_v35  ;;  %v15927_v4 = vpop.f32.mrb[16].mxu1 }
 0x6b0   : > { %v8589_v17 = vadd.f32 %v8588_v2, %v8587_v1  ;;  %v8508_v62 = vadd.f32 %v15927_v4, %v19070_v6  ;;  %v8350_v36 = vpop.f32.mrb[17].mxu1  ;;  %v8592_v5 = vsel %vm720_vm1, %v19159_v56, 0.0 }
 0x6b1   : > { %v8590_v9 = vsel %vm720_vm1, %v19162_v59, 0.0  ;;  %v8507_v14 = vadd.f32 %v19070_v6, %v8350_v36 }
 0x6b2   : > { %v8591_v54 = vadd.f32 %v8590_v9, %v8589_v17  ;;  %v19171_v41 = vmul.f32 %v8508_v62, %v18517_v12 }
 0x6b3   : > { %v19174_v35 = vmul.f32 %v8507_v14, %v18521_v15  ;;  %v15930_v20 = vpop.f32.mrb[18].mxu1 }
 0x6b4   : > { %v8593_v61 = vadd.f32 %v8592_v5, %v8591_v54  ;;  %v8510_v7 = vadd.f32 %v15930_v20, %v19070_v6  ;;  %v8360_v53 = vpop.f32.mrb[19].mxu1  ;;  %v8596_v33 = vsel %vm720_vm1, %v19171_v41, 0.0 }
 0x6b5   : > { %v8594_v13 = vsel %vm720_vm1, %v19174_v35, 0.0  ;;  %v8509_v18 = vadd.f32 %v19070_v6, %v8360_v53 }
 0x6b6   : > { %v8595_v21 = vadd.f32 %v8594_v13, %v8593_v61  ;;  %v19183_v12 = vmul.f32 %v8510_v7, %v18532_v52 }
 0x6b7   : > { %v19186_v15 = vmul.f32 %v8509_v18, %v18536_v57  ;;  %v15933_v46 = vpop.f32.mrb[20].mxu1 }
 0x6b8   : > { %v8597_v47 = vadd.f32 %v8596_v33, %v8595_v21  ;;  %v8512_v24 = vadd.f32 %v15933_v46, %v19070_v6  ;;  %v8370_v49 = vpop.f32.mrb[21].mxu1  ;;  %v8600_v58 = vsel %vm720_vm1, %v19183_v12, 0.0 }
 0x6b9   : > { %v8598_v50 = vsel %vm720_vm1, %v19186_v15, 0.0  ;;  %v8511_v51 = vadd.f32 %v19070_v6, %v8370_v49 }
 0x6ba   : > { %v8599_v55 = vadd.f32 %v8598_v50, %v8597_v47  ;;  %v19195_v52 = vmul.f32 %v8512_v24, %v18549_v0 }
 0x6bb   : > { %v19198_v57 = vmul.f32 %v8511_v51, %v18553_v3  ;;  %v15936_v63 = vpop.f32.mrb[22].mxu1 }
 0x6bc   : > { %v8601_v38 = vadd.f32 %v8600_v58, %v8599_v55  ;;  %v8514_v40 = vadd.f32 %v15936_v63, %v19070_v6  ;;  %v8380_v42 = vpop.f32.mrb[23].mxu1  ;;  %v8604_v1 = vsel %vm720_vm1, %v19195_v52, 0.0  ;;  %v20333_v58 = vld [vmem:[#allocation5_spill] sm:$0xff]  ;;  %v20334_v63 = vld [vmem:[#allocation6_spill] sm:$0xff] }
 0x6bd   : > { %v8602_v34 = vsel %vm720_vm1, %v19198_v57, 0.0  ;;  %v8513_v22 = vadd.f32 %v19070_v6, %v8380_v42 }
 0x6be   : > { %v8603_v30 = vadd.f32 %v8602_v34, %v8601_v38  ;;  %v19207_v0 = vmul.f32 %v8514_v40, %v18564_v19 }
 0x6bf   : > { %v19210_v3 = vmul.f32 %v8513_v22, %v18568_v45  ;;  %v15939_v2 = vpop.f32.mrb[24].mxu1 }
 0x6c0   : > { %v8605_v4 = vadd.f32 %v8604_v1, %v8603_v30  ;;  %v8516_v17 = vadd.f32 %v15939_v2, %v19070_v6  ;;  %v8390_v62 = vpop.f32.mrb[25].mxu1  ;;  %v8608_v54 = vsel %vm720_vm1, %v19207_v0, 0.0 }
 0x6c1   : > { %v8606_v36 = vsel %vm720_vm1, %v19210_v3, 0.0  ;;  %v8515_v9 = vadd.f32 %v19070_v6, %v8390_v62  ;;  %v20336_v62 = vld [vmem:[#allocation8_spill] sm:$0xff] }
 0x6c2   : > { %v8607_v14 = vadd.f32 %v8606_v36, %v8605_v4  ;;  %v19219_v19 = vmul.f32 %v8516_v17, %v18581_v37  ;;  %v20335_v4 = vld [vmem:[#allocation7_spill] sm:$0xff] }
 0x6c3   : > { %v19222_v45 = vmul.f32 %v8515_v9, %v18585_v39  ;;  %v15942_v5 = vpop.f32.mrb[26].mxu1 }
 0x6c4   : > { %v8609_v20 = vadd.f32 %v8608_v54, %v8607_v14  ;;  %v8518_v61 = vadd.f32 %v15942_v5, %v19070_v6  ;;  %v8400_v7 = vpop.f32.mrb[27].mxu1  ;;  %v8612_v21 = vsel %vm720_vm1, %v19219_v19, 0.0 }
 0x6c5   : > { %v8610_v53 = vsel %vm720_vm1, %v19222_v45, 0.0  ;;  %v8517_v13 = vadd.f32 %v19070_v6, %v8400_v7 }
 0x6c6   : > { %v8611_v18 = vadd.f32 %v8610_v53, %v8609_v20  ;;  %v19231_v37 = vmul.f32 %v8518_v61, %v18596_v11 }
 0x6c7   : > { %v19234_v39 = vmul.f32 %v8517_v13, %v18600_v16  ;;  %v15945_v33 = vpop.f32.mrb[28].mxu1  ;;  %v20337_v13 = vld [vmem:[#allocation9_spill] sm:$0xff] }
 0x6c8   : > { %v8613_v46 = vadd.f32 %v8612_v21, %v8611_v18  ;;  %v8520_v47 = vadd.f32 %v15945_v33, %v19070_v6  ;;  %v8410_v24 = vpop.f32.mrb[29].mxu1  ;;  %v8616_v55 = vsel %vm720_vm1, %v19231_v37, 0.0  ;;  %v20338_v21 = vld [vmem:[#allocation10_spill] sm:$0xff] }
 0x6c9   : > { %v8614_v49 = vsel %vm720_vm1, %v19234_v39, 0.0  ;;  %v8519_v50 = vadd.f32 %v19070_v6, %v8410_v24 }
 0x6ca   : > { %v8615_v51 = vadd.f32 %v8614_v49, %v8613_v46  ;;  %v19243_v11 = vmul.f32 %v8520_v47, %v20333_v58 }
 0x6cb   : > { %v19246_v16 = vmul.f32 %v8519_v50, %v20334_v63  ;;  %v15948_v38 = vpop.f32.mrb[30].mxu1  ;;  %v20339_v63 = vld [vmem:[#allocation11_spill] sm:$0xff] }
 0x6cc   : > { %v8617_v40 = vadd.f32 %v8616_v55, %v8615_v51  ;;  %v8522_v42 = vadd.f32 %v15948_v38, %v19070_v6  ;;  %v8420_v34 = vpop.f32.mrb[31].mxu1  ;;  %v8620_v2 = vsel %vm720_vm1, %v19243_v11, 0.0 }
 0x6cd   : > { %v8618_v22 = vsel %vm720_vm1, %v19246_v16, 0.0  ;;  %v8521_v30 = vadd.f32 %v19070_v6, %v8420_v34 }
 0x6ce   : > { %v8619_v1 = vadd.f32 %v8618_v22, %v8617_v40  ;;  %v19255_v17 = vmul.f32 %v8522_v42, %v20335_v4  ;;  %v20340_v40 = vld [vmem:[#allocation12_spill] sm:$0xff] }
 0x6cf   : > { %v19258_v36 = vmul.f32 %v8521_v30, %v20336_v62  ;;  %v15951_v9 = vpop.f32.mrb[32].mxu1 }
 0x6d0   : > { %v8621_v14 = vadd.f32 %v8620_v2, %v8619_v1  ;;  %v8524_v54 = vadd.f32 %v15951_v9, %v19070_v6  ;;  %v8430_v5 = vpop.f32.mrb[33].mxu1  ;;  %v8624_v53 = vsel %vm720_vm1, %v19255_v17, 0.0 }
 0x6d1   : > { %v8622_v20 = vsel %vm720_vm1, %v19258_v36, 0.0  ;;  %v8523_v61 = vadd.f32 %v19070_v6, %v8430_v5 }
 0x6d2   : > { %v8623_v7 = vadd.f32 %v8622_v20, %v8621_v14  ;;  %v19267_v18 = vmul.f32 %v8524_v54, %v20337_v13  ;;  %v8645_v20 = vld [vmem:[%s8644_s29] sm:$0x1] }
 0x6d3   : > { %v19270_v33 = vmul.f32 %v8523_v61, %v20338_v21  ;;  %v15954_v46 = vpop.f32.mrb[34].mxu1  ;;  %v8724_v21 = vld [vmem:[%s8723_s15] sm:$0x1] }
 0x6d4   : > { %v8625_v47 = vadd.f32 %v8624_v53, %v8623_v7  ;;  %v8526_v24 = vadd.f32 %v15954_v46, %v19070_v6  ;;  %v8440_v49 = vpop.f32.mrb[35].mxu1  ;;  %v8628_v58 = vsel %vm720_vm1, %v19267_v18, 0.0 }
 0x6d5   : > { %v8626_v50 = vsel %vm720_vm1, %v19270_v33, 0.0  ;;  %v8525_v51 = vadd.f32 %v19070_v6, %v8440_v49 }
 0x6d6   : > { %v8627_v55 = vadd.f32 %v8626_v50, %v8625_v47  ;;  %v19279_v38 = vmul.f32 %v8526_v24, %v20339_v63 }
 0x6d7   : > { %v19282_v42 = vmul.f32 %v8525_v51, %v20340_v40 }
 0x6d8   : > { %v8629_v34 = vadd.f32 %v8628_v58, %v8627_v55  ;;  %v8632_v1 = vsel %vm720_vm1, %v19279_v38, 0.0  ;;  %v8845_v55 = vlaneseq }
 0x6d9   : > { %v8630_v22 = vsel %vm720_vm1, %v19282_v42, 0.0 }
 0x6da   : > { %v8631_v30 = vadd.f32 %v8630_v22, %v8629_v34  ;;  %v8846_v58 = vshrl.u32 %v8845_v55, 7 }
 0x6dc   : > { %v8633_v6 = vadd.f32 %v8632_v1, %v8631_v30  ;;  %v8847_v63 = vsub.s32 0, %v8846_v58  ;;  %v8828_v58 = vld [vmem:[#allocation2 + $0xb0] sm:$0xff] }
 0x6de   : > { %v8634_v2 = vrot.slane %v8633_v6, 4 }
 0x6e0   : > { %v8635_v4 = vadd.f32 %v8634_v2, %v8633_v6 }
 0x6e2   : > { %v8636_v62 = vrot.slane %v8635_v4, 2 }
 0x6e4   : > { %v8637_v9 = vadd.f32 %v8636_v62, %v8635_v4 }
 0x6e6   : > { %v8638_v14 = vrot.slane %v8637_v9, 1 }
 0x6e8   : > { %v8639_v54 = vadd.f32 %v8638_v14, %v8637_v9 }
 0x6ea   : > { %v8640_v5 = vmul.f32 0.00390625, %v8639_v54 }
 0x6ec   : > { %15958 = vmatmul.mubr.msk.f32.vlgmr.msra.gmra.mrb[36].mxu0 %vm720_vm1, %v8640_v5  ;;  %v8814_v5 = vld [vmem:[#allocation2 + $0x40] sm:$0xff] }
 0x7bf   : > { %v8715_v61 = vpop.f32.mrb[36].mxu0 }
 0x7c0   : > { %v8716_v7 = vadd.f32 %v8715_v61, %v8645_v20  ;;  %v15959_v53 = vpop.f32.mrb[37].mxu0  ;;  %v8816_v20 = vld [vmem:[#allocation2 + $0x50] sm:$0xff] }
 0x7c1   : > { %v8818_v53 = vld [vmem:[#allocation2 + $0x60] sm:$0xff] }
 0x7c2   : > { %v8719_v13 = vmax.f32 %v8716_v7, 0.0 }
 0x7c4   : > { %15963 = vmatmul.mubr.msk.f32.vlgmr.msra.gmra.mrb[36].mxu1 %vm8725_vm4, %v8719_v13  ;;  %v8820_v13 = vld [vmem:[#allocation2 + $0x70] sm:$0xff] }
 0x897   : > { %v8799_v46 = vpop.f32.mrb[36].mxu1 }
 0x898   : > { %v8800_v47 = vadd.f32 %v8799_v46, %v8724_v21  ;;  %v15964_v24 = vpop.f32.mrb[37].mxu1 }
 0x89a   : > { %v13615_v49 = vmul.f32 -1.442695, %v8800_v47  ;;  %v8822_v47 = vld [vmem:[#allocation2 + $0x80] sm:$0xff] }
 0x89c   : > { %17382 = vpow2.f32 %v13615_v49 }
 0x8a6   : > { %v17383_v50 = vpop.eup %17382 }
 0x8a7   : > { %v8806_v51 = vadd.f32 1.0, %v17383_v50  ;;  %v8825_v50 = vld [vmem:[#allocation2 + $0x98] sm:$0xff] }
 0x8a9   : > { %17384 = vrcp.f32 %v8806_v51  ;;  %v8826_v51 = vld [vmem:[#allocation2 + $0xa0] sm:$0xff] }
 0x8b3   : > { %v17385_v40 = vpop.eup %17384 }
 0x8b4   : > { %v8848_v34 = vrot.slane %v17385_v40, %v8847_v63  ;;  %v8829_v63 = vld [vmem:[#allocation2 + $0xb8] sm:$0xff] }
 0x8b6   : > { %v8849_v22 = vmul.f32 %v8848_v34, %v19078_v10  ;;  %v8850_v30 = vmul.f32 %v8848_v34, %v19075_v8  ;;  %v8851_v1 = vmul.f32 %v8848_v34, %v19090_v26  ;;  %v8852_v6 = vmul.f32 %v8848_v34, %v19087_v48 }
 0x8b7   : > { %v8853_v2 = vmul.f32 %v8848_v34, %v19102_v23  ;;  %v8854_v4 = vmul.f32 %v8848_v34, %v19099_v25  ;;  %v8855_v62 = vmul.f32 %v8848_v34, %v19114_v31  ;;  %v8856_v9 = vmul.f32 %v8848_v34, %v19111_v27  ;;  %v8809_v27 = vld [vmem:[#allocation2 + $0x18] sm:$0xff]  ;;  %v8810_v31 = vld [vmem:[#allocation2 + $0x20] sm:$0xff] }
 0x8b8   : > { %v19306_v14 = vmul.f32 %v8848_v34, %v19126_v32  ;;  %v19309_v54 = vmul.f32 %v8848_v34, %v19123_v29  ;;  %v19312_v8 = vmul.f32 %v8848_v34, %v19138_v44  ;;  %v19315_v10 = vmul.f32 %v8848_v34, %v19135_v43  ;;  %v8811_v29 = vld [vmem:[#allocation2 + $0x28] sm:$0xff]  ;;  %v8812_v32 = vld [vmem:[#allocation2 + $0x30] sm:$0xff] }
 0x8b9   : > { %v19318_v48 = vmul.f32 %v8848_v34, %v19150_v60  ;;  %v19321_v26 = vmul.f32 %v8848_v34, %v19147_v28  ;;  %v19324_v25 = vmul.f32 %v8848_v34, %v19162_v59  ;;  %v19327_v23 = vmul.f32 %v8848_v34, %v19159_v56  ;;  %v8813_v59 = vld [vmem:[#allocation2 + $0x38] sm:$0xff]  ;;  %v8815_v56 = vld [vmem:[#allocation2 + $0x48] sm:$0xff] }
 0x8ba   : > { %v19330_v44 = vmul.f32 %v8848_v34, %v19174_v35  ;;  %v19333_v43 = vmul.f32 %v8848_v34, %v19171_v41  ;;  %v19336_v60 = vmul.f32 %v8848_v34, %v19186_v15  ;;  %v19339_v28 = vmul.f32 %v8848_v34, %v19183_v12  ;;  %v8817_v15 = vld [vmem:[#allocation2 + $0x58] sm:$0xff]  ;;  %v8819_v12 = vld [vmem:[#allocation2 + $0x68] sm:$0xff] }
 0x8bb   : > { %v19342_v61 = vmul.f32 %v8848_v34, %v19198_v57  ;;  %v19345_v7 = vmul.f32 %v8848_v34, %v19195_v52  ;;  %v19348_v35 = vmul.f32 %v8848_v34, %v19210_v3  ;;  %v19351_v41 = vmul.f32 %v8848_v34, %v19207_v0  ;;  %v8821_v3 = vld [vmem:[#allocation2 + $0x78] sm:$0xff]  ;;  %v8823_v0 = vld [vmem:[#allocation2 + $0x88] sm:$0xff] }
 0x8bc   : > { %v19354_v21 = vmul.f32 %v8848_v34, %v19222_v45  ;;  %v19357_v46 = vmul.f32 %v8848_v34, %v19219_v19  ;;  %v19360_v57 = vmul.f32 %v8848_v34, %v19234_v39  ;;  %v19363_v52 = vmul.f32 %v8848_v34, %v19231_v37  ;;  %v8824_v39 = vld [vmem:[#allocation2 + $0x90] sm:$0xff] }
 0x8bd   : > { %v19366_v24 = vmul.f32 %v8848_v34, %v19246_v16  ;;  %v19369_v49 = vmul.f32 %v8848_v34, %v19243_v11  ;;  %v19372_v45 = vmul.f32 %v8848_v34, %v19258_v36  ;;  %v19375_v19 = vmul.f32 %v8848_v34, %v19255_v17  ;;  %v8827_v36 = vld [vmem:[#allocation2 + $0xa8] sm:$0xff] }
 0x8be   : > { %20341 = vst [vmem:[#allocation5_spill] sm:$0xff] %v19360_v57  ;;  %20342 = vst [vmem:[#allocation6_spill] sm:$0xff] %v19363_v52  ;;  %v19378_v37 = vmul.f32 %v8848_v34, %v19270_v33  ;;  %v19381_v55 = vmul.f32 %v8848_v34, %v19267_v18  ;;  %v19384_v16 = vmul.f32 %v8848_v34, %v19282_v42  ;;  %v8832_v33 = vld [vmem:[#allocation2 + $0xd0] sm:$0xff]  ;;  %v8833_v57 = vld [vmem:[#allocation2 + $0xd8] sm:$0xff] }
 0x8bf   : > { %20343 = vst [vmem:[#allocation7_spill] sm:$0xff] %v19366_v24  ;;  %20344 = vst [vmem:[#allocation8_spill] sm:$0xff] %v19369_v49  ;;  %v19387_v11 = vmul.f32 %v8848_v34, %v19279_v38  ;;  %v8885_v17 = vadd.f32 %v8849_v22, %v8809_v27  ;;  %v8886_v40 = vadd.f32 %v8850_v30, %v8810_v31  ;;  %v8830_v49 = vld [vmem:[#allocation2 + $0xc0] sm:$0xff]  ;;  %v8831_v24 = vld [vmem:[#allocation2 + $0xc8] sm:$0xff] }
 0x8c0   : > { %20345 = vst [vmem:[#allocation9_spill] sm:$0xff] %v19372_v45  ;;  %20346 = vst [vmem:[#allocation10_spill] sm:$0xff] %v19375_v19  ;;  %v8887_v19 = vadd.f32 %v8851_v1, %v8811_v29  ;;  %v8888_v45 = vadd.f32 %v8852_v6, %v8812_v32  ;;  %v8890_v52 = vadd.f32 %v8854_v4, %v8814_v5  ;;  %v8834_v42 = vld [vmem:[#allocation2 + $0xe0] sm:$0xff]  ;;  %v8836_v30 = vld [vmem:[#allocation2 + $0xf0] sm:$0xff] }
 0x8c1   : > { %20347 = vst [vmem:[#allocation11_spill] sm:$0xff] %v19378_v37  ;;  %20348 = vst [vmem:[#allocation12_spill] sm:$0xff] %v19381_v55  ;;  %v8889_v37 = vadd.f32 %v8853_v2, %v8813_v59  ;;  %v8891_v18 = vadd.f32 %v8855_v62, %v8815_v56  ;;  %v8892_v55 = vadd.f32 %v8856_v9, %v8816_v20  ;;  %v8837_v1 = vld [vmem:[#allocation2 + $0xf8] sm:$0xff]  ;;  %v8838_v6 = vld [vmem:[#allocation2 + $0x100] sm:$0xff] }
 0x8c2   : > { %20349 = vst [vmem:[#allocation13_spill] sm:$0xff] %v19384_v16  ;;  %20350 = vst [vmem:[#allocation14_spill] sm:$0xff] %v19387_v11  ;;  %v8835_v16 = vld [vmem:[#allocation2 + $0xe8] sm:$0xff]  ;;  %v8893_v38 = vadd.f32 %v19306_v14, %v8817_v15  ;;  %v8894_v34 = vadd.f32 %v19309_v54, %v8818_v53  ;;  %v8895_v11 = vadd.f32 %v19312_v8, %v8819_v12  ;;  %v8840_v54 = vld [vmem:[#allocation2 + $0x110] sm:$0xff] }
 0x8c3   : > { %v8896_v22 = vadd.f32 %v19315_v10, %v8820_v13  ;;  %8921 = vst.msk [vmem:[#allocation2 + $0x18] sm:$0xff] %vm720_vm1, %v8885_v17  ;;  %8922 = vst.msk [vmem:[#allocation2 + $0x20] sm:$0xff] %vm720_vm1, %v8886_v40  ;;  %v8897_v2 = vadd.f32 %v19318_v48, %v8821_v3  ;;  %v8898_v4 = vadd.f32 %v19321_v26, %v8822_v47  ;;  %v8839_v14 = vld [vmem:[#allocation2 + $0x108] sm:$0xff]  ;;  %v8841_v8 = vld [vmem:[#allocation2 + $0x118] sm:$0xff] }
 0x8c4   : > { %8923 = vst.msk [vmem:[#allocation2 + $0x28] sm:$0xff] %vm720_vm1, %v8887_v19  ;;  %8924 = vst.msk [vmem:[#allocation2 + $0x30] sm:$0xff] %vm720_vm1, %v8888_v45  ;;  %v8899_v62 = vadd.f32 %v19324_v25, %v8823_v0  ;;  %v8900_v9 = vadd.f32 %v19327_v23, %v8824_v39  ;;  %v8901_v10 = vadd.f32 %v19330_v44, %v8825_v50  ;;  %v8842_v23 = vld [vmem:[#allocation2 + $0x120] sm:$0xff]  ;;  %v8843_v27 = vld [vmem:[#allocation2 + $0x128] sm:$0xff] }
 0x8c5   : > { %8925 = vst.msk [vmem:[#allocation2 + $0x38] sm:$0xff] %vm720_vm1, %v8889_v37  ;;  %8926 = vst.msk [vmem:[#allocation2 + $0x40] sm:$0xff] %vm720_vm1, %v8890_v52  ;;  %v8902_v48 = vadd.f32 %v19333_v43, %v8826_v51  ;;  %v8903_v26 = vadd.f32 %v19336_v60, %v8827_v36  ;;  %v8904_v25 = vadd.f32 %v19339_v28, %v8828_v58  ;;  %v8844_v31 = vld [vmem:[#allocation2 + $0x130] sm:$0xff]  ;;  %v20351_v59 = vld [vmem:[#allocation5_spill] sm:$0xff] }
 0x8c6   : > { %8927 = vst.msk [vmem:[#allocation2 + $0x48] sm:$0xff] %vm720_vm1, %v8891_v18  ;;  %8928 = vst.msk [vmem:[#allocation2 + $0x50] sm:$0xff] %vm720_vm1, %v8892_v55  ;;  %v8905_v29 = vadd.f32 %v19342_v61, %v8829_v63  ;;  %v8906_v32 = vadd.f32 %v19345_v7, %v8830_v49  ;;  %v8907_v44 = vadd.f32 %v19348_v35, %v8831_v24  ;;  %v20352_v56 = vld [vmem:[#allocation6_spill] sm:$0xff]  ;;  %v20353_v61 = vld [vmem:[#allocation7_spill] sm:$0xff] }
 0x8c7   : > { %8929 = vst.msk [vmem:[#allocation2 + $0x58] sm:$0xff] %vm720_vm1, %v8893_v38  ;;  %8930 = vst.msk [vmem:[#allocation2 + $0x60] sm:$0xff] %vm720_vm1, %v8894_v34  ;;  %v8908_v43 = vadd.f32 %v19351_v41, %v8832_v33  ;;  %v8909_v60 = vadd.f32 %v19354_v21, %v8833_v57  ;;  %v8910_v28 = vadd.f32 %v19357_v46, %v8834_v42  ;;  %v20354_v35 = vld [vmem:[#allocation8_spill] sm:$0xff]  ;;  %v20355_v15 = vld [vmem:[#allocation9_spill] sm:$0xff] }
 0x8c8   : > { %8931 = vst.msk [vmem:[#allocation2 + $0x68] sm:$0xff] %vm720_vm1, %v8895_v11  ;;  %8932 = vst.msk [vmem:[#allocation2 + $0x70] sm:$0xff] %vm720_vm1, %v8896_v22  ;;  %v8911_v5 = vadd.f32 %v20351_v59, %v8835_v16  ;;  %v8912_v20 = vadd.f32 %v20352_v56, %v8836_v30  ;;  %v8913_v7 = vadd.f32 %v20353_v61, %v8837_v1  ;;  %v20356_v12 = vld [vmem:[#allocation10_spill] sm:$0xff]  ;;  %v20357_v21 = vld [vmem:[#allocation11_spill] sm:$0xff] }
 0x8c9   : > { %8933 = vst.msk [vmem:[#allocation2 + $0x78] sm:$0xff] %vm720_vm1, %v8897_v2  ;;  %8934 = vst.msk [vmem:[#allocation2 + $0x80] sm:$0xff] %vm720_vm1, %v8898_v4  ;;  %v8914_v41 = vadd.f32 %v20354_v35, %v8838_v6  ;;  %v8915_v53 = vadd.f32 %v20355_v15, %v8839_v14  ;;  %v8916_v13 = vadd.f32 %v20356_v12, %v8840_v54  ;;  %v20358_v57 = vld [vmem:[#allocation12_spill] sm:$0xff]  ;;  %v20359_v3 = vld [vmem:[#allocation13_spill] sm:$0xff] }
 0x8ca   : > { %8935 = vst.msk [vmem:[#allocation2 + $0x88] sm:$0xff] %vm720_vm1, %v8899_v62  ;;  %8936 = vst.msk [vmem:[#allocation2 + $0x90] sm:$0xff] %vm720_vm1, %v8900_v9  ;;  %v8917_v46 = vadd.f32 %v20357_v21, %v8841_v8  ;;  %v8918_v52 = vadd.f32 %v20358_v57, %v8842_v23  ;;  %v8919_v47 = vadd.f32 %v20359_v3, %v8843_v27  ;;  %v20360_v0 = vld [vmem:[#allocation14_spill] sm:$0xff]  ;;  %v19460_v45 = vld [vmem:[%s20297_s10 + $0x20] sm:$0xff] (!%p13616_p7) }
 0x8cb   : > { %8937 = vst.msk [vmem:[#allocation2 + $0x98] sm:$0xff] %vm720_vm1, %v8901_v10  ;;  %8938 = vst.msk [vmem:[#allocation2 + $0xa0] sm:$0xff] %vm720_vm1, %v8902_v48  ;;  %v8920_v24 = vadd.f32 %v20360_v0, %v8844_v31  ;;  %v8962_v49 = vld [vmem:[%s20297_s10 + $0x8] sm:$0xff] (!%p13616_p7)  ;;  %16189 = vmatprep.subr.mxu0 (!%p13616_p7), %v19460_v45  ;;  %v10599_v39 = vld [vmem:[#allocation2 + $0x18] sm:$0xff] (!%p13616_p7) }
 0x8cc   : > { %8939 = vst.msk [vmem:[#allocation2 + $0xa8] sm:$0xff] %vm720_vm1, %v8903_v26  ;;  %8940 = vst.msk [vmem:[#allocation2 + $0xb0] sm:$0xff] %vm720_vm1, %v8904_v25  ;;  %v9007_v19 = vld [vmem:[#allocation2 + $0x6] sm:$0xff] (!%p13616_p7)  ;;  %15965 = vmatprep.subr.mxu1 (!%p13616_p7), %v8962_v49  ;;  %v9008_v50 = vld [vmem:[#allocation2 + $0xe] sm:$0xff] (!%p13616_p7)  ;;  %16190 = vmatpush3.msra.mxu0 (!%p13616_p7), %v19460_v45 }
 0x8cd   : > { %8941 = vst.msk [vmem:[#allocation2 + $0xb8] sm:$0xff] %vm720_vm1, %v8905_v29  ;;  %8942 = vst.msk [vmem:[#allocation2 + $0xc0] sm:$0xff] %vm720_vm1, %v8906_v32  ;;  %v8961_v51 = vld [vmem:[%s20297_s10] sm:$0xff] (!%p13616_p7)  ;;  %15966 = vmatpush3.msra.mxu1 (!%p13616_p7), %v8962_v49  ;;  %15967 = vmatprep.mubr.msk.f32.mxu1 (!%p13616_p7), %vm720_vm1, %v9007_v19  ;;  %v8966_v55 = vld [vmem:[%s20297_s10 + $0x28] sm:$0xff] (!%p13616_p7) }
 0x8ce   : > { %8943 = vst.msk [vmem:[#allocation2 + $0xc8] sm:$0xff] %vm720_vm1, %v8907_v44  ;;  %8944 = vst.msk [vmem:[#allocation2 + $0xd0] sm:$0xff] %vm720_vm1, %v8908_v43  ;;  %8960 = sbr.rel (%p13616_p7) target bundleno = 2795 (0xaeb), region = 76  ;;  %v10600_v37 = vld [vmem:[#allocation2 + $0x20] sm:$0xff] (!%p13616_p7)  ;;  %16191 = vmatprep.mubr.msk.f32.mxu0 (!%p13616_p7), %vm720_vm1, %v10599_v39  ;;  %15968 = vmatmul.mubr.msk.f32.vlgmr.msra.gmra.mrb[0].mxu1 (!%p13616_p7), %vm720_vm1, %v9008_v50  ;;  %v9009_v16 = vld [vmem:[#allocation2 + $0x16] sm:$0xff] (!%p13616_p7) }
 0x8cf   : > { %8945 = vst.msk [vmem:[#allocation2 + $0xd8] sm:$0xff] %vm720_vm1, %v8909_v60  ;;  %8946 = vst.msk [vmem:[#allocation2 + $0xe0] sm:$0xff] %vm720_vm1, %v8910_v28  ;;  %16021 = vmatprep.subr.mxu1 (!%p13616_p7), %v8961_v51  ;;  %v10601_v11 = vld [vmem:[#allocation2 + $0x28] sm:$0xff] (!%p13616_p7)  ;;  %16192 = vmatmul.mubr.msk.f32.vlgmr.msra.gmra.mrb[0].mxu0 (!%p13616_p7), %vm720_vm1, %v10600_v37  ;;  %v9010_v36 = vld [vmem:[#allocation2 + $0x1e] sm:$0xff] (!%p13616_p7) }
 0x8d0   : > { %8947 = vst.msk [vmem:[#allocation2 + $0xe8] sm:$0xff] %vm720_vm1, %v8911_v5  ;;  %8948 = vst.msk [vmem:[#allocation2 + $0xf0] sm:$0xff] %vm720_vm1, %v8912_v20  ;;  %16245 = vmatprep.subr.mxu0 (!%p13616_p7), %v8966_v55  ;;  %16022 = vmatpush3.msra.mxu1 (!%p13616_p7), %v8961_v51  ;;  %v10602_v58 = vld [vmem:[#allocation2 + $0x30] sm:$0xff] (!%p13616_p7)  ;;  %v9011_v63 = vld [vmem:[#allocation2 + $0x26] sm:$0xff] (!%p13616_p7) }
 0x8d1   : > { %8949 = vst.msk [vmem:[#allocation2 + $0xf8] sm:$0xff] %vm720_vm1, %v8913_v7  ;;  %8950 = vst.msk [vmem:[#allocation2 + $0x100] sm:$0xff] %vm720_vm1, %v8914_v41  ;;  %16246 = vmatpush3.msra.mxu0 (!%p13616_p7), %v8966_v55  ;;  %15970 = vmatprep.mubr.msk.f32.mxu1 (!%p13616_p7), %vm720_vm1, %v9009_v16  ;;  %v10603_v17 = vld [vmem:[#allocation2 + $0x38] sm:$0xff] (!%p13616_p7)  ;;  %v9012_v40 = vld [vmem:[#allocation2 + $0x2e] sm:$0xff] (!%p13616_p7) }
 0x8d2   : > { %8951 = vst.msk [vmem:[#allocation2 + $0x108] sm:$0xff] %vm720_vm1, %v8915_v53  ;;  %8952 = vst.msk [vmem:[#allocation2 + $0x110] sm:$0xff] %vm720_vm1, %v8916_v13  ;;  %16194 = vmatprep.mubr.msk.f32.mxu0 (!%p13616_p7), %vm720_vm1, %v10601_v11  ;;  %15971 = vmatmul.mubr.msk.f32.gmra.mrb[2].mxu1 (!%p13616_p7), %vm720_vm1, %v9010_v36  ;;  %v10604_v33 = vld [vmem:[#allocation2 + $0x40] sm:$0xff] (!%p13616_p7)  ;;  %v9013_v18 = vld [vmem:[#allocation2 + $0x36] sm:$0xff] (!%p13616_p7) }
 0x8d3   : > { %8953 = vst.msk [vmem:[#allocation2 + $0x118] sm:$0xff] %vm720_vm1, %v8917_v46  ;;  %8954 = vst.msk [vmem:[#allocation2 + $0x120] sm:$0xff] %vm720_vm1, %v8918_v52  ;;  %16195 = vmatmul.mubr.msk.f32.gmra.mrb[2].mxu0 (!%p13616_p7), %vm720_vm1, %v10602_v58  ;;  %15973 = vmatprep.mubr.msk.f32.mxu1 (!%p13616_p7), %vm720_vm1, %v9011_v63  ;;  %v10605_v42 = vld [vmem:[#allocation2 + $0x48] sm:$0xff] (!%p13616_p7)  ;;  %v9014_v38 = vld [vmem:[#allocation2 + $0x3e] sm:$0xff] (!%p13616_p7) }
 0x8d4   : > { %8955 = vst.msk [vmem:[#allocation2 + $0x128] sm:$0xff] %vm720_vm1, %v8919_v47  ;;  %8956 = vst.msk [vmem:[#allocation2 + $0x130] sm:$0xff] %vm720_vm1, %v8920_v24  ;;  %16197 = vmatprep.mubr.msk.f32.mxu0 (!%p13616_p7), %vm720_vm1, %v10603_v17  ;;  %v10606_v34 = vld [vmem:[#allocation2 + $0x50] sm:$0xff] (!%p13616_p7)  ;;  %v9015_v22 = vld [vmem:[#allocation2 + $0x46] sm:$0xff] (!%p13616_p7) }
 0x8d5   : > { %v8967_v30 = vld [vmem:[%s20297_s10 + $0x30] sm:$0xff]  ;;  %v10607_v1 = vld [vmem:[#allocation2 + $0x58] sm:$0xff]  ;;  %v10608_v2 = vld [vmem:[#allocation2 + $0x60] sm:$0xff] }
 0x8d6   : > { %15974 = vmatmul.mubr.msk.f32.gmra.mrb[4].mxu1 %vm720_vm1, %v9012_v40  ;;  %16301 = vmatprep.subr.mxu0 %v8967_v30  ;;  %v9016_v6 = vld [vmem:[#allocation2 + $0x4e] sm:$0xff]  ;;  %v9017_v4 = vld [vmem:[#allocation2 + $0x56] sm:$0xff]  ;;  %v9018_v9 = vld [vmem:[#allocation2 + $0x5e] sm:$0xff] }
 0x8d7   : > { %16198 = vmatmul.mubr.msk.f32.gmra.mrb[4].mxu0 %vm720_vm1, %v10604_v33  ;;  %15976 = vmatprep.mubr.msk.f32.mxu1 %vm720_vm1, %v9013_v18  ;;  %v10609_v62 = vld [vmem:[#allocation2 + $0x68] sm:$0xff]  ;;  %v10610_v14 = vld [vmem:[#allocation2 + $0x70] sm:$0xff]  ;;  %v10611_v8 = vld [vmem:[#allocation2 + $0x78] sm:$0xff] }
 0x8d8   : > { %16200 = vmatprep.mubr.msk.f32.mxu0 %vm720_vm1, %v10605_v42  ;;  %v9019_v54 = vld [vmem:[#allocation2 + $0x66] sm:$0xff]  ;;  %v9020_v10 = vld [vmem:[#allocation2 + $0x6e] sm:$0xff]  ;;  %v9021_v26 = vld [vmem:[#allocation2 + $0x76] sm:$0xff] }
 0x8d9   : > { %v10612_v48 = vld [vmem:[#allocation2 + $0x80] sm:$0xff]  ;;  %v19502_v25 = vld [vmem:[%s20297_s10 + $0x10] sm:$0xff]  ;;  %v10613_v23 = vld [vmem:[#allocation2 + $0x88] sm:$0xff] }
 0x8da   : > { %15977 = vmatmul.mubr.msk.f32.gmra.mrb[6].mxu1 %vm720_vm1, %v9014_v38  ;;  %16077 = vmatprep.subr.mxu1 %v19502_v25  ;;  %v9022_v27 = vld [vmem:[#allocation2 + $0x7e] sm:$0xff]  ;;  %v10614_v31 = vld [vmem:[#allocation2 + $0x90] sm:$0xff]  ;;  %v9023_v29 = vld [vmem:[#allocation2 + $0x86] sm:$0xff] }
 0x8db   : > { %16201 = vmatmul.mubr.msk.f32.gmra.mrb[6].mxu0 %vm720_vm1, %v10606_v34  ;;  %15979 = vmatprep.mubr.msk.f32.mxu1 %vm720_vm1, %v9015_v22  ;;  %v10615_v32 = vld [vmem:[#allocation2 + $0x98] sm:$0xff]  ;;  %v9024_v44 = vld [vmem:[#allocation2 + $0x8e] sm:$0xff]  ;;  %v10616_v43 = vld [vmem:[#allocation2 + $0xa0] sm:$0xff] }
 0x8dc   : > { %16203 = vmatprep.mubr.msk.f32.mxu0 %vm720_vm1, %v10607_v1  ;;  %v9025_v60 = vld [vmem:[#allocation2 + $0x96] sm:$0xff]  ;;  %v9026_v59 = vld [vmem:[#allocation2 + $0x9e] sm:$0xff]  ;;  %v9027_v56 = vld [vmem:[#allocation2 + $0xa6] sm:$0xff] }
 0x8dd   : > { %v11024_v28 = vld [vmem:[#allocation2 + $0x19] sm:$0xff]  ;;  %v11025_v5 = vld [vmem:[#allocation2 + $0x21] sm:$0xff]  ;;  %v19517_v20 = vld [vmem:[#allocation2 + $0x29] sm:$0xff] }
 0x8de   : > { %15980 = vmatmul.mubr.msk.f32.gmra.mrb[8].mxu1 %vm720_vm1, %v9016_v6  ;;  %v19523_v61 = vld [vmem:[%s20297_s10 + $0x38] sm:$0xff]  ;;  %v9028_v7 = vld [vmem:[#allocation2 + $0xae] sm:$0xff]  ;;  %v19540_v12 = vld [vmem:[#allocation2 + $0x41] sm:$0xff] }
 0x8df   : > { %16204 = vmatmul.mubr.msk.f32.gmra.mrb[8].mxu0 %vm720_vm1, %v10608_v2  ;;  %15982 = vmatprep.mubr.msk.f32.mxu1 %vm720_vm1, %v9017_v4  ;;  %v19529_v35 = vld [vmem:[#allocation2 + $0x31] sm:$0xff]  ;;  %v19531_v15 = vld [vmem:[#allocation2 + $0x39] sm:$0xff]  ;;  %v9031_v13 = vld [vmem:[#allocation2 + $0xc6] sm:$0xff] }
 0x8e0   : > { %16206 = vmatprep.mubr.msk.f32.mxu0 %vm720_vm1, %v10609_v62  ;;  %v9029_v41 = vld [vmem:[#allocation2 + $0xb6] sm:$0xff]  ;;  %v9030_v53 = vld [vmem:[#allocation2 + $0xbe] sm:$0xff]  ;;  %v19542_v21 = vld [vmem:[#allocation2 + $0x49] sm:$0xff] }
 0x8e1   : > { %v9032_v46 = vld [vmem:[#allocation2 + $0xce] sm:$0xff]  ;;  %v9033_v52 = vld [vmem:[#allocation2 + $0xd6] sm:$0xff]  ;;  %v9034_v47 = vld [vmem:[#allocation2 + $0xde] sm:$0xff] }
 0x8e2   : > { %15983 = vmatmul.mubr.msk.f32.gmra.mrb[10].mxu1 %vm720_vm1, %v9018_v9  ;;  %v19550_v57 = vld [vmem:[#allocation2 + $0x51] sm:$0xff]  ;;  %v19552_v3 = vld [vmem:[#allocation2 + $0x59] sm:$0xff]  ;;  %v19560_v0 = vld [vmem:[#allocation2 + $0x61] sm:$0xff] }
 0x8e3   : > { %16207 = vmatmul.mubr.msk.f32.gmra.mrb[10].mxu0 %vm720_vm1, %v10610_v14  ;;  %15985 = vmatprep.mubr.msk.f32.mxu1 %vm720_vm1, %v9019_v54  ;;  %v9035_v24 = vld [vmem:[#allocation2 + $0xe6] sm:$0xff]  ;;  %v9036_v19 = vld [vmem:[#allocation2 + $0xee] sm:$0xff]  ;;  %v9037_v50 = vld [vmem:[#allocation2 + $0xf6] sm:$0xff] }
 0x8e4   : > { %16209 = vmatprep.mubr.msk.f32.mxu0 %vm720_vm1, %v10611_v8  ;;  %v19562_v49 = vld [vmem:[#allocation2 + $0x69] sm:$0xff]  ;;  %v19570_v39 = vld [vmem:[#allocation2 + $0x71] sm:$0xff]  ;;  %v19572_v51 = vld [vmem:[#allocation2 + $0x79] sm:$0xff] }
 0x8e5   : > { %v9038_v37 = vld [vmem:[#allocation2 + $0xfe] sm:$0xff]  ;;  %v9039_v16 = vld [vmem:[#allocation2 + $0x106] sm:$0xff]  ;;  %v9040_v36 = vld [vmem:[#allocation2 + $0x10e] sm:$0xff] }
 0x8e6   : > { %15986 = vmatmul.mubr.msk.f32.gmra.mrb[12].mxu1 %vm720_vm1, %v9020_v10  ;;  %v19580_v55 = vld [vmem:[#allocation2 + $0x81] sm:$0xff]  ;;  %v19582_v11 = vld [vmem:[#allocation2 + $0x89] sm:$0xff]  ;;  %v19590_v58 = vld [vmem:[#allocation2 + $0x91] sm:$0xff] }
 0x8e7   : > { %16210 = vmatmul.mubr.msk.f32.gmra.mrb[12].mxu0 %vm720_vm1, %v10612_v48  ;;  %15988 = vmatprep.mubr.msk.f32.mxu1 %vm720_vm1, %v9021_v26  ;;  %v9041_v63 = vld [vmem:[#allocation2 + $0x116] sm:$0xff]  ;;  %v9042_v40 = vld [vmem:[#allocation2 + $0x11e] sm:$0xff]  ;;  %v19602_v42 = vld [vmem:[#allocation2 + $0xa9] sm:$0xff] }
 0x8e8   : > { %16212 = vmatprep.mubr.msk.f32.mxu0 %vm720_vm1, %v10613_v23  ;;  %v19592_v17 = vld [vmem:[#allocation2 + $0x99] sm:$0xff]  ;;  %v19600_v33 = vld [vmem:[#allocation2 + $0xa1] sm:$0xff]  ;;  %v8972_v38 = vld [vmem:[#allocation2 + $0xd] sm:$0xff] }
 0x8e9   : > { %v8971_v18 = vld [vmem:[#allocation2 + $0x5] sm:$0xff]  ;;  %v19610_v34 = vld [vmem:[#allocation2 + $0xb1] sm:$0xff]  ;;  %v8974_v6 = vld [vmem:[#allocation2 + $0x1d] sm:$0xff] }
 0x8ea   : > { %15989 = vmatmul.mubr.msk.f32.gmra.mrb[14].mxu1 %vm720_vm1, %v9022_v27  ;;  %v8973_v22 = vld [vmem:[#allocation2 + $0x15] sm:$0xff]  ;;  %v19626_v2 = vld [vmem:[#allocation2 + $0xc1] sm:$0xff]  ;;  %v19628_v62 = vld [vmem:[#allocation2 + $0xc9] sm:$0xff] }
 0x8eb   : > { %16213 = vmatmul.mubr.msk.f32.gmra.mrb[14].mxu0 %vm720_vm1, %v10614_v31  ;;  %15991 = vmatprep.mubr.msk.f32.mxu1 %vm720_vm1, %v9023_v29  ;;  %v19618_v1 = vld [vmem:[%s20297_s10 + $0x18] sm:$0xff]  ;;  %v8975_v4 = vld [vmem:[#allocation2 + $0x25] sm:$0xff]  ;;  %v8976_v9 = vld [vmem:[#allocation2 + $0x2d] sm:$0xff] }
 0x8ec   : > { %16215 = vmatprep.mubr.msk.f32.mxu0 %vm720_vm1, %v10615_v32  ;;  %v19637_v14 = vld [vmem:[#allocation2 + $0xd1] sm:$0xff]  ;;  %v19639_v8 = vld [vmem:[#allocation2 + $0xd9] sm:$0xff]  ;;  %v19647_v48 = vld [vmem:[#allocation2 + $0xe1] sm:$0xff] }
 0x8ed   : > { %v8977_v54 = vld [vmem:[#allocation2 + $0x35] sm:$0xff]  ;;  %v8978_v10 = vld [vmem:[#allocation2 + $0x3d] sm:$0xff]  ;;  %v8979_v26 = vld [vmem:[#allocation2 + $0x45] sm:$0xff] }
 0x8ee   : > { %15992 = vmatmul.mubr.msk.f32.gmra.mrb[16].mxu1 %vm720_vm1, %v9024_v44  ;;  %v8980_v23 = vld [vmem:[#allocation2 + $0x4d] sm:$0xff]  ;;  %v8981_v31 = vld [vmem:[#allocation2 + $0x55] sm:$0xff]  ;;  %v8982_v32 = vld [vmem:[#allocation2 + $0x5d] sm:$0xff] }
 0x8ef   : > { %16216 = vmatmul.mubr.msk.f32.gmra.mrb[16].mxu0 %vm720_vm1, %v10616_v43  ;;  %15994 = vmatprep.mubr.msk.f32.mxu1 %vm720_vm1, %v9025_v60  ;;  %v19657_v27 = vld [vmem:[#allocation2 + $0xf1] sm:$0xff]  ;;  %v19659_v29 = vld [vmem:[#allocation2 + $0xf9] sm:$0xff]  ;;  %v19667_v44 = vld [vmem:[#allocation2 + $0x101] sm:$0xff] }
 0x8f0   : > { %16247 = vmatprep.mubr.msk.f32.mxu0 %vm720_vm1, %v11024_v28  ;;  %v8983_v43 = vld [vmem:[#allocation2 + $0x65] sm:$0xff]  ;;  %v8984_v28 = vld [vmem:[#allocation2 + $0x6d] sm:$0xff] }
 0x8f1   : > { %v19669_v60 = vld [vmem:[#allocation2 + $0x109] sm:$0xff] }
 0x8f2   : > { %15995 = vmatmul.mubr.msk.f32.gmra.mrb[18].mxu1 %vm720_vm1, %v9026_v59  ;;  %v19677_v59 = vld [vmem:[#allocation2 + $0x111] sm:$0xff] }
 0x8f3   : > { %16248 = vmatmul.mubr.msk.f32.vlgmr.msra.gmra.mrb[0].mxu0 %vm720_vm1, %v11025_v5  ;;  %15997 = vmatprep.mubr.msk.f32.mxu1 %vm720_vm1, %v9027_v56  ;;  %v8985_v5 = vld [vmem:[#allocation2 + $0x75] sm:$0xff] }
 0x8f4   : > { %16302 = vmatpush3.msra.mxu0 %v8967_v30  ;;  %16250 = vmatprep.mubr.msk.f32.mxu0 %vm720_vm1, %v19517_v20  ;;  %v19612_v30 = vld [vmem:[#allocation2 + $0xb9] sm:$0xff] }
 0x8f5   : > { %16357 = vmatprep.subr.mxu0 %v19523_v61  ;;  %v19679_v56 = vld [vmem:[#allocation2 + $0x119] sm:$0xff] }
 0x8f6   : > { %15998 = vmatmul.mubr.msk.f32.gmra.mrb[20].mxu1 %vm720_vm1, %v9028_v7  ;;  %v8986_v7 = vld [vmem:[#allocation2 + $0x7d] sm:$0xff] }
 0x8f7   : > { %16251 = vmatmul.mubr.msk.f32.gmra.mrb[2].mxu0 %vm720_vm1, %v19529_v35  ;;  %16000 = vmatprep.mubr.msk.f32.mxu1 %vm720_vm1, %v9029_v41  ;;  %v19687_v41 = vld [vmem:[#allocation2 + $0x121] sm:$0xff] }
 0x8f8   : > { %16253 = vmatprep.mubr.msk.f32.mxu0 %vm720_vm1, %v19531_v15 }
 0x8fa   : > { %16001 = vmatmul.mubr.msk.f32.gmra.mrb[22].mxu1 %vm720_vm1, %v9030_v53  ;;  %v8987_v53 = vld [vmem:[#allocation2 + $0x85] sm:$0xff] }
 0x8fb   : > { %16254 = vmatmul.mubr.msk.f32.gmra.mrb[4].mxu0 %vm720_vm1, %v19540_v12  ;;  %16003 = vmatprep.mubr.msk.f32.mxu1 %vm720_vm1, %v9031_v13  ;;  %v19689_v13 = vld [vmem:[#allocation2 + $0x129] sm:$0xff] }
 0x8fc   : > { %16256 = vmatprep.mubr.msk.f32.mxu0 %vm720_vm1, %v19542_v21 }
 0x8fe   : > { %16004 = vmatmul.mubr.msk.f32.gmra.mrb[24].mxu1 %vm720_vm1, %v9032_v46  ;;  %v8988_v46 = vld [vmem:[#allocation2 + $0x8d] sm:$0xff] }
 0x8ff   : > { %16257 = vmatmul.mubr.msk.f32.gmra.mrb[6].mxu0 %vm720_vm1, %v19550_v57  ;;  %16006 = vmatprep.mubr.msk.f32.mxu1 %vm720_vm1, %v9033_v52  ;;  %v19697_v52 = vld [vmem:[#allocation2 + $0x131] sm:$0xff] }
 0x900   : > { %16259 = vmatprep.mubr.msk.f32.mxu0 %vm720_vm1, %v19552_v3 }
 0x902   : > { %16007 = vmatmul.mubr.msk.f32.gmra.mrb[26].mxu1 %vm720_vm1, %v9034_v47  ;;  %v8989_v47 = vld [vmem:[#allocation2 + $0x95] sm:$0xff] }
 0x903   : > { %16260 = vmatmul.mubr.msk.f32.gmra.mrb[8].mxu0 %vm720_vm1, %v19560_v0  ;;  %16009 = vmatprep.mubr.msk.f32.mxu1 %vm720_vm1, %v9035_v24  ;;  %v8990_v24 = vld [vmem:[#allocation2 + $0x9d] sm:$0xff] }
 0x904   : > { %16262 = vmatprep.mubr.msk.f32.mxu0 %vm720_vm1, %v19562_v49 }
 0x906   : > { %16010 = vmatmul.mubr.msk.f32.gmra.mrb[28].mxu1 %vm720_vm1, %v9036_v19  ;;  %v8991_v19 = vld [vmem:[#allocation2 + $0xa5] sm:$0xff] }
 0x907   : > { %16263 = vmatmul.mubr.msk.f32.gmra.mrb[10].mxu0 %vm720_vm1, %v19570_v39  ;;  %16012 = vmatprep.mubr.msk.f32.mxu1 %vm720_vm1, %v9037_v50  ;;  %v19709_v50 = vld [vmem:[%s20297_s10 + $0x40] sm:$0xff] }
 0x908   : > { %16265 = vmatprep.mubr.msk.f32.mxu0 %vm720_vm1, %v19572_v51 }
 0x90a   : > { %16013 = vmatmul.mubr.msk.f32.gmra.mrb[30].mxu1 %vm720_vm1, %v9038_v37  ;;  %v8992_v37 = vld [vmem:[#allocation2 + $0xad] sm:$0xff] }
 0x90b   : > { %16266 = vmatmul.mubr.msk.f32.gmra.mrb[12].mxu0 %vm720_vm1, %v19580_v55  ;;  %16015 = vmatprep.mubr.msk.f32.mxu1 %vm720_vm1, %v9039_v16  ;;  %v8994_v16 = vld [vmem:[#allocation2 + $0xbd] sm:$0xff] }
 0x90c   : > { %16268 = vmatprep.mubr.msk.f32.mxu0 %vm720_vm1, %v19582_v11 }
 0x90e   : > { %16016 = vmatmul.mubr.msk.f32.gmra.mrb[32].mxu1 %vm720_vm1, %v9040_v36  ;;  %v9750_v36 = vld [vmem:[#allocation2 + $0xf] sm:$0xff] }
 0x90f   : > { %16269 = vmatmul.mubr.msk.f32.gmra.mrb[14].mxu0 %vm720_vm1, %v19590_v58  ;;  %16018 = vmatprep.mubr.msk.f32.mxu1 %vm720_vm1, %v9041_v63  ;;  %v19772_v63 = vld [vmem:[#allocation2 + $0x1f] sm:$0xff] }
 0x910   : > { %16271 = vmatprep.mubr.msk.f32.mxu0 %vm720_vm1, %v19592_v17 }
 0x912   : > { %16019 = vmatmul.mubr.msk.f32.gmra.mrb[34].mxu1 %vm720_vm1, %v9042_v40  ;;  %v19787_v40 = vld [vmem:[#allocation2 + $0x2f] sm:$0xff] }
 0x913   : > { %16272 = vmatmul.mubr.msk.f32.gmra.mrb[16].mxu0 %vm720_vm1, %v19600_v33  ;;  %16023 = vmatprep.mubr.msk.f32.mxu1 %vm720_vm1, %v8971_v18  ;;  %v19799_v18 = vld [vmem:[#allocation2 + $0x3f] sm:$0xff] }
 0x914   : > { %16274 = vmatprep.mubr.msk.f32.mxu0 %vm720_vm1, %v19602_v42 }
 0x916   : > { %16024 = vmatmul.mubr.msk.f32.vlgmr.msra.gmra.mrb[0].mxu1 %vm720_vm1, %v8972_v38  ;;  %v19811_v38 = vld [vmem:[#allocation2 + $0x4f] sm:$0xff] }
 0x917   : > { %16275 = vmatmul.mubr.msk.f32.gmra.mrb[18].mxu0 %vm720_vm1, %v19610_v34  ;;  %16078 = vmatpush3.msra.mxu1 %v19502_v25  ;;  %v19649_v25 = vld [vmem:[#allocation2 + $0xe9] sm:$0xff] }
 0x918   : > { %16026 = vmatprep.mubr.msk.f32.mxu1 %vm720_vm1, %v8973_v22  ;;  %16277 = vmatprep.mubr.msk.f32.mxu0 %vm720_vm1, %v19612_v30  ;;  %v19823_v22 = vld [vmem:[#allocation2 + $0x5f] sm:$0xff] }
 0x919   : > { %16133 = vmatprep.subr.mxu1 %v19618_v1 }
 0x91a   : > { %16027 = vmatmul.mubr.msk.f32.gmra.mrb[2].mxu1 %vm720_vm1, %v8974_v6  ;;  %v19839_v6 = vld [vmem:[#allocation2 + $0x77] sm:$0xff] }
 0x91b   : > { %16278 = vmatmul.mubr.msk.f32.gmra.mrb[20].mxu0 %vm720_vm1, %v19626_v2  ;;  %16029 = vmatprep.mubr.msk.f32.mxu1 %vm720_vm1, %v8975_v4  ;;  %v19851_v4 = vld [vmem:[#allocation2 + $0x87] sm:$0xff] }
 0x91c   : > { %16280 = vmatprep.mubr.msk.f32.mxu0 %vm720_vm1, %v19628_v62 }
 0x91e   : > { %16030 = vmatmul.mubr.msk.f32.gmra.mrb[4].mxu1 %vm720_vm1, %v8976_v9  ;;  %v19859_v9 = vld [vmem:[#allocation2 + $0x8f] sm:$0xff] }
 0x91f   : > { %16281 = vmatmul.mubr.msk.f32.gmra.mrb[22].mxu0 %vm720_vm1, %v19637_v14  ;;  %16032 = vmatprep.mubr.msk.f32.mxu1 %vm720_vm1, %v8977_v54  ;;  %v19862_v54 = vld [vmem:[#allocation2 + $0x97] sm:$0xff] }
 0x920   : > { %16283 = vmatprep.mubr.msk.f32.mxu0 %vm720_vm1, %v19639_v8 }
 0x922   : > { %16033 = vmatmul.mubr.msk.f32.gmra.mrb[6].mxu1 %vm720_vm1, %v8978_v10  ;;  %v19869_v10 = vld [vmem:[#allocation2 + $0x9f] sm:$0xff] }
 0x923   : > { %16284 = vmatmul.mubr.msk.f32.gmra.mrb[24].mxu0 %vm720_vm1, %v19647_v48  ;;  %16035 = vmatprep.mubr.msk.f32.mxu1 %vm720_vm1, %v8979_v26  ;;  %v19872_v26 = vld [vmem:[#allocation2 + $0xa7] sm:$0xff] }
 0x924   : > { %16286 = vmatprep.mubr.msk.f32.mxu0 %vm720_vm1, %v19649_v25 }
 0x926   : > { %16036 = vmatmul.mubr.msk.f32.gmra.mrb[8].mxu1 %vm720_vm1, %v8980_v23  ;;  %v19879_v23 = vld [vmem:[#allocation2 + $0xaf] sm:$0xff] }
 0x927   : > { %16287 = vmatmul.mubr.msk.f32.gmra.mrb[26].mxu0 %vm720_vm1, %v19657_v27  ;;  %16038 = vmatprep.mubr.msk.f32.mxu1 %vm720_vm1, %v8981_v31  ;;  %v19883_v31 = vld [vmem:[#allocation2 + $0xb7] sm:$0xff] }
 0x928   : > { %16289 = vmatprep.mubr.msk.f32.mxu0 %vm720_vm1, %v19659_v29 }
 0x92a   : > { %16039 = vmatmul.mubr.msk.f32.gmra.mrb[10].mxu1 %vm720_vm1, %v8982_v32  ;;  %v19890_v32 = vld [vmem:[#allocation2 + $0xbf] sm:$0xff] }
 0x92b   : > { %16290 = vmatmul.mubr.msk.f32.gmra.mrb[28].mxu0 %vm720_vm1, %v19667_v44  ;;  %16041 = vmatprep.mubr.msk.f32.mxu1 %vm720_vm1, %v8983_v43  ;;  %v19893_v43 = vld [vmem:[#allocation2 + $0xc7] sm:$0xff] }
 0x92c   : > { %16292 = vmatprep.mubr.msk.f32.mxu0 %vm720_vm1, %v19669_v60 }
 0x92e   : > { %16042 = vmatmul.mubr.msk.f32.gmra.mrb[12].mxu1 %vm720_vm1, %v8984_v28  ;;  %v19900_v28 = vld [vmem:[#allocation2 + $0xcf] sm:$0xff] }
 0x92f   : > { %16293 = vmatmul.mubr.msk.f32.gmra.mrb[30].mxu0 %vm720_vm1, %v19677_v59  ;;  %16044 = vmatprep.mubr.msk.f32.mxu1 %vm720_vm1, %v8985_v5  ;;  %v19903_v5 = vld [vmem:[#allocation2 + $0xd7] sm:$0xff] }
 0x930   : > { %16295 = vmatprep.mubr.msk.f32.mxu0 %vm720_vm1, %v19679_v56 }
 0x932   : > { %16045 = vmatmul.mubr.msk.f32.gmra.mrb[14].mxu1 %vm720_vm1, %v8986_v7  ;;  %v19910_v7 = vld [vmem:[#allocation2 + $0xdf] sm:$0xff] }
 0x933   : > { %16296 = vmatmul.mubr.msk.f32.gmra.mrb[32].mxu0 %vm720_vm1, %v19687_v41  ;;  %16047 = vmatprep.mubr.msk.f32.mxu1 %vm720_vm1, %v8987_v53  ;;  %v19913_v53 = vld [vmem:[#allocation2 + $0xe7] sm:$0xff] }
 0x934   : > { %16298 = vmatprep.mubr.msk.f32.mxu0 %vm720_vm1, %v19689_v13 }
 0x936   : > { %16048 = vmatmul.mubr.msk.f32.gmra.mrb[16].mxu1 %vm720_vm1, %v8988_v46  ;;  %v19920_v46 = vld [vmem:[#allocation2 + $0xef] sm:$0xff] }
 0x937   : > { %16299 = vmatmul.mubr.msk.f32.gmra.mrb[34].mxu0 %vm720_vm1, %v19697_v52  ;;  %16050 = vmatprep.mubr.msk.f32.mxu1 %vm720_vm1, %v8989_v47  ;;  %v19923_v47 = vld [vmem:[#allocation2 + $0xf7] sm:$0xff] }
 0x938   : > { %16303 = vmatprep.mubr.msk.f32.mxu0 %vm720_vm1, %v19517_v20  ;;  %v8993_v20 = vld [vmem:[#allocation2 + $0xb5] sm:$0xff] }
 0x93a   : > { %16051 = vmatmul.mubr.msk.f32.gmra.mrb[18].mxu1 %vm720_vm1, %v8990_v24  ;;  %v11886_v24 = vld [vmem:[#allocation2 + $0x8a] sm:$0xff] }
 0x93b   : > { %16304 = vmatmul.mubr.msk.f32.vlgmr.msra.gmra.mrb[0].mxu0 %vm720_vm1, %v19529_v35  ;;  %16053 = vmatprep.mubr.msk.f32.mxu1 %vm720_vm1, %v8991_v19  ;;  %v8995_v35 = vld [vmem:[#allocation2 + $0xc5] sm:$0xff] }
 0x93c   : > { %16358 = vmatpush3.msra.mxu0 %v19523_v61  ;;  %16306 = vmatprep.mubr.msk.f32.mxu0 %vm720_vm1, %v19531_v15  ;;  %v8996_v61 = vld [vmem:[#allocation2 + $0xcd] sm:$0xff]  ;;  %v8997_v15 = vld [vmem:[#allocation2 + $0xd5] sm:$0xff]  ;;  %v19930_v19 = vld [vmem:[#allocation2 + $0xff] sm:$0xff] }
 0x93d   : > { %16413 = vmatprep.subr.mxu0 %v19709_v50 }
 0x93e   : > { %16054 = vmatmul.mubr.msk.f32.gmra.mrb[20].mxu1 %vm720_vm1, %v8992_v37  ;;  %v19933_v37 = vld [vmem:[#allocation2 + $0x107] sm:$0xff] }
 0x93f   : > { %16307 = vmatmul.mubr.msk.f32.gmra.mrb[2].mxu0 %vm720_vm1, %v19540_v12  ;;  %16056 = vmatprep.mubr.msk.f32.mxu1 %vm720_vm1, %v8993_v20  ;;  %v8998_v12 = vld [vmem:[#allocation2 + $0xdd] sm:$0xff] }
 0x940   : > { %16309 = vmatprep.mubr.msk.f32.mxu0 %vm720_vm1, %v19542_v21  ;;  %v8999_v21 = vld [vmem:[#allocation2 + $0xe5] sm:$0xff]  ;;  %v11888_v20 = vld [vmem:[#allocation2 + $0x9a] sm:$0xff] }
 0x942   : > { %16057 = vmatmul.mubr.msk.f32.gmra.mrb[22].mxu1 %vm720_vm1, %v8994_v16  ;;  %v19940_v16 = vld [vmem:[#allocation2 + $0x10f] sm:$0xff] }
 0x943   : > { %16310 = vmatmul.mubr.msk.f32.gmra.mrb[4].mxu0 %vm720_vm1, %v19550_v57  ;;  %16059 = vmatprep.mubr.msk.f32.mxu1 %vm720_vm1, %v8995_v35  ;;  %v9000_v57 = vld [vmem:[#allocation2 + $0xed] sm:$0xff]  ;;  %v11889_v35 = vld [vmem:[#allocation2 + $0xa2] sm:$0xff] }
 0x944   : > { %16312 = vmatprep.mubr.msk.f32.mxu0 %vm720_vm1, %v19552_v3  ;;  %v9001_v3 = vld [vmem:[#allocation2 + $0xf5] sm:$0xff] }
 0x946   : > { %16060 = vmatmul.mubr.msk.f32.gmra.mrb[24].mxu1 %vm720_vm1, %v8996_v61  ;;  %v19943_v61 = vld [vmem:[#allocation2 + $0x117] sm:$0xff] }
 0x947   : > { %16313 = vmatmul.mubr.msk.f32.gmra.mrb[6].mxu0 %vm720_vm1, %v19560_v0  ;;  %16062 = vmatprep.mubr.msk.f32.mxu1 %vm720_vm1, %v8997_v15  ;;  %v9002_v0 = vld [vmem:[#allocation2 + $0xfd] sm:$0xff]  ;;  %v11890_v15 = vld [vmem:[#allocation2 + $0xaa] sm:$0xff] }
 0x948   : > { %16315 = vmatprep.mubr.msk.f32.mxu0 %vm720_vm1, %v19562_v49  ;;  %v9003_v49 = vld [vmem:[#allocation2 + $0x105] sm:$0xff] }
 0x94a   : > { %16063 = vmatmul.mubr.msk.f32.gmra.mrb[26].mxu1 %vm720_vm1, %v8998_v12  ;;  %v19950_v12 = vld [vmem:[#allocation2 + $0x11f] sm:$0xff] }
 0x94b   : > { %16316 = vmatmul.mubr.msk.f32.gmra.mrb[8].mxu0 %vm720_vm1, %v19570_v39  ;;  %16065 = vmatprep.mubr.msk.f32.mxu1 %vm720_vm1, %v8999_v21  ;;  %v9004_v39 = vld [vmem:[#allocation2 + $0x10d] sm:$0xff] }
 0x94c   : > { %16318 = vmatprep.mubr.msk.f32.mxu0 %vm720_vm1, %v19572_v51  ;;  %v9005_v51 = vld [vmem:[#allocation2 + $0x115] sm:$0xff] }
 0x94d   : > { %v11891_v21 = vld [vmem:[#allocation2 + $0xb2] sm:$0xff] }
 0x94e   : > { %16066 = vmatmul.mubr.msk.f32.gmra.mrb[28].mxu1 %vm720_vm1, %v9000_v57  ;;  %v11892_v57 = vld [vmem:[#allocation2 + $0xba] sm:$0xff] }
 0x94f   : > { %16319 = vmatmul.mubr.msk.f32.gmra.mrb[10].mxu0 %vm720_vm1, %v19580_v55  ;;  %16068 = vmatprep.mubr.msk.f32.mxu1 %vm720_vm1, %v9001_v3  ;;  %v9006_v55 = vld [vmem:[#allocation2 + $0x11d] sm:$0xff] }
 0x950   : > { %16321 = vmatprep.mubr.msk.f32.mxu0 %vm720_vm1, %v19582_v11  ;;  %v9749_v11 = vld [vmem:[#allocation2 + $0x7] sm:$0xff] }
 0x951   : > { %v11893_v3 = vld [vmem:[#allocation2 + $0xc2] sm:$0xff] }
 0x952   : > { %16069 = vmatmul.mubr.msk.f32.gmra.mrb[30].mxu1 %vm720_vm1, %v9002_v0  ;;  %v11894_v0 = vld [vmem:[#allocation2 + $0xca] sm:$0xff] }
 0x953   : > { %16322 = vmatmul.mubr.msk.f32.gmra.mrb[12].mxu0 %vm720_vm1, %v19590_v58  ;;  %16071 = vmatprep.mubr.msk.f32.mxu1 %vm720_vm1, %v9003_v49  ;;  %v19766_v58 = vld [vmem:[#allocation2 + $0x17] sm:$0xff] }
 0x954   : > { %16324 = vmatprep.mubr.msk.f32.mxu0 %vm720_vm1, %v19592_v17  ;;  %v19778_v17 = vld [vmem:[#allocation2 + $0x27] sm:$0xff]  ;;  %v11895_v49 = vld [vmem:[#allocation2 + $0xd2] sm:$0xff] }
 0x956   : > { %16072 = vmatmul.mubr.msk.f32.gmra.mrb[32].mxu1 %vm720_vm1, %v9004_v39  ;;  %v11896_v39 = vld [vmem:[#allocation2 + $0xda] sm:$0xff] }
 0x957   : > { %16325 = vmatmul.mubr.msk.f32.gmra.mrb[14].mxu0 %vm720_vm1, %v19600_v33  ;;  %16074 = vmatprep.mubr.msk.f32.mxu1 %vm720_vm1, %v9005_v51  ;;  %v19791_v33 = vld [vmem:[#allocation2 + $0x37] sm:$0xff]  ;;  %v11897_v51 = vld [vmem:[#allocation2 + $0xe2] sm:$0xff] }
 0x958   : > { %16327 = vmatprep.mubr.msk.f32.mxu0 %vm720_vm1, %v19602_v42  ;;  %v19803_v42 = vld [vmem:[#allocation2 + $0x47] sm:$0xff] }
 0x95a   : > { %16075 = vmatmul.mubr.msk.f32.gmra.mrb[34].mxu1 %vm720_vm1, %v9006_v55  ;;  %v11898_v55 = vld [vmem:[#allocation2 + $0xea] sm:$0xff] }
 0x95b   : > { %16328 = vmatmul.mubr.msk.f32.gmra.mrb[16].mxu0 %vm720_vm1, %v19610_v34  ;;  %16079 = vmatprep.mubr.msk.f32.mxu1 %vm720_vm1, %v9749_v11  ;;  %v19815_v34 = vld [vmem:[#allocation2 + $0x57] sm:$0xff] }
 0x95c   : > { %16330 = vmatprep.mubr.msk.f32.mxu0 %vm720_vm1, %v19612_v30  ;;  %v19827_v30 = vld [vmem:[#allocation2 + $0x67] sm:$0xff]  ;;  %v11900_v11 = vld [vmem:[#allocation2 + $0xfa] sm:$0xff] }
 0x95e   : > { %16080 = vmatmul.mubr.msk.f32.vlgmr.msra.gmra.mrb[0].mxu1 %vm720_vm1, %v9750_v36  ;;  %v11901_v36 = vld [vmem:[#allocation2 + $0x102] sm:$0xff] }
 0x95f   : > { %16331 = vmatmul.mubr.msk.f32.gmra.mrb[18].mxu0 %vm720_vm1, %v19626_v2  ;;  %16134 = vmatpush3.msra.mxu1 %v19618_v1  ;;  %v19835_v1 = vld [vmem:[#allocation2 + $0x6f] sm:$0xff]  ;;  %v19847_v2 = vld [vmem:[#allocation2 + $0x7f] sm:$0xff] }
 0x960   : > { %16082 = vmatprep.mubr.msk.f32.mxu1 %vm720_vm1, %v19766_v58  ;;  %16333 = vmatprep.mubr.msk.f32.mxu0 %vm720_vm1, %v19628_v62  ;;  %v11483_v62 = vld [vmem:[#allocation2 + $0x139] sm:$0xff] }
 0x961   : > { %17045 = vmatprep.subr.mxu1 %v19460_v45 }
 0x962   : > { %16083 = vmatmul.mubr.msk.f32.gmra.mrb[2].mxu1 %vm720_vm1, %v19772_v63 }
 0x963   : > { %16334 = vmatmul.mubr.msk.f32.gmra.mrb[20].mxu0 %vm720_vm1, %v19637_v14  ;;  %16085 = vmatprep.mubr.msk.f32.mxu1 %vm720_vm1, %v19778_v17  ;;  %v11484_v14 = vld [vmem:[#allocation2 + $0x141] sm:$0xff] }
 0x964   : > { %16336 = vmatprep.mubr.msk.f32.mxu0 %vm720_vm1, %v19639_v8  ;;  %v11874_v8 = vld [vmem:[#allocation2 + $0x2a] sm:$0xff] }
 0x966   : > { %16086 = vmatmul.mubr.msk.f32.gmra.mrb[4].mxu1 %vm720_vm1, %v19787_v40 }
 0x967   : > { %16337 = vmatmul.mubr.msk.f32.gmra.mrb[22].mxu0 %vm720_vm1, %v19647_v48  ;;  %16088 = vmatprep.mubr.msk.f32.mxu1 %vm720_vm1, %v19791_v33  ;;  %v11875_v48 = vld [vmem:[#allocation2 + $0x32] sm:$0xff] }
 0x968   : > { %16339 = vmatprep.mubr.msk.f32.mxu0 %vm720_vm1, %v19649_v25  ;;  %v11876_v25 = vld [vmem:[#allocation2 + $0x3a] sm:$0xff] }
 0x96a   : > { %16089 = vmatmul.mubr.msk.f32.gmra.mrb[6].mxu1 %vm720_vm1, %v19799_v18 }
 0x96b   : > { %16340 = vmatmul.mubr.msk.f32.gmra.mrb[24].mxu0 %vm720_vm1, %v19657_v27  ;;  %16091 = vmatprep.mubr.msk.f32.mxu1 %vm720_vm1, %v19803_v42  ;;  %v11877_v27 = vld [vmem:[#allocation2 + $0x42] sm:$0xff] }
 0x96c   : > { %16342 = vmatprep.mubr.msk.f32.mxu0 %vm720_vm1, %v19659_v29  ;;  %v11878_v29 = vld [vmem:[#allocation2 + $0x4a] sm:$0xff] }
 0x96e   : > { %16092 = vmatmul.mubr.msk.f32.gmra.mrb[8].mxu1 %vm720_vm1, %v19811_v38 }
 0x96f   : > { %16343 = vmatmul.mubr.msk.f32.gmra.mrb[26].mxu0 %vm720_vm1, %v19667_v44  ;;  %16094 = vmatprep.mubr.msk.f32.mxu1 %vm720_vm1, %v19815_v34  ;;  %v11879_v44 = vld [vmem:[#allocation2 + $0x52] sm:$0xff] }
 0x970   : > { %16345 = vmatprep.mubr.msk.f32.mxu0 %vm720_vm1, %v19669_v60  ;;  %v11880_v60 = vld [vmem:[#allocation2 + $0x5a] sm:$0xff] }
 0x972   : > { %16095 = vmatmul.mubr.msk.f32.gmra.mrb[10].mxu1 %vm720_vm1, %v19823_v22 }
 0x973   : > { %16346 = vmatmul.mubr.msk.f32.gmra.mrb[28].mxu0 %vm720_vm1, %v19677_v59  ;;  %16097 = vmatprep.mubr.msk.f32.mxu1 %vm720_vm1, %v19827_v30  ;;  %v11881_v59 = vld [vmem:[#allocation2 + $0x62] sm:$0xff] }
 0x974   : > { %16348 = vmatprep.mubr.msk.f32.mxu0 %vm720_vm1, %v19679_v56  ;;  %v11882_v56 = vld [vmem:[#allocation2 + $0x6a] sm:$0xff] }
 0x976   : > { %16098 = vmatmul.mubr.msk.f32.gmra.mrb[12].mxu1 %vm720_vm1, %v19835_v1 }
 0x977   : > { %16349 = vmatmul.mubr.msk.f32.gmra.mrb[30].mxu0 %vm720_vm1, %v19687_v41  ;;  %16100 = vmatprep.mubr.msk.f32.mxu1 %vm720_vm1, %v19839_v6  ;;  %v11883_v41 = vld [vmem:[#allocation2 + $0x72] sm:$0xff] }
 0x978   : > { %16351 = vmatprep.mubr.msk.f32.mxu0 %vm720_vm1, %v19689_v13  ;;  %v11884_v13 = vld [vmem:[#allocation2 + $0x7a] sm:$0xff] }
 0x97a   : > { %16101 = vmatmul.mubr.msk.f32.gmra.mrb[14].mxu1 %vm720_vm1, %v19847_v2 }
 0x97b   : > { %16352 = vmatmul.mubr.msk.f32.gmra.mrb[32].mxu0 %vm720_vm1, %v19697_v52  ;;  %16103 = vmatprep.mubr.msk.f32.mxu1 %vm720_vm1, %v19851_v4  ;;  %v11885_v52 = vld [vmem:[#allocation2 + $0x82] sm:$0xff] }
 0x97c   : > { %16354 = vmatprep.mubr.msk.f32.mxu0 %vm720_vm1, %v11483_v62  ;;  %v12306_v62 = vld [vmem:[#allocation2 + $0x63] sm:$0xff] }
 0x97e   : > { %16104 = vmatmul.mubr.msk.f32.gmra.mrb[16].mxu1 %vm720_vm1, %v19859_v9 }
 0x97f   : > { %16355 = vmatmul.mubr.msk.f32.gmra.mrb[34].mxu0 %vm720_vm1, %v11484_v14  ;;  %16106 = vmatprep.mubr.msk.f32.mxu1 %vm720_vm1, %v19862_v54  ;;  %v12308_v14 = vld [vmem:[#allocation2 + $0x73] sm:$0xff] }
 0x980   : > { %16359 = vmatprep.mubr.msk.f32.mxu0 %vm720_vm1, %v11874_v8  ;;  %v12310_v8 = vld [vmem:[#allocation2 + $0x83] sm:$0xff] }
 0x982   : > { %16107 = vmatmul.mubr.msk.f32.gmra.mrb[18].mxu1 %vm720_vm1, %v19869_v10 }
 0x983   : > { %16360 = vmatmul.mubr.msk.f32.vlgmr.msra.gmra.mrb[0].mxu0 %vm720_vm1, %v11875_v48  ;;  %16109 = vmatprep.mubr.msk.f32.mxu1 %vm720_vm1, %v19872_v26  ;;  %v12312_v48 = vld [vmem:[#allocation2 + $0x93] sm:$0xff] }
 0x984   : > { %16414 = vmatpush3.msra.mxu0 %v19709_v50  ;;  %16362 = vmatprep.mubr.msk.f32.mxu0 %vm720_vm1, %v11876_v25  ;;  %v11887_v50 = vld [vmem:[#allocation2 + $0x92] sm:$0xff]  ;;  %v12314_v25 = vld [vmem:[#allocation2 + $0xa3] sm:$0xff] }
 0x986   : > { %16110 = vmatmul.mubr.msk.f32.gmra.mrb[20].mxu1 %vm720_vm1, %v19879_v23 }
 0x987   : > { %16363 = vmatmul.mubr.msk.f32.gmra.mrb[2].mxu0 %vm720_vm1, %v11877_v27  ;;  %16112 = vmatprep.mubr.msk.f32.mxu1 %vm720_vm1, %v19883_v31  ;;  %v12315_v27 = vld [vmem:[#allocation2 + $0xab] sm:$0xff] }
 0x988   : > { %16365 = vmatprep.mubr.msk.f32.mxu0 %vm720_vm1, %v11878_v29  ;;  %v12316_v29 = vld [vmem:[#allocation2 + $0xb3] sm:$0xff] }
 0x98a   : > { %16113 = vmatmul.mubr.msk.f32.gmra.mrb[22].mxu1 %vm720_vm1, %v19890_v32 }
 0x98b   : > { %16366 = vmatmul.mubr.msk.f32.gmra.mrb[4].mxu0 %vm720_vm1, %v11879_v44  ;;  %16115 = vmatprep.mubr.msk.f32.mxu1 %vm720_vm1, %v19893_v43  ;;  %v12317_v44 = vld [vmem:[#allocation2 + $0xbb] sm:$0xff] }
 0x98c   : > { %16368 = vmatprep.mubr.msk.f32.mxu0 %vm720_vm1, %v11880_v60  ;;  %v12318_v60 = vld [vmem:[#allocation2 + $0xc3] sm:$0xff] }
 0x98e   : > { %16116 = vmatmul.mubr.msk.f32.gmra.mrb[24].mxu1 %vm720_vm1, %v19900_v28 }
 0x98f   : > { %16369 = vmatmul.mubr.msk.f32.gmra.mrb[6].mxu0 %vm720_vm1, %v11881_v59  ;;  %16118 = vmatprep.mubr.msk.f32.mxu1 %vm720_vm1, %v19903_v5  ;;  %v12319_v59 = vld [vmem:[#allocation2 + $0xcb] sm:$0xff] }
 0x990   : > { %16371 = vmatprep.mubr.msk.f32.mxu0 %vm720_vm1, %v11882_v56  ;;  %v12320_v56 = vld [vmem:[#allocation2 + $0xd3] sm:$0xff] }
 0x992   : > { %16119 = vmatmul.mubr.msk.f32.gmra.mrb[26].mxu1 %vm720_vm1, %v19910_v7 }
 0x993   : > { %16372 = vmatmul.mubr.msk.f32.gmra.mrb[8].mxu0 %vm720_vm1, %v11883_v41  ;;  %16121 = vmatprep.mubr.msk.f32.mxu1 %vm720_vm1, %v19913_v53  ;;  %v12321_v41 = vld [vmem:[#allocation2 + $0xdb] sm:$0xff] }
 0x994   : > { %16374 = vmatprep.mubr.msk.f32.mxu0 %vm720_vm1, %v11884_v13  ;;  %v12322_v13 = vld [vmem:[#allocation2 + $0xe3] sm:$0xff] }
 0x996   : > { %16122 = vmatmul.mubr.msk.f32.gmra.mrb[28].mxu1 %vm720_vm1, %v19920_v46 }
 0x997   : > { %16375 = vmatmul.mubr.msk.f32.gmra.mrb[10].mxu0 %vm720_vm1, %v11885_v52  ;;  %16124 = vmatprep.mubr.msk.f32.mxu1 %vm720_vm1, %v19923_v47  ;;  %v12323_v52 = vld [vmem:[#allocation2 + $0xeb] sm:$0xff] }
 0x998   : > { %16377 = vmatprep.mubr.msk.f32.mxu0 %vm720_vm1, %v11886_v24  ;;  %v12324_v24 = vld [vmem:[#allocation2 + $0xf3] sm:$0xff] }
 0x99a   : > { %16125 = vmatmul.mubr.msk.f32.gmra.mrb[30].mxu1 %vm720_vm1, %v19930_v19 }
 0x99b   : > { %16378 = vmatmul.mubr.msk.f32.gmra.mrb[12].mxu0 %vm720_vm1, %v11887_v50  ;;  %16127 = vmatprep.mubr.msk.f32.mxu1 %vm720_vm1, %v19933_v37  ;;  %v12325_v50 = vld [vmem:[#allocation2 + $0xfb] sm:$0xff] }
 0x99c   : > { %16380 = vmatprep.mubr.msk.f32.mxu0 %vm720_vm1, %v11888_v20  ;;  %v12326_v20 = vld [vmem:[#allocation2 + $0x103] sm:$0xff] }
 0x99e   : > { %16128 = vmatmul.mubr.msk.f32.gmra.mrb[32].mxu1 %vm720_vm1, %v19940_v16 }
 0x99f   : > { %16381 = vmatmul.mubr.msk.f32.gmra.mrb[14].mxu0 %vm720_vm1, %v11889_v35  ;;  %16130 = vmatprep.mubr.msk.f32.mxu1 %vm720_vm1, %v19943_v61  ;;  %v12327_v35 = vld [vmem:[#allocation2 + $0x10b] sm:$0xff] }
 0x9a0   : > { %16383 = vmatprep.mubr.msk.f32.mxu0 %vm720_vm1, %v11890_v15  ;;  %v12328_v15 = vld [vmem:[#allocation2 + $0x113] sm:$0xff] }
 0x9a2   : > { %16131 = vmatmul.mubr.msk.f32.gmra.mrb[34].mxu1 %vm720_vm1, %v19950_v12 }
 0x9a3   : > { %16384 = vmatmul.mubr.msk.f32.gmra.mrb[16].mxu0 %vm720_vm1, %v11891_v21  ;;  %16135 = vmatprep.mubr.msk.f32.mxu1 %vm720_vm1, %v19766_v58  ;;  %v11902_v58 = vld [vmem:[#allocation2 + $0x10a] sm:$0xff]  ;;  %v12329_v21 = vld [vmem:[#allocation2 + $0x11b] sm:$0xff] }
 0x9a4   : > { %16386 = vmatprep.mubr.msk.f32.mxu0 %vm720_vm1, %v11892_v57  ;;  %v10630_v57 = vld [vmem:[#allocation2 + $0x110] sm:$0xff] }
 0x9a6   : > { %16136 = vmatmul.mubr.msk.f32.vlgmr.msra.gmra.mrb[0].mxu1 %vm720_vm1, %v19772_v63  ;;  %v11903_v63 = vld [vmem:[#allocation2 + $0x112] sm:$0xff] }
 0x9a7   : > { %16387 = vmatmul.mubr.msk.f32.gmra.mrb[18].mxu0 %vm720_vm1, %v11893_v3  ;;  %17046 = vmatpush3.msra.mxu1 %v19460_v45  ;;  %v11899_v45 = vld [vmem:[#allocation2 + $0xf2] sm:$0xff]  ;;  %v12330_v3 = vld [vmem:[#allocation2 + $0x123] sm:$0xff] }
 0x9a8   : > { %16138 = vmatprep.mubr.msk.f32.mxu1 %vm720_vm1, %v19778_v17  ;;  %16389 = vmatprep.mubr.msk.f32.mxu0 %vm720_vm1, %v11894_v0  ;;  %v11904_v17 = vld [vmem:[#allocation2 + $0x11a] sm:$0xff] }
 0x9a9   : > { %v10631_v0 = vld [vmem:[#allocation2 + $0x118] sm:$0xff] }
 0x9aa   : > { %16139 = vmatmul.mubr.msk.f32.gmra.mrb[2].mxu1 %vm720_vm1, %v19787_v40  ;;  %v11905_v40 = vld [vmem:[#allocation2 + $0x122] sm:$0xff] }
 0x9ab   : > { %16390 = vmatmul.mubr.msk.f32.gmra.mrb[20].mxu0 %vm720_vm1, %v11895_v49  ;;  %16141 = vmatprep.mubr.msk.f32.mxu1 %vm720_vm1, %v19791_v33  ;;  %v11906_v33 = vld [vmem:[#allocation2 + $0x12a] sm:$0xff] }
 0x9ac   : > { %16392 = vmatprep.mubr.msk.f32.mxu0 %vm720_vm1, %v11896_v39  ;;  %v12331_v49 = vld [vmem:[#allocation2 + $0x12b] sm:$0xff]  ;;  %v10632_v39 = vld [vmem:[#allocation2 + $0x120] sm:$0xff] }
 0x9ae   : > { %16142 = vmatmul.mubr.msk.f32.gmra.mrb[4].mxu1 %vm720_vm1, %v19799_v18  ;;  %v11907_v18 = vld [vmem:[#allocation2 + $0x132] sm:$0xff] }
 0x9af   : > { %16393 = vmatmul.mubr.msk.f32.gmra.mrb[22].mxu0 %vm720_vm1, %v11897_v51  ;;  %16144 = vmatprep.mubr.msk.f32.mxu1 %vm720_vm1, %v19803_v42  ;;  %v11908_v42 = vld [vmem:[#allocation2 + $0x13a] sm:$0xff] }
 0x9b0   : > { %16395 = vmatprep.mubr.msk.f32.mxu0 %vm720_vm1, %v11898_v55  ;;  %v12332_v51 = vld [vmem:[#allocation2 + $0x133] sm:$0xff]  ;;  %v10633_v55 = vld [vmem:[#allocation2 + $0x128] sm:$0xff] }
 0x9b2   : > { %16145 = vmatmul.mubr.msk.f32.gmra.mrb[6].mxu1 %vm720_vm1, %v19811_v38  ;;  %v11909_v38 = vld [vmem:[#allocation2 + $0x142] sm:$0xff] }
 0x9b3   : > { %16396 = vmatmul.mubr.msk.f32.gmra.mrb[24].mxu0 %vm720_vm1, %v11899_v45  ;;  %16147 = vmatprep.mubr.msk.f32.mxu1 %vm720_vm1, %v19815_v34  ;;  %v12299_v34 = vld [vmem:[#allocation2 + $0x2b] sm:$0xff]  ;;  %v12333_v45 = vld [vmem:[#allocation2 + $0x13b] sm:$0xff] }
 0x9b4   : > { %16398 = vmatprep.mubr.msk.f32.mxu0 %vm720_vm1, %v11900_v11  ;;  %v10634_v11 = vld [vmem:[#allocation2 + $0x130] sm:$0xff] }
 0x9b6   : > { %16148 = vmatmul.mubr.msk.f32.gmra.mrb[8].mxu1 %vm720_vm1, %v19823_v22  ;;  %v12300_v22 = vld [vmem:[#allocation2 + $0x33] sm:$0xff] }
 0x9b7   : > { %16399 = vmatmul.mubr.msk.f32.gmra.mrb[26].mxu0 %vm720_vm1, %v11901_v36  ;;  %16150 = vmatprep.mubr.msk.f32.mxu1 %vm720_vm1, %v19827_v30  ;;  %v12301_v30 = vld [vmem:[#allocation2 + $0x3b] sm:$0xff]  ;;  %v12334_v36 = vld [vmem:[#allocation2 + $0x143] sm:$0xff] }
 0x9b8   : > { %16401 = vmatprep.mubr.msk.f32.mxu0 %vm720_vm1, %v11902_v58 }
 0x9ba   : > { %16151 = vmatmul.mubr.msk.f32.gmra.mrb[10].mxu1 %vm720_vm1, %v19835_v1  ;;  %v12302_v1 = vld [vmem:[#allocation2 + $0x43] sm:$0xff] }
 0x9bb   : > { %16402 = vmatmul.mubr.msk.f32.gmra.mrb[28].mxu0 %vm720_vm1, %v11903_v63  ;;  %16153 = vmatprep.mubr.msk.f32.mxu1 %vm720_vm1, %v19839_v6  ;;  %v12303_v6 = vld [vmem:[#allocation2 + $0x4b] sm:$0xff] }
 0x9bc   : > { %16404 = vmatprep.mubr.msk.f32.mxu0 %vm720_vm1, %v11904_v17 }
 0x9be   : > { %16154 = vmatmul.mubr.msk.f32.gmra.mrb[12].mxu1 %vm720_vm1, %v19847_v2  ;;  %v12304_v2 = vld [vmem:[#allocation2 + $0x53] sm:$0xff] }
 0x9bf   : > { %16405 = vmatmul.mubr.msk.f32.gmra.mrb[30].mxu0 %vm720_vm1, %v11905_v40  ;;  %16156 = vmatprep.mubr.msk.f32.mxu1 %vm720_vm1, %v19851_v4  ;;  %v12305_v4 = vld [vmem:[#allocation2 + $0x5b] sm:$0xff] }
 0x9c0   : > { %16407 = vmatprep.mubr.msk.f32.mxu0 %vm720_vm1, %v11906_v33 }
 0x9c2   : > { %16157 = vmatmul.mubr.msk.f32.gmra.mrb[14].mxu1 %vm720_vm1, %v19859_v9  ;;  %v12307_v9 = vld [vmem:[#allocation2 + $0x6b] sm:$0xff] }
 0x9c3   : > { %16408 = vmatmul.mubr.msk.f32.gmra.mrb[32].mxu0 %vm720_vm1, %v11907_v18  ;;  %16159 = vmatprep.mubr.msk.f32.mxu1 %vm720_vm1, %v19862_v54  ;;  %v12309_v54 = vld [vmem:[#allocation2 + $0x7b] sm:$0xff] }
 0x9c4   : > { %16410 = vmatprep.mubr.msk.f32.mxu0 %vm720_vm1, %v11908_v42 }
 0x9c6   : > { %16160 = vmatmul.mubr.msk.f32.gmra.mrb[16].mxu1 %vm720_vm1, %v19869_v10  ;;  %v12311_v10 = vld [vmem:[#allocation2 + $0x8b] sm:$0xff] }
 0x9c7   : > { %16411 = vmatmul.mubr.msk.f32.gmra.mrb[34].mxu0 %vm720_vm1, %v11909_v38  ;;  %16162 = vmatprep.mubr.msk.f32.mxu1 %vm720_vm1, %v19872_v26  ;;  %v12313_v26 = vld [vmem:[#allocation2 + $0x9b] sm:$0xff] }
 0x9c8   : > { %16415 = vmatprep.mubr.msk.f32.mxu0 %vm720_vm1, %v12299_v34 }
 0x9ca   : > { %16163 = vmatmul.mubr.msk.f32.gmra.mrb[18].mxu1 %vm720_vm1, %v19879_v23  ;;  %v10208_v23 = vld [vmem:[#allocation2 + $0x127] sm:$0xff] }
 0x9cb   : > { %16416 = vmatmul.mubr.msk.f32.vlgmr.msra.gmra.mrb[0].mxu0 %vm720_vm1, %v12300_v22  ;;  %16165 = vmatprep.mubr.msk.f32.mxu1 %vm720_vm1, %v19883_v31  ;;  %v10209_v31 = vld [vmem:[#allocation2 + $0x12f] sm:$0xff] }
 0x9cc   : > { %16418 = vmatprep.mubr.msk.f32.mxu0 %vm720_vm1, %v12301_v30 }
 0x9ce   : > { %16166 = vmatmul.mubr.msk.f32.gmra.mrb[20].mxu1 %vm720_vm1, %v19890_v32  ;;  %v10617_v32 = vld [vmem:[#allocation2 + $0xa8] sm:$0xff] }
 0x9cf   : > { %16419 = vmatmul.mubr.msk.f32.gmra.mrb[2].mxu0 %vm720_vm1, %v12302_v1  ;;  %16168 = vmatprep.mubr.msk.f32.mxu1 %vm720_vm1, %v19893_v43  ;;  %v10618_v43 = vld [vmem:[#allocation2 + $0xb0] sm:$0xff] }
 0x9d0   : > { %16421 = vmatprep.mubr.msk.f32.mxu0 %vm720_vm1, %v12303_v6 }
 0x9d2   : > { %16169 = vmatmul.mubr.msk.f32.gmra.mrb[22].mxu1 %vm720_vm1, %v19900_v28  ;;  %v10619_v28 = vld [vmem:[#allocation2 + $0xb8] sm:$0xff] }
 0x9d3   : > { %16422 = vmatmul.mubr.msk.f32.gmra.mrb[4].mxu0 %vm720_vm1, %v12304_v2  ;;  %16171 = vmatprep.mubr.msk.f32.mxu1 %vm720_vm1, %v19903_v5  ;;  %v10620_v5 = vld [vmem:[#allocation2 + $0xc0] sm:$0xff] }
 0x9d4   : > { %16424 = vmatprep.mubr.msk.f32.mxu0 %vm720_vm1, %v12305_v4 }
 0x9d6   : > { %16172 = vmatmul.mubr.msk.f32.gmra.mrb[24].mxu1 %vm720_vm1, %v19910_v7  ;;  %v10621_v7 = vld [vmem:[#allocation2 + $0xc8] sm:$0xff] }
 0x9d7   : > { %16425 = vmatmul.mubr.msk.f32.gmra.mrb[6].mxu0 %vm720_vm1, %v12306_v62  ;;  %16174 = vmatprep.mubr.msk.f32.mxu1 %vm720_vm1, %v19913_v53  ;;  %v10622_v53 = vld [vmem:[#allocation2 + $0xd0] sm:$0xff] }
 0x9d8   : > { %16427 = vmatprep.mubr.msk.f32.mxu0 %vm720_vm1, %v12307_v9 }
 0x9da   : > { %16175 = vmatmul.mubr.msk.f32.gmra.mrb[26].mxu1 %vm720_vm1, %v19920_v46  ;;  %v10623_v46 = vld [vmem:[#allocation2 + $0xd8] sm:$0xff] }
 0x9db   : > { %16428 = vmatmul.mubr.msk.f32.gmra.mrb[8].mxu0 %vm720_vm1, %v12308_v14  ;;  %16177 = vmatprep.mubr.msk.f32.mxu1 %vm720_vm1, %v19923_v47  ;;  %v10624_v47 = vld [vmem:[#allocation2 + $0xe0] sm:$0xff] }
 0x9dc   : > { %16430 = vmatprep.mubr.msk.f32.mxu0 %vm720_vm1, %v12309_v54  ;;  %v20118_v54 = vld [vmem:[%s20298_s11] ss:$0 sm:$0xff] }
 0x9de   : > { %16178 = vmatmul.mubr.msk.f32.gmra.mrb[28].mxu1 %vm720_vm1, %v19930_v19  ;;  %v10625_v19 = vld [vmem:[#allocation2 + $0xe8] sm:$0xff] }
 0x9df   : > { %16431 = vmatmul.mubr.msk.f32.gmra.mrb[10].mxu0 %vm720_vm1, %v12310_v8  ;;  %16180 = vmatprep.mubr.msk.f32.mxu1 %vm720_vm1, %v19933_v37  ;;  %v10626_v37 = vld [vmem:[#allocation2 + $0xf0] sm:$0xff] }
 0x9e0   : > { %16433 = vmatprep.mubr.msk.f32.mxu0 %vm720_vm1, %v12311_v10 }
 0x9e2   : > { %16181 = vmatmul.mubr.msk.f32.gmra.mrb[30].mxu1 %vm720_vm1, %v19940_v16  ;;  %v10627_v16 = vld [vmem:[#allocation2 + $0xf8] sm:$0xff] }
 0x9e3   : > { %16434 = vmatmul.mubr.msk.f32.gmra.mrb[12].mxu0 %vm720_vm1, %v12312_v48  ;;  %16183 = vmatprep.mubr.msk.f32.mxu1 %vm720_vm1, %v19943_v61  ;;  %v10628_v61 = vld [vmem:[#allocation2 + $0x100] sm:$0xff] }
 0x9e4   : > { %16436 = vmatprep.mubr.msk.f32.mxu0 %vm720_vm1, %v12313_v26  ;;  %v12767_v26 = vld [vmem:[%s17620_s16 + $0x8] sm:$0xff] }
 0x9e6   : > { %16184 = vmatmul.mubr.msk.f32.gmra.mrb[32].mxu1 %vm720_vm1, %v19950_v12  ;;  %v10629_v12 = vld [vmem:[#allocation2 + $0x108] sm:$0xff] }
 0x9e7   : > { %16437 = vmatmul.mubr.msk.f32.gmra.mrb[14].mxu0 %vm720_vm1, %v12314_v25  ;;  %16186 = vmatprep.mubr.msk.f32.mxu1 %vm720_vm1, %v10208_v23 }
 0x9e8   : > { %16439 = vmatprep.mubr.msk.f32.mxu0 %vm720_vm1, %v12315_v27  ;;  %v12766_v27 = vld [vmem:[%s17620_s16] sm:$0xff] }
 0x9ea   : > { %16187 = vmatmul.mubr.msk.f32.gmra.mrb[34].mxu1 %vm720_vm1, %v10209_v31 }
 0x9eb   : > { %16440 = vmatmul.mubr.msk.f32.gmra.mrb[16].mxu0 %vm720_vm1, %v12316_v29  ;;  %16218 = vmatprep.mubr.msk.f32.mxu1 %vm720_vm1, %v10617_v32 }
 0x9ec   : > { %16442 = vmatprep.mubr.msk.f32.mxu0 %vm720_vm1, %v12317_v44 }
 0x9ee   : > { %16219 = vmatmul.mubr.msk.f32.vlgmr.msra.gmra.mrb[18].mxu1 %vm720_vm1, %v10618_v43 }
 0x9ef   : > { %16443 = vmatmul.mubr.msk.f32.gmra.mrb[18].mxu0 %vm720_vm1, %v12318_v60  ;;  %16221 = vmatprep.mubr.msk.f32.mxu1 %vm720_vm1, %v10619_v28  ;;  %v12769_v28 = vld [vmem:[%s17620_s16 + $0x18] sm:$0xff] }
 0x9f0   : > { %16445 = vmatprep.mubr.msk.f32.mxu0 %vm720_vm1, %v12319_v59 }
 0x9f2   : > { %16222 = vmatmul.mubr.msk.f32.gmra.mrb[20].mxu1 %vm720_vm1, %v10620_v5 }
 0x9f3   : > { %16446 = vmatmul.mubr.msk.f32.gmra.mrb[20].mxu0 %vm720_vm1, %v12320_v56  ;;  %16224 = vmatprep.mubr.msk.f32.mxu1 %vm720_vm1, %v10621_v7  ;;  %v12768_v56 = vld [vmem:[%s17620_s16 + $0x10] sm:$0xff] }
 0x9f4   : > { %16448 = vmatprep.mubr.msk.f32.mxu0 %vm720_vm1, %v12321_v41 }
 0x9f6   : > { %16225 = vmatmul.mubr.msk.f32.gmra.mrb[22].mxu1 %vm720_vm1, %v10622_v53 }
 0x9f7   : > { %16449 = vmatmul.mubr.msk.f32.gmra.mrb[22].mxu0 %vm720_vm1, %v12322_v13  ;;  %16227 = vmatprep.mubr.msk.f32.mxu1 %vm720_vm1, %v10623_v46 }
 0x9f8   : > { %16451 = vmatprep.mubr.msk.f32.mxu0 %vm720_vm1, %v12323_v52 }
 0x9fa   : > { %16228 = vmatmul.mubr.msk.f32.gmra.mrb[24].mxu1 %vm720_vm1, %v10624_v47  ;;  %v12771_v47 = vld [vmem:[%s17620_s16 + $0x28] sm:$0xff] }
 0x9fb   : > { %16452 = vmatmul.mubr.msk.f32.gmra.mrb[24].mxu0 %vm720_vm1, %v12324_v24  ;;  %16230 = vmatprep.mubr.msk.f32.mxu1 %vm720_vm1, %v10625_v19 }
 0x9fc   : > { %16454 = vmatprep.mubr.msk.f32.mxu0 %vm720_vm1, %v12325_v50  ;;  %v12770_v50 = vld [vmem:[%s17620_s16 + $0x20] sm:$0xff] }
 0x9fe   : > { %16231 = vmatmul.mubr.msk.f32.gmra.mrb[26].mxu1 %vm720_vm1, %v10626_v37 }
 0x9ff   : > { %16455 = vmatmul.mubr.msk.f32.gmra.mrb[26].mxu0 %vm720_vm1, %v12326_v20  ;;  %16233 = vmatprep.mubr.msk.f32.mxu1 %vm720_vm1, %v10627_v16 }
 0xa00   : > { %16457 = vmatprep.mubr.msk.f32.mxu0 %vm720_vm1, %v12327_v35 }
 0xa02   : > { %16234 = vmatmul.mubr.msk.f32.gmra.mrb[28].mxu1 %vm720_vm1, %v10628_v61 }
 0xa03   : > { %16458 = vmatmul.mubr.msk.f32.gmra.mrb[28].mxu0 %vm720_vm1, %v12328_v15  ;;  %16236 = vmatprep.mubr.msk.f32.mxu1 %vm720_vm1, %v10629_v12  ;;  %v12773_v12 = vld [vmem:[%s17620_s16 + $0x38] sm:$0xff] }
 0xa04   : > { %16460 = vmatprep.mubr.msk.f32.mxu0 %vm720_vm1, %v12329_v21 }
 0xa06   : > { %16237 = vmatmul.mubr.msk.f32.gmra.mrb[30].mxu1 %vm720_vm1, %v10630_v57 }
 0xa07   : > { %16461 = vmatmul.mubr.msk.f32.gmra.mrb[30].mxu0 %vm720_vm1, %v12330_v3  ;;  %16239 = vmatprep.mubr.msk.f32.mxu1 %vm720_vm1, %v10631_v0  ;;  %v12772_v3 = vld [vmem:[%s17620_s16 + $0x30] sm:$0xff] }
 0xa08   : > { %16463 = vmatprep.mubr.msk.f32.mxu0 %vm720_vm1, %v12331_v49 }
 0xa0a   : > { %16240 = vmatmul.mubr.msk.f32.gmra.mrb[32].mxu1 %vm720_vm1, %v10632_v39 }
 0xa0b   : > { %16464 = vmatmul.mubr.msk.f32.gmra.mrb[32].mxu0 %vm720_vm1, %v12332_v51  ;;  %16242 = vmatprep.mubr.msk.f32.mxu1 %vm720_vm1, %v10633_v55 }
 0xa0c   : > { %16466 = vmatprep.mubr.msk.f32.mxu0 %vm720_vm1, %v12333_v45 }
 0xa0e   : > { %16243 = vmatmul.mubr.msk.f32.gmra.mrb[34].mxu1 %vm720_vm1, %v10634_v11  ;;  %v12775_v11 = vld [vmem:[%s17620_s16 + $0x48] sm:$0xff] }
 0xa0f   : > { %16467 = vmatmul.mubr.msk.f32.gmra.mrb[34].mxu0 %vm720_vm1, %v12334_v36 }
 0xa79   : > { %v16137_v58 = vpop.f32.mrb[0].mxu1 }
 0xa7a   : > { %v10384_v63 = vpop.f32.mrb[1].mxu1 }
 0xa7d   : > { %v16140_v17 = vpop.f32.mrb[2].mxu1 }
 0xa7e   : > { %v10394_v40 = vpop.f32.mrb[3].mxu1 }
 0xa81   : > { %v16143_v33 = vpop.f32.mrb[4].mxu1 }
 0xa82   : > { %v10404_v18 = vpop.f32.mrb[5].mxu1 }
 0xa85   : > { %v16146_v42 = vpop.f32.mrb[6].mxu1 }
 0xa86   : > { %v10414_v38 = vpop.f32.mrb[7].mxu1 }
 0xa89   : > { %v16149_v34 = vpop.f32.mrb[8].mxu1 }
 0xa8a   : > { %v10424_v22 = vpop.f32.mrb[9].mxu1 }
 0xa8d   : > { %v20099_v30 = vpop.f32.mrb[10].mxu1 }
 0xa8e   : > { %v20101_v1 = vpop.f32.mrb[11].mxu1 }
 0xa91   : > { %v20103_v6 = vpop.f32.mrb[12].mxu1 }
 0xa92   : > { %v20105_v2 = vpop.f32.mrb[13].mxu1 }
 0xa95   : > { %v20107_v4 = vpop.f32.mrb[14].mxu1 }
 0xa96   : > { %v20109_v62 = vpop.f32.mrb[15].mxu1 }
 0xa99   : > { %v20111_v9 = vpop.f32.mrb[16].mxu1 }
 0xa9a   : > { %v20113_v14 = vpop.f32.mrb[17].mxu1 }
 0xa9e   : > { %v16417_v8 = vpop.f32.mrb[0].mxu0 }
 0xa9f   : > { %v17047_v10 = vadd.f32 %v16417_v8, %v16137_v58  ;;  %v12509_v48 = vpop.f32.mrb[1].mxu0 }
 0xaa0   : > { %v17048_v25 = vadd.f32 %v12509_v48, %v10384_v63  ;;  %v12774_v63 = vld [vmem:[%s17620_s16 + $0x40] sm:$0xff] }
 0xaa1   : > { %v12731_v23 = vadd.f32 %v17047_v10, %v20118_v54  ;;  %v12776_v10 = vld [vmem:[%s17620_s16 + $0x50] sm:$0xff] }
 0xaa2   : > { %v12730_v31 = vadd.f32 %v17048_v25, %v20118_v54  ;;  %v16420_v29 = vpop.f32.mrb[2].mxu0 }
 0xaa3   : > { %v12803_v32 = vadd.f32 %v12767_v26, %v12731_v23  ;;  %v17049_v44 = vadd.f32 %v16420_v29, %v16140_v17  ;;  %v12519_v43 = vpop.f32.mrb[3].mxu0 }
 0xaa4   : > { %v12802_v60 = vadd.f32 %v12766_v27, %v12730_v31  ;;  %v17050_v59 = vadd.f32 %v12519_v43, %v10394_v40  ;;  %v12779_v31 = vld [vmem:[%s17620_s16 + $0x68] sm:$0xff] }
 0xaa5   : > { %12839 = vst.msk [vmem:[%s17625_s19 + $0x8] sm:$0xff] %vm720_vm1, %v12803_v32  ;;  %v12733_v5 = vadd.f32 %v17049_v44, %v20118_v54  ;;  %v12778_v32 = vld [vmem:[%s17620_s16 + $0x60] sm:$0xff] }
 0xaa6   : > { %12838 = vst.msk [vmem:[%s17625_s19] sm:$0xff] %vm720_vm1, %v12802_v60  ;;  %v12732_v7 = vadd.f32 %v17050_v59, %v20118_v54  ;;  %v16423_v41 = vpop.f32.mrb[4].mxu0 }
 0xaa7   : > { %v12805_v53 = vadd.f32 %v12769_v28, %v12733_v5  ;;  %v17051_v13 = vadd.f32 %v16423_v41, %v16143_v33  ;;  %v12529_v46 = vpop.f32.mrb[5].mxu0  ;;  %v12781_v5 = vld [vmem:[%s17620_s16 + $0x78] sm:$0xff] }
 0xaa8   : > { %v12804_v52 = vadd.f32 %v12768_v56, %v12732_v7  ;;  %v17052_v24 = vadd.f32 %v12529_v46, %v10404_v18  ;;  %v12780_v7 = vld [vmem:[%s17620_s16 + $0x70] sm:$0xff] }
 0xaa9   : > { %12841 = vst.msk [vmem:[%s17625_s19 + $0x18] sm:$0xff] %vm720_vm1, %v12805_v53  ;;  %v12735_v19 = vadd.f32 %v17051_v13, %v20118_v54 }
 0xaaa   : > { %12840 = vst.msk [vmem:[%s17625_s19 + $0x10] sm:$0xff] %vm720_vm1, %v12804_v52  ;;  %v12734_v37 = vadd.f32 %v17052_v24, %v20118_v54  ;;  %v16426_v20 = vpop.f32.mrb[6].mxu0 }
 0xaab   : > { %v12807_v16 = vadd.f32 %v12771_v47, %v12735_v19  ;;  %v17053_v35 = vadd.f32 %v16426_v20, %v16146_v42  ;;  %v12539_v61 = vpop.f32.mrb[7].mxu0  ;;  %v12783_v47 = vld [vmem:[%s17620_s16 + $0x88] sm:$0xff]  ;;  %v12782_v19 = vld [vmem:[%s17620_s16 + $0x80] sm:$0xff] }
 0xaac   : > { %v12806_v15 = vadd.f32 %v12770_v50, %v12734_v37  ;;  %v17054_v21 = vadd.f32 %v12539_v61, %v10414_v38 }
 0xaad   : > { %12843 = vst.msk [vmem:[%s17625_s19 + $0x28] sm:$0xff] %vm720_vm1, %v12807_v16  ;;  %v12737_v57 = vadd.f32 %v17053_v35, %v20118_v54 }
 0xaae   : > { %12842 = vst.msk [vmem:[%s17625_s19 + $0x20] sm:$0xff] %vm720_vm1, %v12806_v15  ;;  %v12736_v0 = vadd.f32 %v17054_v21, %v20118_v54  ;;  %v16429_v49 = vpop.f32.mrb[8].mxu0 }
 0xaaf   : > { %v12809_v39 = vadd.f32 %v12773_v12, %v12737_v57  ;;  %v17055_v51 = vadd.f32 %v16429_v49, %v16149_v34  ;;  %v12549_v55 = vpop.f32.mrb[9].mxu0  ;;  %v12777_v34 = vld [vmem:[%s17620_s16 + $0x58] sm:$0xff]  ;;  %v12784_v57 = vld [vmem:[%s17620_s16 + $0x90] sm:$0xff] }
 0xab0   : > { %v12808_v45 = vadd.f32 %v12772_v3, %v12736_v0  ;;  %v17056_v36 = vadd.f32 %v12549_v55, %v10424_v22 }
 0xab1   : > { %12845 = vst.msk [vmem:[%s17625_s19 + $0x38] sm:$0xff] %vm720_vm1, %v12809_v39  ;;  %v12739_v58 = vadd.f32 %v17055_v51, %v20118_v54 }
 0xab2   : > { %12844 = vst.msk [vmem:[%s17625_s19 + $0x30] sm:$0xff] %vm720_vm1, %v12808_v45  ;;  %v12738_v17 = vadd.f32 %v17056_v36, %v20118_v54  ;;  %v16432_v40 = vpop.f32.mrb[10].mxu0  ;;  %v12787_v36 = vld [vmem:[%s17620_s16 + $0xa8] sm:$0xff] }
 0xab3   : > { %v12811_v33 = vadd.f32 %v12775_v11, %v12739_v58  ;;  %v17057_v18 = vadd.f32 %v16432_v40, %v20099_v30  ;;  %v12559_v42 = vpop.f32.mrb[11].mxu0 }
 0xab4   : > { %v12810_v38 = vadd.f32 %v12774_v63, %v12738_v17  ;;  %v17058_v22 = vadd.f32 %v12559_v42, %v20101_v1  ;;  %v12786_v17 = vld [vmem:[%s17620_s16 + $0xa0] sm:$0xff] }
 0xab5   : > { %12847 = vst.msk [vmem:[%s17625_s19 + $0x48] sm:$0xff] %vm720_vm1, %v12811_v33  ;;  %v12741_v8 = vadd.f32 %v17057_v18, %v20118_v54 }
 0xab6   : > { %12846 = vst.msk [vmem:[%s17625_s19 + $0x40] sm:$0xff] %vm720_vm1, %v12810_v38  ;;  %v12740_v48 = vadd.f32 %v17058_v22, %v20118_v54  ;;  %v16435_v26 = vpop.f32.mrb[12].mxu0 }
 0xab7   : > { %v12813_v25 = vadd.f32 %v12777_v34, %v12741_v8  ;;  %v17059_v30 = vadd.f32 %v16435_v26, %v20103_v6  ;;  %v12569_v23 = vpop.f32.mrb[13].mxu0 }
 0xab8   : > { %v12812_v27 = vadd.f32 %v12776_v10, %v12740_v48  ;;  %v17060_v1 = vadd.f32 %v12569_v23, %v20105_v2  ;;  %v12789_v10 = vld [vmem:[%s17620_s16 + $0xb8] sm:$0xff] }
 0xab9   : > { %12849 = vst.msk [vmem:[%s17625_s19 + $0x58] sm:$0xff] %vm720_vm1, %v12813_v25  ;;  %v12743_v29 = vadd.f32 %v17059_v30, %v20118_v54  ;;  %v12788_v25 = vld [vmem:[%s17620_s16 + $0xb0] sm:$0xff] }
 0xaba   : > { %12848 = vst.msk [vmem:[%s17625_s19 + $0x50] sm:$0xff] %vm720_vm1, %v12812_v27  ;;  %v12742_v44 = vadd.f32 %v17060_v1, %v20118_v54  ;;  %v16438_v43 = vpop.f32.mrb[14].mxu0 }
 0xabb   : > { %v12815_v60 = vadd.f32 %v12779_v31, %v12743_v29  ;;  %v17061_v6 = vadd.f32 %v16438_v43, %v20107_v4  ;;  %v12579_v28 = vpop.f32.mrb[15].mxu0  ;;  %v12791_v43 = vld [vmem:[%s17620_s16 + $0xc8] sm:$0xff] }
 0xabc   : > { %v12814_v59 = vadd.f32 %v12778_v32, %v12742_v44  ;;  %v17062_v2 = vadd.f32 %v12579_v28, %v20109_v62  ;;  %v12790_v28 = vld [vmem:[%s17620_s16 + $0xc0] sm:$0xff] }
 0xabd   : > { %12851 = vst.msk [vmem:[%s17625_s19 + $0x68] sm:$0xff] %vm720_vm1, %v12815_v60  ;;  %v12745_v56 = vadd.f32 %v17061_v6, %v20118_v54 }
 0xabe   : > { %12850 = vst.msk [vmem:[%s17625_s19 + $0x60] sm:$0xff] %vm720_vm1, %v12814_v59  ;;  %v12744_v41 = vadd.f32 %v17062_v2, %v20118_v54  ;;  %v16441_v53 = vpop.f32.mrb[16].mxu0 }
 0xabf   : > { %v12817_v13 = vadd.f32 %v12781_v5, %v12745_v56  ;;  %v17063_v4 = vadd.f32 %v16441_v53, %v20111_v9  ;;  %v12589_v46 = vpop.f32.mrb[17].mxu0 }
 0xac0   : > { %v12816_v52 = vadd.f32 %v12780_v7, %v12744_v41  ;;  %v17064_v62 = vadd.f32 %v12589_v46, %v20113_v14  ;;  %v12785_v14 = vld [vmem:[%s17620_s16 + $0x98] sm:$0xff] }
 0xac1   : > { %12853 = vst.msk [vmem:[%s17625_s19 + $0x78] sm:$0xff] %vm720_vm1, %v12817_v13  ;;  %v12747_v24 = vadd.f32 %v17063_v4, %v20118_v54  ;;  %v16220_v50 = vpop.f32.mrb[18].mxu1  ;;  %v12793_v4 = vld [vmem:[%s17620_s16 + $0xd8] sm:$0xff] }
 0xac2   : > { %12852 = vst.msk [vmem:[%s17625_s19 + $0x70] sm:$0xff] %vm720_vm1, %v12816_v52  ;;  %v12746_v37 = vadd.f32 %v17064_v62, %v20118_v54  ;;  %v16444_v9 = vpop.f32.mrb[18].mxu0  ;;  %v10899_v20 = vpop.f32.mrb[19].mxu1 }
 0xac3   : > { %v12819_v16 = vadd.f32 %v12783_v47, %v12747_v24  ;;  %v17065_v35 = vadd.f32 %v16444_v9, %v16220_v50  ;;  %v12599_v61 = vpop.f32.mrb[19].mxu0  ;;  %v12792_v47 = vld [vmem:[%s17620_s16 + $0xd0] sm:$0xff] }
 0xac4   : > { %v12818_v15 = vadd.f32 %v12782_v19, %v12746_v37  ;;  %v17066_v12 = vadd.f32 %v12599_v61, %v10899_v20 }
 0xac5   : > { %12855 = vst.msk [vmem:[%s17625_s19 + $0x88] sm:$0xff] %vm720_vm1, %v12819_v16  ;;  %v12749_v21 = vadd.f32 %v17065_v35, %v20118_v54  ;;  %v16223_v3 = vpop.f32.mrb[20].mxu1  ;;  %v12795_v35 = vld [vmem:[%s17620_s16 + $0xe8] sm:$0xff] }
 0xac6   : > { %12854 = vst.msk [vmem:[%s17625_s19 + $0x80] sm:$0xff] %vm720_vm1, %v12818_v15  ;;  %v12748_v0 = vadd.f32 %v17066_v12, %v20118_v54  ;;  %v16447_v49 = vpop.f32.mrb[20].mxu0  ;;  %v10909_v39 = vpop.f32.mrb[21].mxu1 }
 0xac7   : > { %v12821_v51 = vadd.f32 %v12785_v14, %v12749_v21  ;;  %v17067_v55 = vadd.f32 %v16447_v49, %v16223_v3  ;;  %v12609_v45 = vpop.f32.mrb[21].mxu0  ;;  %v12794_v14 = vld [vmem:[%s17620_s16 + $0xe0] sm:$0xff] }
 0xac8   : > { %v12820_v11 = vadd.f32 %v12784_v57, %v12748_v0  ;;  %v17068_v58 = vadd.f32 %v12609_v45, %v10909_v39 }
 0xac9   : > { %12857 = vst.msk [vmem:[%s17625_s19 + $0x98] sm:$0xff] %vm720_vm1, %v12821_v51  ;;  %v12751_v63 = vadd.f32 %v17067_v55, %v20118_v54  ;;  %v16226_v40 = vpop.f32.mrb[22].mxu1  ;;  %v12797_v55 = vld [vmem:[%s17620_s16 + $0xf8] sm:$0xff] }
 0xaca   : > { %12856 = vst.msk [vmem:[%s17625_s19 + $0x90] sm:$0xff] %vm720_vm1, %v12820_v11  ;;  %v12750_v33 = vadd.f32 %v17068_v58, %v20118_v54  ;;  %v16450_v18 = vpop.f32.mrb[22].mxu0  ;;  %v10919_v42 = vpop.f32.mrb[23].mxu1 }
 0xacb   : > { %v12823_v38 = vadd.f32 %v12787_v36, %v12751_v63  ;;  %v17069_v34 = vadd.f32 %v16450_v18, %v16226_v40  ;;  %v12619_v22 = vpop.f32.mrb[23].mxu0  ;;  %v12796_v36 = vld [vmem:[%s17620_s16 + $0xf0] sm:$0xff] }
 0xacc   : > { %v12822_v8 = vadd.f32 %v12786_v17, %v12750_v33  ;;  %v17070_v48 = vadd.f32 %v12619_v22, %v10919_v42 }
 0xacd   : > { %12859 = vst.msk [vmem:[%s17625_s19 + $0xa8] sm:$0xff] %vm720_vm1, %v12823_v38  ;;  %v12753_v26 = vadd.f32 %v17069_v34, %v20118_v54  ;;  %v16229_v30 = vpop.f32.mrb[24].mxu1  ;;  %v12799_v34 = vld [vmem:[%s17620_s16 + $0x108] sm:$0xff] }
 0xace   : > { %12858 = vst.msk [vmem:[%s17625_s19 + $0xa0] sm:$0xff] %vm720_vm1, %v12822_v8  ;;  %v12752_v23 = vadd.f32 %v17070_v48, %v20118_v54  ;;  %v16453_v27 = vpop.f32.mrb[24].mxu0  ;;  %v10929_v31 = vpop.f32.mrb[25].mxu1 }
 0xacf   : > { %v12825_v1 = vadd.f32 %v12789_v10, %v12753_v26  ;;  %v17071_v29 = vadd.f32 %v16453_v27, %v16229_v30  ;;  %v12629_v32 = vpop.f32.mrb[25].mxu0  ;;  %v12798_v10 = vld [vmem:[%s17620_s16 + $0x100] sm:$0xff] }
 0xad0   : > { %v12824_v44 = vadd.f32 %v12788_v25, %v12752_v23  ;;  %v17072_v60 = vadd.f32 %v12629_v32, %v10929_v31 }
 0xad1   : > { %12861 = vst.msk [vmem:[%s17625_s19 + $0xb8] sm:$0xff] %vm720_vm1, %v12825_v1  ;;  %v12755_v6 = vadd.f32 %v17071_v29, %v20118_v54  ;;  %v16232_v59 = vpop.f32.mrb[26].mxu1  ;;  %v12801_v29 = vld [vmem:[%s17620_s16 + $0x118] sm:$0xff] }
 0xad2   : > { %12860 = vst.msk [vmem:[%s17625_s19 + $0xb0] sm:$0xff] %vm720_vm1, %v12824_v44  ;;  %v12754_v5 = vadd.f32 %v17072_v60, %v20118_v54  ;;  %v16456_v2 = vpop.f32.mrb[26].mxu0  ;;  %v10939_v56 = vpop.f32.mrb[27].mxu1 }
 0xad3   : > { %v12827_v7 = vadd.f32 %v12791_v43, %v12755_v6  ;;  %v17073_v41 = vadd.f32 %v16456_v2, %v16232_v59  ;;  %v12639_v53 = vpop.f32.mrb[27].mxu0  ;;  %v12800_v43 = vld [vmem:[%s17620_s16 + $0x110] sm:$0xff] }
 0xad4   : > { %v12826_v13 = vadd.f32 %v12790_v28, %v12754_v5  ;;  %v17074_v46 = vadd.f32 %v12639_v53, %v10939_v56 }
 0xad5   : > { %12863 = vst.msk [vmem:[%s17625_s19 + $0xc8] sm:$0xff] %vm720_vm1, %v12827_v7  ;;  %v12757_v52 = vadd.f32 %v17073_v41, %v20118_v54  ;;  %v16235_v62 = vpop.f32.mrb[28].mxu1 }
 0xad6   : > { %12862 = vst.msk [vmem:[%s17625_s19 + $0xc0] sm:$0xff] %vm720_vm1, %v12826_v13  ;;  %v12756_v24 = vadd.f32 %v17074_v46, %v20118_v54  ;;  %v16459_v19 = vpop.f32.mrb[28].mxu0  ;;  %v10949_v50 = vpop.f32.mrb[29].mxu1 }
 0xad7   : > { %v12829_v37 = vadd.f32 %v12793_v4, %v12757_v52  ;;  %v17075_v9 = vadd.f32 %v16459_v19, %v16235_v62  ;;  %v12649_v20 = vpop.f32.mrb[29].mxu0 }
 0xad8   : > { %v12828_v16 = vadd.f32 %v12792_v47, %v12756_v24  ;;  %v17076_v61 = vadd.f32 %v12649_v20, %v10949_v50 }
 0xad9   : > { %12865 = vst.msk [vmem:[%s17625_s19 + $0xd8] sm:$0xff] %vm720_vm1, %v12829_v37  ;;  %v12759_v15 = vadd.f32 %v17075_v9, %v20118_v54  ;;  %v16238_v12 = vpop.f32.mrb[30].mxu1 }
 0xada   : > { %12864 = vst.msk [vmem:[%s17625_s19 + $0xd0] sm:$0xff] %vm720_vm1, %v12828_v16  ;;  %v12758_v21 = vadd.f32 %v17076_v61, %v20118_v54  ;;  %v16462_v57 = vpop.f32.mrb[30].mxu0  ;;  %v10959_v3 = vpop.f32.mrb[31].mxu1 }
 0xadb   : > { %v12831_v0 = vadd.f32 %v12795_v35, %v12759_v15  ;;  %v17077_v49 = vadd.f32 %v16462_v57, %v16238_v12  ;;  %v12659_v39 = vpop.f32.mrb[31].mxu0 }
 0xadc   : > { %v12830_v51 = vadd.f32 %v12794_v14, %v12758_v21  ;;  %v17078_v45 = vadd.f32 %v12659_v39, %v10959_v3 }
 0xadd   : > { %12867 = vst.msk [vmem:[%s17625_s19 + $0xe8] sm:$0xff] %vm720_vm1, %v12831_v0  ;;  %v12761_v11 = vadd.f32 %v17077_v49, %v20118_v54  ;;  %v16241_v58 = vpop.f32.mrb[32].mxu1 }
 0xade   : > { %12866 = vst.msk [vmem:[%s17625_s19 + $0xe0] sm:$0xff] %vm720_vm1, %v12830_v51  ;;  %v12760_v63 = vadd.f32 %v17078_v45, %v20118_v54  ;;  %v16465_v17 = vpop.f32.mrb[32].mxu0  ;;  %v10969_v40 = vpop.f32.mrb[33].mxu1 }
 0xadf   : > { %v12833_v33 = vadd.f32 %v12797_v55, %v12761_v11  ;;  %v17079_v18 = vadd.f32 %v16465_v17, %v16241_v58  ;;  %v12669_v42 = vpop.f32.mrb[33].mxu0 }
 0xae0   : > { %v12832_v38 = vadd.f32 %v12796_v36, %v12760_v63  ;;  %v17080_v22 = vadd.f32 %v12669_v42, %v10969_v40 }
 0xae1   : > { %12869 = vst.msk [vmem:[%s17625_s19 + $0xf8] sm:$0xff] %vm720_vm1, %v12833_v33  ;;  %v12763_v8 = vadd.f32 %v17079_v18, %v20118_v54  ;;  %v16244_v48 = vpop.f32.mrb[34].mxu1 }
 0xae2   : > { %12868 = vst.msk [vmem:[%s17625_s19 + $0xf0] sm:$0xff] %vm720_vm1, %v12832_v38  ;;  %v12762_v26 = vadd.f32 %v17080_v22, %v20118_v54  ;;  %v16468_v25 = vpop.f32.mrb[34].mxu0  ;;  %v10979_v30 = vpop.f32.mrb[35].mxu1 }
 0xae3   : > { %v12835_v23 = vadd.f32 %v12799_v34, %v12763_v8  ;;  %v17081_v27 = vadd.f32 %v16468_v25, %v16244_v48  ;;  %v12679_v31 = vpop.f32.mrb[35].mxu0 }
 0xae4   : > { %v12834_v1 = vadd.f32 %v12798_v10, %v12762_v26  ;;  %v17082_v32 = vadd.f32 %v12679_v31, %v10979_v30 }
 0xae5   : > { %12871 = vst.msk [vmem:[%s17625_s19 + $0x108] sm:$0xff] %vm720_vm1, %v12835_v23  ;;  %v12765_v44 = vadd.f32 %v17081_v27, %v20118_v54 }
 0xae6   : > { %12870 = vst.msk [vmem:[%s17625_s19 + $0x100] sm:$0xff] %vm720_vm1, %v12834_v1  ;;  %v12764_v60 = vadd.f32 %v17082_v32, %v20118_v54 }
 0xae7   : > { %v12837_v6 = vadd.f32 %v12801_v29, %v12765_v44 }
 0xae8   : > { %v12836_v28 = vadd.f32 %v12800_v43, %v12764_v60 }
 0xae9   : > { %12873 = vst.msk [vmem:[%s17625_s19 + $0x118] sm:$0xff] %vm720_vm1, %v12837_v6 }
 0xaea   : > { %12872 = vst.msk [vmem:[%s17625_s19 + $0x110] sm:$0xff] %vm720_vm1, %v12836_v28 }
 0xaeb PF: > { %s22_s25 = sadd.s32 1, %s17424_s25   ;;  %s20361_s29 = sld [smem:[#allocation4_spill]] }
 0xaec   : > { %p19_p8 = scmp.ge.s32.totalorder %s22_s25, 6   ;;  %s20362_s21 = smov %s17416_s23 }
 0xaed   : > { %s20363_s22 = smov %s17420_s24  ;;  %s20364_s23 = smov %s20367_s26 }
 0xaee   :  { %21 = sbr.rel (!%p19_p8) target bundleno = 3 (0x3), region = 114 }
 0xaf1   : > { %s20365_s24 = smov %s20361_s29 }

</bundles_post_ra>
